<compile_context>
chip_gen: v6e
topology: v6e:2x2x1
jax: 0.10.0
libtpu: 0.0.40
codegen_flags: <defaults>
</compile_context>

<pallas_src>
import functools

import jax
import jax.numpy as jnp
from jax.experimental import pallas as pl
from jax.experimental.pallas import tpu as pltpu

LANE = 128
SUBLANE = 8
_MIB = 1024 * 1024


def _round_up(x, m):
    return ((x + m - 1) // m) * m


def _pick_tile(dim_p, cap):
    """Largest multiple of 128 <= cap that divides dim_p (dim_p % 128 == 0)."""
    t = min(dim_p, cap)
    while dim_p % t:
        t -= LANE
    return t


def _pick_batch_tiling(m, cap=256):
    """Pad M to a sublane multiple, then pick a batch tile.

    Prefers an exact divisor of Mp (no padded rows beyond the sublane round-up);
    if the best exact divisor is tiny, accepts bounded (< cap rows) padding.
    """
    mp = _round_up(max(m, 1), SUBLANE)
    tm = min(mp, cap)
    while mp % tm:
        tm -= SUBLANE
    if mp > cap and tm < 64:
        tm = cap
        mp = _round_up(mp, cap)
    return mp, tm


def _vmem_capacity_bytes():
    """Per-core VMEM capacity (generation-aware), conservative default if unknown."""
    try:
        cap = int(getattr(pltpu.get_tpu_info(), "vmem_capacity_bytes", 0))
        if cap > 0:
            return cap
    except Exception:
        pass
    return 64 * _MIB   # conservative (v7x per-TC); v5e/v6e have 128 MiB


# ----------------------------------------------------------------------------
# Fused kernel: one grid point does fc1+ReLU -> fc2+ReLU -> fc3 for a batch tile.
# Weights/biases are VMEM-resident (single-buffered); intermediates never touch HBM.
# ----------------------------------------------------------------------------
def _fused_mlp_kernel(x_ref, w1_ref, b1_ref, w2_ref, b2_ref, w3_ref, b3_ref,
                      o_ref):
    wdt = w1_ref.dtype
    # fc1 + ReLU   (drop_in: identity, eval mode)
    h = jnp.dot(x_ref[...].astype(wdt), w1_ref[...],
                preferred_element_type=jnp.float32) + b1_ref[...]
    h = jnp.maximum(h, 0.0)
    # fc2 + ReLU   (drop: identity, eval mode)
    h = jnp.dot(h.astype(wdt), w2_ref[...],
                preferred_element_type=jnp.float32) + b2_ref[...]
    h = jnp.maximum(h, 0.0)
    # fc3 (no activation)
    out = jnp.dot(h.astype(wdt), w3_ref[...],
                  preferred_element_type=jnp.float32) + b3_ref[...]
    o_ref[...] = out.astype(o_ref.dtype)


# ----------------------------------------------------------------------------
# Fallback kernel (huge hidden dims): tiled matmul, K-accumulation directly in
# the resident output block (no scratch accumulator).
# ----------------------------------------------------------------------------
def _linear_kernel(x_ref, w_ref, b_ref, o_ref, *, relu: bool):
    k = pl.program_id(2)

    @pl.when(k == 0)
    def _():
        o_ref[...] = jnp.broadcast_to(b_ref[...], o_ref.shape)   # bias init

    o_ref[...] += jnp.dot(x_ref[...].astype(w_ref.dtype), w_ref[...],
                          preferred_element_type=jnp.float32)

    if relu:
        @pl.when(k == pl.num_programs(2) - 1)
        def _():
            o_ref[...] = jnp.maximum(o_ref[...], 0.0)


def _pallas_linear_padded(xp, wp, bp, *, relu, tm, vmem_limit):
    """act(xp @ wp + bp) on pre-padded operands; returns padded (Mp, Np)."""
    Mp, Kp = xp.shape
    _, Np = wp.shape
    tk = _pick_tile(Kp, 512)
    tn = _pick_tile(Np, 512)
    kernel = functools.partial(_linear_kernel, relu=relu)
    return pl.pallas_call(
        kernel,
        out_shape=jax.ShapeDtypeStruct((Mp, Np), jnp.float32),
        grid_spec=pltpu.PrefetchScalarGridSpec(
            num_scalar_prefetch=0,
            grid=(Mp // tm, Np // tn, Kp // tk),
            in_specs=[
                pl.BlockSpec((tm, tk), lambda i, j, k: (i, k)),
                pl.BlockSpec((tk, tn), lambda i, j, k: (k, j)),
                pl.BlockSpec((1, tn), lambda i, j, k: (0, j)),
            ],
            out_specs=pl.BlockSpec((tm, tn), lambda i, j, k: (i, j)),
        ),
        compiler_params=pltpu.CompilerParams(
            dimension_semantics=("parallel", "parallel", "arbitrary"),
            vmem_limit_bytes=vmem_limit,
        ),
    )(xp, wp, bp)


# ----------------------------------------------------------------------------
# Parameter init (PyTorch parity: Xavier-normal weights, uniform(-1,0) biases).
# Weights stored as (D_in, D_out), i.e. transposed vs nn.Linear.weight.
# ----------------------------------------------------------------------------
def init_expression_nn_params(key, d_in, h1, h2, d_out):
    ks = jax.random.split(key, 6)

    def xavier_normal(k, fan_in, fan_out):
        std = (2.0 / (fan_in + fan_out)) ** 0.5
        return jax.random.normal(k, (fan_in, fan_out), jnp.float32) * std

    def bias_uniform(k, n):
        return jax.random.uniform(k, (n,), jnp.float32, minval=-1.0, maxval=0.0)

    return {
        "w1": xavier_normal(ks[0], d_in, h1),  "b1": bias_uniform(ks[1], h1),
        "w2": xavier_normal(ks[2], h1, h2),    "b2": bias_uniform(ks[3], h2),
        "w3": xavier_normal(ks[4], h2, d_out), "b3": bias_uniform(ks[5], d_out),
    }


def _pad2(a, rows, cols, dtype):
    return jnp.zeros((rows, cols), dtype).at[:a.shape[0], :a.shape[1]].set(
        a.astype(dtype))


def _pad_bias(b, cols):
    return jnp.zeros((1, cols), jnp.float32).at[0, :b.shape[0]].set(b)


def prepare_expression_nn(params, weights_dtype=jnp.float32):
    """Pad (and optionally down-cast) weights/biases ONCE, hoisted out of forward."""
    d_in, h1 = params["w1"].shape
    _, h2 = params["w2"].shape
    _, d_out = params["w3"].shape
    Kp, H1p = _round_up(d_in, LANE), _round_up(h1, LANE)
    H2p, Np = _round_up(h2, LANE), _round_up(d_out, LANE)
    return {
        "dims": (d_in, h1, h2, d_out),
        "padded_dims": (Kp, H1p, H2p, Np),
        "weights_dtype": weights_dtype,
        "w1": _pad2(params["w1"], Kp, H1p, weights_dtype),
        "b1": _pad_bias(params["b1"], H1p),
        "w2": _pad2(params["w2"], H1p, H2p, weights_dtype),
        "b2": _pad_bias(params["b2"], H2p),
        "w3": _pad2(params["w3"], H2p, Np, weights_dtype),
        "b3": _pad_bias(params["b3"], Np),
    }


# ----------------------------------------------------------------------------
# Forward pass
# ----------------------------------------------------------------------------
def expression_nn_forward(model, x, *, vmem_budget_bytes=None,
                          single_buffer_weights=True):
    d_in, h1, h2, d_out = model["dims"]
    Kp, H1p, H2p, Np = model["padded_dims"]
    w_bytes = jnp.dtype(model["weights_dtype"]).itemsize

    M = x.shape[0]
    Mp, tm = _pick_batch_tiling(M)
    grid_m = Mp // tm
    xp = jnp.zeros((Mp, Kp), jnp.float32).at[:M, :d_in].set(x)

    # Generation-aware VMEM limit (v5e/v6e: 128 MiB, v7x: 64 MiB per core).
    vmem_cap = _vmem_capacity_bytes()
    vmem_limit = int(vmem_cap * 13 // 16)          # headroom for Mosaic internals

    weight_elems = Kp * H1p + H1p * H2p + H2p * Np
    bias_elems = H1p + H2p + Np
    weight_bufs = 1 if single_buffer_weights else 2
    fused_bytes = (
        weight_bufs * (w_bytes * weight_elems + 4 * bias_elems)   # resident params
        + 2 * 4 * tm * (Kp + Np)                                  # x/out tiles (2-buf)
        + 4 * tm * (H1p + H2p)                                    # intermediates
    )
    budget = (vmem_limit - 2 * _MIB) if vmem_budget_bytes is None else vmem_budget_bytes

    if fused_bytes <= budget:
        # Resident-param specs: constant index_map across the grid -> one buffer.
        if single_buffer_weights:
            def wspec(shape):
                return pl.BlockSpec(shape, lambda i: (0, 0),
                                    pipeline_mode=pl.Buffered(1))
        else:
            def wspec(shape):
                return pl.BlockSpec(shape, lambda i: (0, 0))

        # Small batch is weight-bandwidth bound: keep "arbitrary" so megacore does
        # not duplicate resident weights into both TCs; "parallel" once compute-bound.
        semantics = "parallel" if (grid_m >= 2 and Mp >= 512) else "arbitrary"

        cost = pl.CostEstimate(
            flops=2 * Mp * weight_elems,
            transcendentals=0,
            bytes_accessed=int(w_bytes * weight_elems + 4 * bias_elems
                               + 4 * Mp * (Kp + Np)),
        )

        out = pl.pallas_call(
            _fused_mlp_kernel,
            out_shape=jax.ShapeDtypeStruct((Mp, Np), jnp.float32),
            grid_spec=pltpu.PrefetchScalarGridSpec(
                num_scalar_prefetch=0,
                grid=(grid_m,),
                in_specs=[
                    pl.BlockSpec((tm, Kp), lambda i: (i, 0)),
                    wspec((Kp, H1p)), wspec((1, H1p)),
                    wspec((H1p, H2p)), wspec((1, H2p)),
                    wspec((H2p, Np)), wspec((1, Np)),
                ],
                out_specs=pl.BlockSpec((tm, Np), lambda i: (i, 0)),
            ),
            compiler_params=pltpu.CompilerParams(
                dimension_semantics=(semantics,),
                vmem_limit_bytes=vmem_limit,
            ),
            cost_estimate=cost,
        )(xp, model["w1"], model["b1"], model["w2"], model["b2"],
          model["w3"], model["b3"])
    else:
        # Fallback for configs whose resident weights overflow VMEM (e.g. the
        # module's full H1=8192/H2=4096 defaults in f32 on v7x): tiled layers,
        # intermediates stay padded between layers (padded cols are exact 0s).
        h = _pallas_linear_padded(xp, model["w1"], model["b1"], relu=True,
                                  tm=tm, vmem_limit=vmem_limit)
        h = _pallas_linear_padded(h, model["w2"], model["b2"], relu=True,
                                  tm=tm, vmem_limit=vmem_limit)
        out = _pallas_linear_padded(h, model["w3"], model["b3"], relu=False,
                                    tm=tm, vmem_limit=vmem_limit)

    return out[:M, :d_out]


def expression_nn_reference(params, x, weights_dtype=jnp.float32):
    """Pure-JAX reference (eval-mode dropout == identity), mirroring the kernel's
    weight-storage dtype so bf16 parity can also be checked."""
    hp = jax.lax.Precision.HIGHEST
    q = lambda a: a.astype(weights_dtype).astype(jnp.float32)
    h = jnp.maximum(jnp.dot(q(x), q(params["w1"]), precision=hp) + params["b1"], 0.0)
    h = jnp.maximum(jnp.dot(q(h), q(params["w2"]), precision=hp) + params["b2"], 0.0)
    return jnp.dot(q(h), q(params["w3"]), precision=hp) + params["b3"]


if __name__ == "__main__":
    # Small-but-faithful shapes: keep D_in=926 / D_out=2 from the module,
    # shrink the hidden layers for a quick synthetic run.
    B, D_IN, H1, H2, D_OUT = 8, 926, 512, 256, 2

    key = jax.random.PRNGKey(0)
    pkey, xkey, xkey2 = jax.random.split(key, 3)

    params = init_expression_nn_params(pkey, D_IN, H1, H2, D_OUT)
    x = jax.random.normal(xkey, (B, D_IN), jnp.float32)

    def run(model, xin, **kw):
        try:
            return jax.block_until_ready(expression_nn_forward(model, xin, **kw))
        except Exception:
            # Defensive retry with default double-buffered weight specs in case
            # pipeline_mode=pl.Buffered(1) is unsupported by this Pallas build.
            return jax.block_until_ready(
                expression_nn_forward(model, xin, single_buffer_weights=False, **kw))

    # --- f32 weights: fused single-kernel path --------------------------------
    model_f32 = prepare_expression_nn(params)              # padding hoisted here
    ref = expression_nn_reference(params, x)
    out = run(model_f32, x)
    assert out.shape == (B, D_OUT), out.shape
    assert jnp.allclose(out, ref, atol=2e-3, rtol=2e-3), "fused f32 mismatch"

    # --- f32 weights: tiled 3-call fallback (forced via tiny budget) ----------
    out_fb = run(model_f32, x, vmem_budget_bytes=1)
    assert jnp.allclose(out_fb, ref, atol=2e-3, rtol=2e-3), "fallback mismatch"

    # --- multi-tile batch grid (exercises the fixed tm/Mp selection) ----------
    x_big = jax.random.normal(xkey2, (260, D_IN), jnp.float32)
    ref_big = expression_nn_reference(params, x_big)
    out_big = run(model_f32, x_big)
    assert out_big.shape == (260, D_OUT), out_big.shape
    assert jnp.allclose(out_big, ref_big, atol=2e-3, rtol=2e-3), "batched mismatch"

    # --- bf16 weight storage (half HBM weight traffic / VMEM residency) -------
    model_bf16 = prepare_expression_nn(params, weights_dtype=jnp.bfloat16)
    ref_bf16 = expression_nn_reference(params, x, weights_dtype=jnp.bfloat16)
    out_bf16 = run(model_bf16, x)
    assert jnp.allclose(out_bf16, ref_bf16, atol=1e-2, rtol=1e-2), "bf16 mismatch"

    print("KERNEL_OK")
</pallas_src>

<mosaic_0001>
module attributes {stable_mosaic.version = 11 : i64} {
  func.func @_fused_mlp_kernel(%arg0: i32, %arg1: memref<8x1024xf32, #tpu.memory_space<vmem>>, %arg2: memref<1024x512xf32, #tpu.memory_space<vmem>>, %arg3: memref<1x512xf32, #tpu.memory_space<vmem>>, %arg4: memref<512x256xf32, #tpu.memory_space<vmem>>, %arg5: memref<1x256xf32, #tpu.memory_space<vmem>>, %arg6: memref<256x128xf32, #tpu.memory_space<vmem>>, %arg7: memref<1x128xf32, #tpu.memory_space<vmem>>, %arg8: memref<8x128xf32, #tpu.memory_space<vmem>>) attributes {dimension_semantics = [#tpu.dimension_semantics<arbitrary>], iteration_bounds = array<i64: 1>, scalar_prefetch = 0 : i64, scratch_operands = 0 : i64, tpu.core_type = #tpu.core_type<tc>, window_params = [{transform_indices = @transform_0, window_bounds = array<i64: 8, 1024>}, {pipeline_mode = #tpu.pipeline_mode<synchronous>, transform_indices = @transform_1, window_bounds = array<i64: 1024, 512>}, {pipeline_mode = #tpu.pipeline_mode<synchronous>, transform_indices = @transform_2, window_bounds = array<i64: 1, 512>}, {pipeline_mode = #tpu.pipeline_mode<synchronous>, transform_indices = @transform_3, window_bounds = array<i64: 512, 256>}, {pipeline_mode = #tpu.pipeline_mode<synchronous>, transform_indices = @transform_4, window_bounds = array<i64: 1, 256>}, {pipeline_mode = #tpu.pipeline_mode<synchronous>, transform_indices = @transform_5, window_bounds = array<i64: 256, 128>}, {pipeline_mode = #tpu.pipeline_mode<synchronous>, transform_indices = @transform_6, window_bounds = array<i64: 1, 128>}, {transform_indices = @transform_7, window_bounds = array<i64: 8, 128>}]} {
    %c0 = arith.constant 0 : index
    %c0_0 = arith.constant 0 : index
    %0 = vector.load %arg1[%c0, %c0_0] : memref<8x1024xf32, #tpu.memory_space<vmem>>, vector<8x1024xf32>
    %c0_1 = arith.constant 0 : index
    %c0_2 = arith.constant 0 : index
    %1 = vector.load %arg2[%c0_1, %c0_2] : memref<1024x512xf32, #tpu.memory_space<vmem>>, vector<1024x512xf32>
    %cst = arith.constant dense<0.000000e+00> : vector<8x512xf32>
    %2 = tpu.matmul %0, %1, %cst {dimension_numbers = #tpu.dot_dimension_numbers<[1], [0], [0], [1], [0, 0, 1, 1], [], []>} : vector<8x1024xf32>, vector<1024x512xf32>, vector<8x512xf32> -> vector<8x512xf32>
    %c0_3 = arith.constant 0 : index
    %c0_4 = arith.constant 0 : index
    %3 = vector.load %arg3[%c0_3, %c0_4] : memref<1x512xf32, #tpu.memory_space<vmem>>, vector<1x512xf32>
    %4 = vector.broadcast %3 : vector<1x512xf32> to vector<8x512xf32>
    %5 = arith.addf %2, %4 : vector<8x512xf32>
    %cst_5 = arith.constant 0.000000e+00 : f32
    %6 = vector.broadcast %cst_5 : f32 to vector<8x512xf32>
    %7 = arith.maximumf %5, %6 : vector<8x512xf32>
    %c0_6 = arith.constant 0 : index
    %c0_7 = arith.constant 0 : index
    %8 = vector.load %arg4[%c0_6, %c0_7] : memref<512x256xf32, #tpu.memory_space<vmem>>, vector<512x256xf32>
    %cst_8 = arith.constant dense<0.000000e+00> : vector<8x256xf32>
    %9 = tpu.matmul %7, %8, %cst_8 {dimension_numbers = #tpu.dot_dimension_numbers<[1], [0], [0], [1], [0, 0, 1, 1], [], []>} : vector<8x512xf32>, vector<512x256xf32>, vector<8x256xf32> -> vector<8x256xf32>
    %c0_9 = arith.constant 0 : index
    %c0_10 = arith.constant 0 : index
    %10 = vector.load %arg5[%c0_9, %c0_10] : memref<1x256xf32, #tpu.memory_space<vmem>>, vector<1x256xf32>
    %11 = vector.broadcast %10 : vector<1x256xf32> to vector<8x256xf32>
    %12 = arith.addf %9, %11 : vector<8x256xf32>
    %cst_11 = arith.constant 0.000000e+00 : f32
    %13 = vector.broadcast %cst_11 : f32 to vector<8x256xf32>
    %14 = arith.maximumf %12, %13 : vector<8x256xf32>
    %c0_12 = arith.constant 0 : index
    %c0_13 = arith.constant 0 : index
    %15 = vector.load %arg6[%c0_12, %c0_13] : memref<256x128xf32, #tpu.memory_space<vmem>>, vector<256x128xf32>
    %cst_14 = arith.constant dense<0.000000e+00> : vector<8x128xf32>
    %16 = tpu.matmul %14, %15, %cst_14 {dimension_numbers = #tpu.dot_dimension_numbers<[1], [0], [0], [1], [0, 0, 1, 1], [], []>} : vector<8x256xf32>, vector<256x128xf32>, vector<8x128xf32> -> vector<8x128xf32>
    %c0_15 = arith.constant 0 : index
    %c0_16 = arith.constant 0 : index
    %17 = vector.load %arg7[%c0_15, %c0_16] : memref<1x128xf32, #tpu.memory_space<vmem>>, vector<1x128xf32>
    %18 = vector.broadcast %17 : vector<1x128xf32> to vector<8x128xf32>
    %19 = arith.addf %16, %18 : vector<8x128xf32>
    %c0_17 = arith.constant 0 : index
    %c0_18 = arith.constant 0 : index
    %20 = vector.load %arg8[%c0_17, %c0_18] : memref<8x128xf32, #tpu.memory_space<vmem>>, vector<8x128xf32>
    tpu.vector_store %arg8[%c0_17, %c0_18], %19 {strides = array<i32>} : memref<8x128xf32, #tpu.memory_space<vmem>>, vector<8x128xf32>,
    return
  }
  func.func @transform_0(%arg0: i32) -> (i32, i32) {
    %c0_i32 = arith.constant 0 : i32
    %c0_i32_0 = arith.constant 0 : i32
    return %arg0, %c0_i32 : i32, i32
  }
  func.func @transform_1(%arg0: i32) -> (i32, i32) {
    %c0_i32 = arith.constant 0 : i32
    %c0_i32_0 = arith.constant 0 : i32
    %c0_i32_1 = arith.constant 0 : i32
    return %c0_i32, %c0_i32_0 : i32, i32
  }
  func.func @transform_2(%arg0: i32) -> (i32, i32) {
    %c0_i32 = arith.constant 0 : i32
    %c0_i32_0 = arith.constant 0 : i32
    %c0_i32_1 = arith.constant 0 : i32
    return %c0_i32, %c0_i32_0 : i32, i32
  }
  func.func @transform_3(%arg0: i32) -> (i32, i32) {
    %c0_i32 = arith.constant 0 : i32
    %c0_i32_0 = arith.constant 0 : i32
    %c0_i32_1 = arith.constant 0 : i32
    return %c0_i32, %c0_i32_0 : i32, i32
  }
  func.func @transform_4(%arg0: i32) -> (i32, i32) {
    %c0_i32 = arith.constant 0 : i32
    %c0_i32_0 = arith.constant 0 : i32
    %c0_i32_1 = arith.constant 0 : i32
    return %c0_i32, %c0_i32_0 : i32, i32
  }
  func.func @transform_5(%arg0: i32) -> (i32, i32) {
    %c0_i32 = arith.constant 0 : i32
    %c0_i32_0 = arith.constant 0 : i32
    %c0_i32_1 = arith.constant 0 : i32
    return %c0_i32, %c0_i32_0 : i32, i32
  }
  func.func @transform_6(%arg0: i32) -> (i32, i32) {
    %c0_i32 = arith.constant 0 : i32
    %c0_i32_0 = arith.constant 0 : i32
    %c0_i32_1 = arith.constant 0 : i32
    return %c0_i32, %c0_i32_0 : i32, i32
  }
  func.func @transform_7(%arg0: i32) -> (i32, i32) {
    %c0_i32 = arith.constant 0 : i32
    %c0_i32_0 = arith.constant 0 : i32
    return %arg0, %c0_i32 : i32, i32
  }
}

module attributes {stable_mosaic.version = 11 : i64} {
  func.func @_fused_mlp_kernel(%arg0: i32, %arg1: memref<8x1024xf32, #tpu.memory_space<vmem>>, %arg2: memref<1024x512xf32, #tpu.memory_space<vmem>>, %arg3: memref<1x512xf32, #tpu.memory_space<vmem>>, %arg4: memref<512x256xf32, #tpu.memory_space<vmem>>, %arg5: memref<1x256xf32, #tpu.memory_space<vmem>>, %arg6: memref<256x128xf32, #tpu.memory_space<vmem>>, %arg7: memref<1x128xf32, #tpu.memory_space<vmem>>, %arg8: memref<8x128xf32, #tpu.memory_space<vmem>>) attributes {dimension_semantics = [#tpu.dimension_semantics<arbitrary>], iteration_bounds = array<i64: 1>, scalar_prefetch = 0 : i64, scratch_operands = 0 : i64, tpu.core_type = #tpu.core_type<tc>, window_params = [{transform_indices = @transform_0, window_bounds = array<i64: 8, 1024>}, {pipeline_mode = #tpu.pipeline_mode<synchronous>, transform_indices = @transform_1, window_bounds = array<i64: 1024, 512>}, {pipeline_mode = #tpu.pipeline_mode<synchronous>, transform_indices = @transform_2, window_bounds = array<i64: 1, 512>}, {pipeline_mode = #tpu.pipeline_mode<synchronous>, transform_indices = @transform_3, window_bounds = array<i64: 512, 256>}, {pipeline_mode = #tpu.pipeline_mode<synchronous>, transform_indices = @transform_4, window_bounds = array<i64: 1, 256>}, {pipeline_mode = #tpu.pipeline_mode<synchronous>, transform_indices = @transform_5, window_bounds = array<i64: 256, 128>}, {pipeline_mode = #tpu.pipeline_mode<synchronous>, transform_indices = @transform_6, window_bounds = array<i64: 1, 128>}, {transform_indices = @transform_7, window_bounds = array<i64: 8, 128>}]} {
    %c0 = arith.constant 0 : index
    %c0_0 = arith.constant 0 : index
    %0 = vector.load %arg1[%c0, %c0_0] : memref<8x1024xf32, #tpu.memory_space<vmem>>, vector<8x1024xf32>
    %c0_1 = arith.constant 0 : index
    %c0_2 = arith.constant 0 : index
    %1 = vector.load %arg2[%c0_1, %c0_2] : memref<1024x512xf32, #tpu.memory_space<vmem>>, vector<1024x512xf32>
    %cst = arith.constant dense<0.000000e+00> : vector<8x512xf32>
    %2 = tpu.matmul %0, %1, %cst {dimension_numbers = #tpu.dot_dimension_numbers<[1], [0], [0], [1], [0, 0, 1, 1], [], []>} : vector<8x1024xf32>, vector<1024x512xf32>, vector<8x512xf32> -> vector<8x512xf32>
    %c0_3 = arith.constant 0 : index
    %c0_4 = arith.constant 0 : index
    %3 = vector.load %arg3[%c0_3, %c0_4] : memref<1x512xf32, #tpu.memory_space<vmem>>, vector<1x512xf32>
    %4 = vector.broadcast %3 : vector<1x512xf32> to vector<8x512xf32>
    %5 = arith.addf %2, %4 : vector<8x512xf32>
    %cst_5 = arith.constant 0.000000e+00 : f32
    %6 = vector.broadcast %cst_5 : f32 to vector<8x512xf32>
    %7 = arith.maximumf %5, %6 : vector<8x512xf32>
    %c0_6 = arith.constant 0 : index
    %c0_7 = arith.constant 0 : index
    %8 = vector.load %arg4[%c0_6, %c0_7] : memref<512x256xf32, #tpu.memory_space<vmem>>, vector<512x256xf32>
    %cst_8 = arith.constant dense<0.000000e+00> : vector<8x256xf32>
    %9 = tpu.matmul %7, %8, %cst_8 {dimension_numbers = #tpu.dot_dimension_numbers<[1], [0], [0], [1], [0, 0, 1, 1], [], []>} : vector<8x512xf32>, vector<512x256xf32>, vector<8x256xf32> -> vector<8x256xf32>
    %c0_9 = arith.constant 0 : index
    %c0_10 = arith.constant 0 : index
    %10 = vector.load %arg5[%c0_9, %c0_10] : memref<1x256xf32, #tpu.memory_space<vmem>>, vector<1x256xf32>
    %11 = vector.broadcast %10 : vector<1x256xf32> to vector<8x256xf32>
    %12 = arith.addf %9, %11 : vector<8x256xf32>
    %cst_11 = arith.constant 0.000000e+00 : f32
    %13 = vector.broadcast %cst_11 : f32 to vector<8x256xf32>
    %14 = arith.maximumf %12, %13 : vector<8x256xf32>
    %c0_12 = arith.constant 0 : index
    %c0_13 = arith.constant 0 : index
    %15 = vector.load %arg6[%c0_12, %c0_13] : memref<256x128xf32, #tpu.memory_space<vmem>>, vector<256x128xf32>
    %cst_14 = arith.constant dense<0.000000e+00> : vector<8x128xf32>
    %16 = tpu.matmul %14, %15, %cst_14 {dimension_numbers = #tpu.dot_dimension_numbers<[1], [0], [0], [1], [0, 0, 1, 1], [], []>} : vector<8x256xf32>, vector<256x128xf32>, vector<8x128xf32> -> vector<8x128xf32>
    %c0_15 = arith.constant 0 : index
    %c0_16 = arith.constant 0 : index
    %17 = vector.load %arg7[%c0_15, %c0_16] : memref<1x128xf32, #tpu.memory_space<vmem>>, vector<1x128xf32>
    %18 = vector.broadcast %17 : vector<1x128xf32> to vector<8x128xf32>
    %19 = arith.addf %16, %18 : vector<8x128xf32>
    %c0_17 = arith.constant 0 : index
    %c0_18 = arith.constant 0 : index
    %20 = vector.load %arg8[%c0_17, %c0_18] : memref<8x128xf32, #tpu.memory_space<vmem>>, vector<8x128xf32>
    tpu.vector_store %arg8[%c0_17, %c0_18], %19 {strides = array<i32>} : memref<8x128xf32, #tpu.memory_space<vmem>>, vector<8x128xf32>,
    return
  }
  func.func @transform_0(%arg0: i32) -> (i32, i32) {
    %c0_i32 = arith.constant 0 : i32
    %c0_i32_0 = arith.constant 0 : i32
    return %arg0, %c0_i32 : i32, i32
  }
  func.func @transform_1(%arg0: i32) -> (i32, i32) {
    %c0_i32 = arith.constant 0 : i32
    %c0_i32_0 = arith.constant 0 : i32
    %c0_i32_1 = arith.constant 0 : i32
    return %c0_i32, %c0_i32_0 : i32, i32
  }
  func.func @transform_2(%arg0: i32) -> (i32, i32) {
    %c0_i32 = arith.constant 0 : i32
    %c0_i32_0 = arith.constant 0 : i32
    %c0_i32_1 = arith.constant 0 : i32
    return %c0_i32, %c0_i32_0 : i32, i32
  }
  func.func @transform_3(%arg0: i32) -> (i32, i32) {
    %c0_i32 = arith.constant 0 : i32
    %c0_i32_0 = arith.constant 0 : i32
    %c0_i32_1 = arith.constant 0 : i32
    return %c0_i32, %c0_i32_0 : i32, i32
  }
  func.func @transform_4(%arg0: i32) -> (i32, i32) {
    %c0_i32 = arith.constant 0 : i32
    %c0_i32_0 = arith.constant 0 : i32
    %c0_i32_1 = arith.constant 0 : i32
    return %c0_i32, %c0_i32_0 : i32, i32
  }
  func.func @transform_5(%arg0: i32) -> (i32, i32) {
    %c0_i32 = arith.constant 0 : i32
    %c0_i32_0 = arith.constant 0 : i32
    %c0_i32_1 = arith.constant 0 : i32
    return %c0_i32, %c0_i32_0 : i32, i32
  }
  func.func @transform_6(%arg0: i32) -> (i32, i32) {
    %c0_i32 = arith.constant 0 : i32
    %c0_i32_0 = arith.constant 0 : i32
    %c0_i32_1 = arith.constant 0 : i32
    return %c0_i32, %c0_i32_0 : i32, i32
  }
  func.func @transform_7(%arg0: i32) -> (i32, i32) {
    %c0_i32 = arith.constant 0 : i32
    %c0_i32_0 = arith.constant 0 : i32
    return %arg0, %c0_i32 : i32, i32
  }
}

</mosaic_0001>

<bundles_post_ra>
// kernel: tpu_custom_call.1
= control target key start
LH: loop header
LB: loop body
LE: loop exit
PB: predicated region body
PF: predicated region fallthrough
CT: control target
= control target key end

     0   :  { %12 = vsyncpa [#allocation3], 0  ;;  %s1966_s0 = inlined_call_operand.hbm [shape: f32[8,1024], index: 0, kind: input, shape index: {}]   ;;  %s1967_s1 = inlined_call_operand.hbm [shape: f32[1024,512], index: 1, kind: input, shape index: {}]   ;;  %s1968_s2 = inlined_call_operand.hbm [shape: f32[1,512], index: 2, kind: input, shape index: {}]   ;;  %s1969_s3 = inlined_call_operand.hbm [shape: f32[512,256], index: 3, kind: input, shape index: {}]   ;;  %s1970_s4 = inlined_call_operand.hbm [shape: f32[1,256], index: 4, kind: input, shape index: {}]   ;;  %s1971_s5 = inlined_call_operand.hbm [shape: f32[256,128], index: 5, kind: input, shape index: {}]   ;;  %s1972_s6 = inlined_call_operand.hbm [shape: f32[1,128], index: 6, kind: input, shape index: {}]   ;;  %s1973_s7 = inlined_call_operand.hbm [shape: f32[8,128], index: 7, kind: output, shape index: {}]  }
   0x1   :  { %13 = vsyncpa [#allocation6], 0 }
   0x2   :  { %14 = vsyncpa [#allocation9], 0 }
   0x3   :  { %15 = vsyncpa [#allocation12], 0 }
   0x4   :  { %16 = vsyncpa [#allocation4], 0  ;;  %s1868_s24 = smov [#allocation5]  }
   0x5   :  { %s32_s25 = sshll.u32 %s1868_s24, 4  ;;  %s33_s25 = int_to_ptr.vmem [resolvable:$true] %s32_s25 }
   0x6   :  { %s1706_s26 = scalar_lea.vmem %s33_s25, 65536  ;;  %p1711_p1 = scmp.lt.s32.totalorder %s33_s25, %s33_s25 }
   0x7   :  { %p1707_p0 = scmp.ne.s32.totalorder %s33_s25, %s1706_s26  ;;  %p1712_p2 = scmp.lt.s32.totalorder %s1706_s26, %s1706_s26 }
   0x9   :  { %p1713_p3 = por %p1712_p2, %p1711_p1 }
   0xb   :  { %p1714_p4 = pnand %p1713_p3, %p1707_p0 }
   0xd   :  { %1717 = shalt.err (!%p1714_p4)
}
   0xe   :  { %s1869_s27 = smov 512   ;;  %s1870_s28 = smov 32  }
   0xf   :  { %38 = dma.hbm_to_vmem [thread:$0]  %s1967_s1, 65536, %s33_s25, [#allocation6], %s1869_s27, %s1869_s27, %s1870_s28  }
  0x10   :  { %s1871_s8 = smov [#allocation8]  }
  0x11   :  { %s54_s9 = sshll.u32 %s1871_s8, 4  ;;  %s55_s9 = int_to_ptr.vmem [resolvable:$true] %s54_s9 }
  0x12   :  { %s1726_s10 = scalar_lea.vmem %s55_s9, 16384  ;;  %p1731_p6 = scmp.lt.s32.totalorder %s55_s9, %s55_s9 }
  0x13   :  { %p1727_p5 = scmp.ne.s32.totalorder %s55_s9, %s1726_s10  ;;  %p1732_p7 = scmp.lt.s32.totalorder %s1726_s10, %s1726_s10 }
  0x15   :  { %p1733_p8 = por %p1732_p7, %p1731_p6 }
  0x17   :  { %p1734_p9 = pnand %p1733_p8, %p1727_p5 }
  0x19   :  { %1737 = shalt.err (!%p1734_p9)
}
  0x1a   :  { %s1872_s11 = smov 256   ;;  %s1873_s12 = smov 16  }
  0x1b   :  { %60 = dma.hbm_to_vmem [thread:$0]  %s1969_s3, 16384, %s55_s9, [#allocation9], %s1872_s11, %s1872_s11, %s1873_s12  }
  0x1c   :  { %s1874_s15 = smov [#allocation11]  }
  0x1d   :  { %s76_s16 = sshll.u32 %s1874_s15, 4  ;;  %s77_s16 = int_to_ptr.vmem [resolvable:$true] %s76_s16 }
  0x1e   :  { %s1746_s1 = scalar_lea.vmem %s77_s16, 4096  ;;  %p1751_p11 = scmp.lt.s32.totalorder %s77_s16, %s77_s16 }
  0x1f   :  { %p1747_p10 = scmp.ne.s32.totalorder %s77_s16, %s1746_s1  ;;  %p1752_p12 = scmp.lt.s32.totalorder %s1746_s1, %s1746_s1 }
  0x21   :  { %p1753_p13 = por %p1752_p12, %p1751_p11 }
  0x23   :  { %p1754_p0 = pnand %p1753_p13, %p1747_p10 }
  0x25   :  { %1757 = shalt.err (!%p1754_p0)
}
  0x26   :  { %s1875_s17 = smov 128   ;;  %s1876_s18 = smov 8  }
  0x27   :  { %82 = dma.hbm_to_vmem [thread:$0]  %s1971_s5, 4096, %s77_s16, [#allocation12], %s1875_s17, %s1875_s17, %s1876_s18  }
  0x28   :  { %s1877_s21 = smov [#allocation2]   ;;  %s1878_s3 = smov [#allocation7]  }
  0x29   :  { %s23_s22 = sshll.u32 %s1877_s21, 4  ;;  %s45_s23 = sshll.u32 %s1878_s3, 4  ;;  %s24_s22 = int_to_ptr.vmem [resolvable:$true] %s23_s22  ;;  %s46_s23 = int_to_ptr.vmem [resolvable:$true] %s45_s23 }
  0x2a   :  { %s1766_s24 = scalar_lea.vmem %s24_s22, 1024  ;;  %p1771_p2 = scmp.lt.s32.totalorder %s24_s22, %s24_s22 }
  0x2b   :  { %p1767_p1 = scmp.ne.s32.totalorder %s24_s22, %s1766_s24  ;;  %p1772_p3 = scmp.lt.s32.totalorder %s1766_s24, %s1766_s24 }
  0x2d   :  { %p1773_p4 = por %p1772_p3, %p1771_p2 }
  0x2f   :  { %p1774_p5 = pnand %p1773_p4, %p1767_p1 }
  0x31   :  { %1777 = shalt.err (!%p1774_p5)
}
  0x32   :  { %26 = dma.hbm_to_vmem [thread:$0]  %s1966_s0, 1024, %s24_s22, [#allocation3]  }
  0x33   :  { %s1786_s27 = scalar_lea.vmem %s46_s23, 64  ;;  %p1791_p7 = scmp.lt.s32.totalorder %s46_s23, %s46_s23 }
  0x34   :  { %p1787_p6 = scmp.ne.s32.totalorder %s46_s23, %s1786_s27  ;;  %p1792_p8 = scmp.lt.s32.totalorder %s1786_s27, %s1786_s27 }
  0x36   :  { %p1793_p9 = por %p1792_p8, %p1791_p7 }
  0x38   :  { %p1794_p10 = pnand %p1793_p9, %p1787_p6 }
  0x3a   :  { %1797 = shalt.err (!%p1794_p10)
}
  0x3b   :  { %48 = dma.hbm_to_vmem [thread:$0]  %s1968_s2, 64, %s46_s23, [#allocation6]  }
  0x3c   :  { %s1879_s29 = smov [#allocation10]   ;;  %s1880_s8 = smov [#allocation13]  }
  0x3d   :  { %s67_s30 = sshll.u32 %s1879_s29, 4  ;;  %s89_s9 = sshll.u32 %s1880_s8, 4  ;;  %s68_s30 = int_to_ptr.vmem [resolvable:$true] %s67_s30  ;;  %s90_s9 = int_to_ptr.vmem [resolvable:$true] %s89_s9 }
  0x3e   :  { %s1806_s10 = scalar_lea.vmem %s68_s30, 32  ;;  %p1811_p12 = scmp.lt.s32.totalorder %s68_s30, %s68_s30 }
  0x3f   :  { %p1807_p11 = scmp.ne.s32.totalorder %s68_s30, %s1806_s10  ;;  %p1812_p13 = scmp.lt.s32.totalorder %s1806_s10, %s1806_s10 }
  0x41   :  { %p1813_p0 = por %p1812_p13, %p1811_p12 }
  0x43   :  { %p1814_p1 = pnand %p1813_p0, %p1807_p11 }
  0x45   :  { %1817 = shalt.err (!%p1814_p1)
}
  0x46   :  { %70 = dma.hbm_to_vmem [thread:$0]  %s1970_s4, 32, %s68_s30, [#allocation9]  }
  0x47   :  { %s1826_s12 = scalar_lea.vmem %s90_s9, 16  ;;  %s1830_s2 = scalar_lea.vmem %s90_s9, 32 }
  0x48   :  { %p1827_p2 = scmp.ne.s32.totalorder %s90_s9, %s1826_s12  ;;  %p1831_p3 = scmp.lt.s32.totalorder %s90_s9, %s90_s9 }
  0x49   :  { %p1832_p4 = scmp.lt.s32.totalorder %s1830_s2, %s1826_s12 }
  0x4b   :  { %p1833_p5 = por %p1832_p4, %p1831_p3 }
  0x4d   :  { %p1834_p6 = pnand %p1833_p5, %p1827_p2 }
  0x4f   :  { %1837 = shalt.err (!%p1834_p6)
}
  0x50   :  { %92 = dma.hbm_to_vmem [thread:$0]  %s1972_s6, 16, %s90_s9, [#allocation12]  }
  0x51   :  { %1858 = dma.done.wait [#allocation3], 1024  }
  0x52   :  { %1859 = vsyncadd [#allocation3], 4294966272 }
  0x53   :  { %1860 = dma.done.wait [#allocation6], 65600  }
  0x54   :  { %1861 = vsyncadd [#allocation6], 4294901696 }
  0x55   :  { %1862 = dma.done.wait [#allocation9], 16416  }
  0x56   :  { %1863 = vsyncadd [#allocation9], 4294950880 }
  0x57   :  { %1864 = dma.done.wait [#allocation12], 4112  }
  0x58   :  { %1865 = vsyncadd [#allocation12], 4294963184  ;;  %v183_v0 = vld [vmem:[#allocation5 + $0x1e8] sm:$0xff]  ;;  %v182_v2 = vld [vmem:[#allocation5 + $0x1e0] sm:$0xff]  ;;  %s1881_s4 = smov [#allocation14]  }
  0x59   :  { %v311_v1 = vld [vmem:[#allocation5 + $0x5e8] sm:$0xff]  ;;  %656 = vmatprep.subr.mxu0 %v183_v0  ;;  %v310_v3 = vld [vmem:[#allocation5 + $0x5e0] sm:$0xff]  ;;  %s1628_s6 = sshll.u32 %s1881_s4, 4  ;;  %s1629_s6 = int_to_ptr.vmem [resolvable:$true] %s1628_s6 }
  0x5a   :  { %727 = vmatprep.subr.mxu1 %v311_v1  ;;  %v179_v4 = vld [vmem:[#allocation5 + $0x1c8] sm:$0xff]  ;;  %657 = vmatpush1.msra.mxu0 %v182_v2  ;;  %v178_v6 = vld [vmem:[#allocation5 + $0x1c0] sm:$0xff]  ;;  %s1838_s15 = scalar_lea.vmem %s1629_s6, 128  ;;  %p1843_p8 = scmp.lt.s32.totalorder %s1629_s6, %s1629_s6 }
  0x5b   :  { %v307_v5 = vld [vmem:[#allocation5 + $0x5c8] sm:$0xff]  ;;  %728 = vmatpush1.msra.mxu1 %v310_v3  ;;  %v306_v7 = vld [vmem:[#allocation5 + $0x5c0] sm:$0xff]  ;;  %658 = vmatprep.subr.mxu0 %v179_v4  ;;  %p1839_p7 = scmp.ne.s32.totalorder %s1629_s6, %s1838_s15  ;;  %p1844_p9 = scmp.lt.s32.totalorder %s1838_s15, %s1838_s15 }
  0x5c   :  { %v175_v8 = vld [vmem:[#allocation5 + $0x1a8] sm:$0xff]  ;;  %729 = vmatprep.subr.mxu1 %v307_v5  ;;  %v174_v10 = vld [vmem:[#allocation5 + $0x1a0] sm:$0xff]  ;;  %659 = vmatpush1.msra.mxu0 %v178_v6 }
  0x5d   :  { %v303_v9 = vld [vmem:[#allocation5 + $0x5a8] sm:$0xff]  ;;  %v302_v11 = vld [vmem:[#allocation5 + $0x5a0] sm:$0xff]  ;;  %730 = vmatpush1.msra.mxu1 %v306_v7  ;;  %660 = vmatprep.subr.mxu0 %v175_v8  ;;  %p1845_p10 = por %p1844_p9, %p1843_p8 }
  0x5e   :  { %v171_v12 = vld [vmem:[#allocation5 + $0x188] sm:$0xff]  ;;  %731 = vmatprep.subr.mxu1 %v303_v9  ;;  %v170_v14 = vld [vmem:[#allocation5 + $0x180] sm:$0xff]  ;;  %661 = vmatpush1.msra.mxu0 %v174_v10 }
  0x5f   :  { %v299_v13 = vld [vmem:[#allocation5 + $0x588] sm:$0xff]  ;;  %v298_v15 = vld [vmem:[#allocation5 + $0x580] sm:$0xff]  ;;  %732 = vmatpush1.msra.mxu1 %v302_v11  ;;  %662 = vmatprep.subr.mxu0 %v171_v12  ;;  %p1846_p11 = pnand %p1845_p10, %p1839_p7 }
  0x60   :  { %v167_v16 = vld [vmem:[#allocation5 + $0x168] sm:$0xff]  ;;  %733 = vmatprep.subr.mxu1 %v299_v13  ;;  %v166_v18 = vld [vmem:[#allocation5 + $0x160] sm:$0xff]  ;;  %663 = vmatpush1.msra.mxu0 %v170_v14 }
  0x61   :  { %v295_v17 = vld [vmem:[#allocation5 + $0x568] sm:$0xff]  ;;  %v294_v19 = vld [vmem:[#allocation5 + $0x560] sm:$0xff]  ;;  %734 = vmatpush1.msra.mxu1 %v298_v15  ;;  %664 = vmatprep.subr.mxu0 %v167_v16 }
  0x62   :  { %v163_v20 = vld [vmem:[#allocation5 + $0x148] sm:$0xff]  ;;  %735 = vmatprep.subr.mxu1 %v295_v17  ;;  %v162_v22 = vld [vmem:[#allocation5 + $0x140] sm:$0xff]  ;;  %665 = vmatpush1.msra.mxu0 %v166_v18 }
  0x63   :  { %v291_v21 = vld [vmem:[#allocation5 + $0x548] sm:$0xff]  ;;  %v290_v23 = vld [vmem:[#allocation5 + $0x540] sm:$0xff]  ;;  %736 = vmatpush1.msra.mxu1 %v294_v19  ;;  %666 = vmatprep.subr.mxu0 %v163_v20 }
  0x64   :  { %v159_v24 = vld [vmem:[#allocation5 + $0x128] sm:$0xff]  ;;  %737 = vmatprep.subr.mxu1 %v291_v21  ;;  %v158_v26 = vld [vmem:[#allocation5 + $0x120] sm:$0xff]  ;;  %667 = vmatpush1.msra.mxu0 %v162_v22 }
  0x65   :  { %v287_v25 = vld [vmem:[#allocation5 + $0x528] sm:$0xff]  ;;  %v286_v27 = vld [vmem:[#allocation5 + $0x520] sm:$0xff]  ;;  %738 = vmatpush1.msra.mxu1 %v290_v23  ;;  %668 = vmatprep.subr.mxu0 %v159_v24 }
  0x66   :  { %v155_v28 = vld [vmem:[#allocation5 + $0x108] sm:$0xff]  ;;  %739 = vmatprep.subr.mxu1 %v287_v25  ;;  %v154_v30 = vld [vmem:[#allocation5 + $0x100] sm:$0xff]  ;;  %669 = vmatpush1.msra.mxu0 %v158_v26 }
  0x67   :  { %v283_v29 = vld [vmem:[#allocation5 + $0x508] sm:$0xff]  ;;  %v282_v31 = vld [vmem:[#allocation5 + $0x500] sm:$0xff]  ;;  %740 = vmatpush1.msra.mxu1 %v286_v27  ;;  %670 = vmatprep.subr.mxu0 %v155_v28 }
  0x68   :  { %v151_v32 = vld [vmem:[#allocation5 + $0xe8] sm:$0xff]  ;;  %741 = vmatprep.subr.mxu1 %v283_v29  ;;  %v150_v34 = vld [vmem:[#allocation5 + $0xe0] sm:$0xff]  ;;  %671 = vmatpush1.msra.mxu0 %v154_v30 }
  0x69   :  { %v279_v33 = vld [vmem:[#allocation5 + $0x4e8] sm:$0xff]  ;;  %v278_v35 = vld [vmem:[#allocation5 + $0x4e0] sm:$0xff]  ;;  %742 = vmatpush1.msra.mxu1 %v282_v31  ;;  %672 = vmatprep.subr.mxu0 %v151_v32 }
  0x6a   :  { %v147_v36 = vld [vmem:[#allocation5 + $0xc8] sm:$0xff]  ;;  %743 = vmatprep.subr.mxu1 %v279_v33  ;;  %v146_v38 = vld [vmem:[#allocation5 + $0xc0] sm:$0xff]  ;;  %673 = vmatpush1.msra.mxu0 %v150_v34 }
  0x6b   :  { %v275_v37 = vld [vmem:[#allocation5 + $0x4c8] sm:$0xff]  ;;  %v274_v39 = vld [vmem:[#allocation5 + $0x4c0] sm:$0xff]  ;;  %744 = vmatpush1.msra.mxu1 %v278_v35  ;;  %674 = vmatprep.subr.mxu0 %v147_v36 }
  0x6c   :  { %v143_v40 = vld [vmem:[#allocation5 + $0xa8] sm:$0xff]  ;;  %745 = vmatprep.subr.mxu1 %v275_v37  ;;  %v142_v42 = vld [vmem:[#allocation5 + $0xa0] sm:$0xff]  ;;  %675 = vmatpush1.msra.mxu0 %v146_v38 }
  0x6d   :  { %v271_v41 = vld [vmem:[#allocation5 + $0x4a8] sm:$0xff]  ;;  %v270_v43 = vld [vmem:[#allocation5 + $0x4a0] sm:$0xff]  ;;  %746 = vmatpush1.msra.mxu1 %v274_v39  ;;  %676 = vmatprep.subr.mxu0 %v143_v40 }
  0x6e   :  { %v139_v44 = vld [vmem:[#allocation5 + $0x88] sm:$0xff]  ;;  %747 = vmatprep.subr.mxu1 %v271_v41  ;;  %v138_v46 = vld [vmem:[#allocation5 + $0x80] sm:$0xff]  ;;  %677 = vmatpush1.msra.mxu0 %v142_v42 }
  0x6f   :  { %v267_v45 = vld [vmem:[#allocation5 + $0x488] sm:$0xff]  ;;  %v266_v47 = vld [vmem:[#allocation5 + $0x480] sm:$0xff]  ;;  %748 = vmatpush1.msra.mxu1 %v270_v43  ;;  %678 = vmatprep.subr.mxu0 %v139_v44 }
  0x70   :  { %v135_v48 = vld [vmem:[#allocation5 + $0x68] sm:$0xff]  ;;  %749 = vmatprep.subr.mxu1 %v267_v45  ;;  %v134_v50 = vld [vmem:[#allocation5 + $0x60] sm:$0xff]  ;;  %679 = vmatpush1.msra.mxu0 %v138_v46 }
  0x71   :  { %v263_v49 = vld [vmem:[#allocation5 + $0x468] sm:$0xff]  ;;  %v262_v51 = vld [vmem:[#allocation5 + $0x460] sm:$0xff]  ;;  %750 = vmatpush1.msra.mxu1 %v266_v47  ;;  %680 = vmatprep.subr.mxu0 %v135_v48 }
  0x72   :  { %v131_v52 = vld [vmem:[#allocation5 + $0x48] sm:$0xff]  ;;  %751 = vmatprep.subr.mxu1 %v263_v49  ;;  %v130_v54 = vld [vmem:[#allocation5 + $0x40] sm:$0xff]  ;;  %681 = vmatpush1.msra.mxu0 %v134_v50 }
  0x73   :  { %v259_v53 = vld [vmem:[#allocation5 + $0x448] sm:$0xff]  ;;  %v258_v55 = vld [vmem:[#allocation5 + $0x440] sm:$0xff]  ;;  %752 = vmatpush1.msra.mxu1 %v262_v51  ;;  %682 = vmatprep.subr.mxu0 %v131_v52 }
  0x74   :  { %v127_v56 = vld [vmem:[#allocation5 + $0x28] sm:$0xff]  ;;  %753 = vmatprep.subr.mxu1 %v259_v53  ;;  %v126_v58 = vld [vmem:[#allocation5 + $0x20] sm:$0xff]  ;;  %683 = vmatpush1.msra.mxu0 %v130_v54 }
  0x75   :  { %v255_v57 = vld [vmem:[#allocation5 + $0x428] sm:$0xff]  ;;  %v254_v59 = vld [vmem:[#allocation5 + $0x420] sm:$0xff]  ;;  %754 = vmatpush1.msra.mxu1 %v258_v55  ;;  %684 = vmatprep.subr.mxu0 %v127_v56 }
  0x76   :  { %v123_v60 = vld [vmem:[#allocation5 + $0x8] sm:$0xff]  ;;  %755 = vmatprep.subr.mxu1 %v255_v57  ;;  %v122_v62 = vld [vmem:[#allocation5] sm:$0xff]  ;;  %685 = vmatpush1.msra.mxu0 %v126_v58 }
  0x77   :  { %v251_v61 = vld [vmem:[#allocation5 + $0x408] sm:$0xff]  ;;  %v250_v63 = vld [vmem:[#allocation5 + $0x400] sm:$0xff]  ;;  %756 = vmatpush1.msra.mxu1 %v254_v59  ;;  %686 = vmatprep.subr.mxu0 %v123_v60 }
  0x78   :  { %v247_v0 = vld [vmem:[#allocation5 + $0x3e8] sm:$0xff]  ;;  %757 = vmatprep.subr.mxu1 %v251_v61  ;;  %v246_v2 = vld [vmem:[#allocation5 + $0x3e0] sm:$0xff]  ;;  %687 = vmatpush1.msra.mxu0 %v122_v62 }
  0x79   :  { %v375_v1 = vld [vmem:[#allocation5 + $0x7e8] sm:$0xff]  ;;  %v374_v3 = vld [vmem:[#allocation5 + $0x7e0] sm:$0xff]  ;;  %758 = vmatpush1.msra.mxu1 %v250_v63  ;;  %688 = vmatprep.subr.mxu0 %v247_v0 }
  0x7a   :  { %v243_v4 = vld [vmem:[#allocation5 + $0x3c8] sm:$0xff]  ;;  %759 = vmatprep.subr.mxu1 %v375_v1  ;;  %v242_v6 = vld [vmem:[#allocation5 + $0x3c0] sm:$0xff]  ;;  %689 = vmatpush2.msra.mxu0 %v246_v2  ;;  %v117_v2 = vld [vmem:[#allocation2 + $0x18] sm:$0xff] }
  0x7b   :  { %v371_v5 = vld [vmem:[#allocation5 + $0x7c8] sm:$0xff]  ;;  %v370_v7 = vld [vmem:[#allocation5 + $0x7c0] sm:$0xff]  ;;  %760 = vmatpush2.msra.mxu1 %v374_v3  ;;  %690 = vmatprep.subr.mxu0 %v243_v4 }
  0x7c   :  { %v239_v8 = vld [vmem:[#allocation5 + $0x3a8] sm:$0xff]  ;;  %761 = vmatprep.subr.mxu1 %v371_v5  ;;  %v238_v10 = vld [vmem:[#allocation5 + $0x3a0] sm:$0xff]  ;;  %691 = vmatpush2.msra.mxu0 %v242_v6  ;;  %v116_v5 = vld [vmem:[#allocation2 + $0x10] sm:$0xff] }
  0x7d   :  { %v367_v9 = vld [vmem:[#allocation5 + $0x7a8] sm:$0xff]  ;;  %v366_v11 = vld [vmem:[#allocation5 + $0x7a0] sm:$0xff]  ;;  %762 = vmatpush2.msra.mxu1 %v370_v7  ;;  %692 = vmatprep.subr.mxu0 %v239_v8 }
  0x7e   :  { %v235_v12 = vld [vmem:[#allocation5 + $0x388] sm:$0xff]  ;;  %763 = vmatprep.subr.mxu1 %v367_v9  ;;  %v234_v14 = vld [vmem:[#allocation5 + $0x380] sm:$0xff]  ;;  %693 = vmatpush2.msra.mxu0 %v238_v10 }
  0x7f   :  { %v363_v13 = vld [vmem:[#allocation5 + $0x788] sm:$0xff]  ;;  %v362_v15 = vld [vmem:[#allocation5 + $0x780] sm:$0xff]  ;;  %764 = vmatpush2.msra.mxu1 %v366_v11  ;;  %694 = vmatprep.subr.mxu0 %v235_v12 }
  0x80   :  { %v231_v16 = vld [vmem:[#allocation5 + $0x368] sm:$0xff]  ;;  %765 = vmatprep.subr.mxu1 %v363_v13  ;;  %v230_v18 = vld [vmem:[#allocation5 + $0x360] sm:$0xff]  ;;  %695 = vmatpush2.msra.mxu0 %v234_v14 }
  0x81   :  { %v359_v17 = vld [vmem:[#allocation5 + $0x768] sm:$0xff]  ;;  %v358_v19 = vld [vmem:[#allocation5 + $0x760] sm:$0xff]  ;;  %766 = vmatpush2.msra.mxu1 %v362_v15  ;;  %696 = vmatprep.subr.mxu0 %v231_v16 }
  0x82   :  { %v227_v20 = vld [vmem:[#allocation5 + $0x348] sm:$0xff]  ;;  %767 = vmatprep.subr.mxu1 %v359_v17  ;;  %v226_v22 = vld [vmem:[#allocation5 + $0x340] sm:$0xff]  ;;  %697 = vmatpush2.msra.mxu0 %v230_v18 }
  0x83   :  { %v355_v21 = vld [vmem:[#allocation5 + $0x748] sm:$0xff]  ;;  %v354_v23 = vld [vmem:[#allocation5 + $0x740] sm:$0xff]  ;;  %768 = vmatpush2.msra.mxu1 %v358_v19  ;;  %698 = vmatprep.subr.mxu0 %v227_v20 }
  0x84   :  { %v223_v24 = vld [vmem:[#allocation5 + $0x328] sm:$0xff]  ;;  %769 = vmatprep.subr.mxu1 %v355_v21  ;;  %v222_v26 = vld [vmem:[#allocation5 + $0x320] sm:$0xff]  ;;  %699 = vmatpush2.msra.mxu0 %v226_v22 }
  0x85   :  { %v351_v25 = vld [vmem:[#allocation5 + $0x728] sm:$0xff]  ;;  %v350_v27 = vld [vmem:[#allocation5 + $0x720] sm:$0xff]  ;;  %770 = vmatpush2.msra.mxu1 %v354_v23  ;;  %700 = vmatprep.subr.mxu0 %v223_v24 }
  0x86   :  { %v219_v28 = vld [vmem:[#allocation5 + $0x308] sm:$0xff]  ;;  %771 = vmatprep.subr.mxu1 %v351_v25  ;;  %v218_v30 = vld [vmem:[#allocation5 + $0x300] sm:$0xff]  ;;  %701 = vmatpush2.msra.mxu0 %v222_v26 }
  0x87   :  { %v347_v29 = vld [vmem:[#allocation5 + $0x708] sm:$0xff]  ;;  %v346_v31 = vld [vmem:[#allocation5 + $0x700] sm:$0xff]  ;;  %772 = vmatpush2.msra.mxu1 %v350_v27  ;;  %702 = vmatprep.subr.mxu0 %v219_v28 }
  0x88   :  { %v215_v32 = vld [vmem:[#allocation5 + $0x2e8] sm:$0xff]  ;;  %773 = vmatprep.subr.mxu1 %v347_v29  ;;  %v214_v34 = vld [vmem:[#allocation5 + $0x2e0] sm:$0xff]  ;;  %703 = vmatpush2.msra.mxu0 %v218_v30 }
  0x89   :  { %v343_v33 = vld [vmem:[#allocation5 + $0x6e8] sm:$0xff]  ;;  %v342_v35 = vld [vmem:[#allocation5 + $0x6e0] sm:$0xff]  ;;  %774 = vmatpush2.msra.mxu1 %v346_v31  ;;  %704 = vmatprep.subr.mxu0 %v215_v32 }
  0x8a   :  { %v211_v36 = vld [vmem:[#allocation5 + $0x2c8] sm:$0xff]  ;;  %775 = vmatprep.subr.mxu1 %v343_v33  ;;  %v210_v38 = vld [vmem:[#allocation5 + $0x2c0] sm:$0xff]  ;;  %705 = vmatpush2.msra.mxu0 %v214_v34 }
  0x8b   :  { %v339_v37 = vld [vmem:[#allocation5 + $0x6c8] sm:$0xff]  ;;  %v338_v39 = vld [vmem:[#allocation5 + $0x6c0] sm:$0xff]  ;;  %776 = vmatpush2.msra.mxu1 %v342_v35  ;;  %706 = vmatprep.subr.mxu0 %v211_v36 }
  0x8c   :  { %v207_v40 = vld [vmem:[#allocation5 + $0x2a8] sm:$0xff]  ;;  %777 = vmatprep.subr.mxu1 %v339_v37  ;;  %v206_v42 = vld [vmem:[#allocation5 + $0x2a0] sm:$0xff]  ;;  %707 = vmatpush2.msra.mxu0 %v210_v38 }
  0x8d   :  { %v335_v41 = vld [vmem:[#allocation5 + $0x6a8] sm:$0xff]  ;;  %v334_v43 = vld [vmem:[#allocation5 + $0x6a0] sm:$0xff]  ;;  %778 = vmatpush2.msra.mxu1 %v338_v39  ;;  %708 = vmatprep.subr.mxu0 %v207_v40 }
  0x8e   :  { %v203_v44 = vld [vmem:[#allocation5 + $0x288] sm:$0xff]  ;;  %779 = vmatprep.subr.mxu1 %v335_v41  ;;  %v202_v46 = vld [vmem:[#allocation5 + $0x280] sm:$0xff]  ;;  %709 = vmatpush2.msra.mxu0 %v206_v42 }
  0x8f   :  { %v331_v45 = vld [vmem:[#allocation5 + $0x688] sm:$0xff]  ;;  %v330_v47 = vld [vmem:[#allocation5 + $0x680] sm:$0xff]  ;;  %780 = vmatpush2.msra.mxu1 %v334_v43  ;;  %710 = vmatprep.subr.mxu0 %v203_v44 }
  0x90   :  { %v199_v48 = vld [vmem:[#allocation5 + $0x268] sm:$0xff]  ;;  %781 = vmatprep.subr.mxu1 %v331_v45  ;;  %v198_v50 = vld [vmem:[#allocation5 + $0x260] sm:$0xff]  ;;  %711 = vmatpush2.msra.mxu0 %v202_v46 }
  0x91   :  { %v327_v49 = vld [vmem:[#allocation5 + $0x668] sm:$0xff]  ;;  %v326_v51 = vld [vmem:[#allocation5 + $0x660] sm:$0xff]  ;;  %782 = vmatpush2.msra.mxu1 %v330_v47  ;;  %712 = vmatprep.subr.mxu0 %v199_v48 }
  0x92   :  { %v195_v52 = vld [vmem:[#allocation5 + $0x248] sm:$0xff]  ;;  %783 = vmatprep.subr.mxu1 %v327_v49  ;;  %v194_v54 = vld [vmem:[#allocation5 + $0x240] sm:$0xff]  ;;  %713 = vmatpush2.msra.mxu0 %v198_v50 }
  0x93   :  { %v323_v53 = vld [vmem:[#allocation5 + $0x648] sm:$0xff]  ;;  %v322_v55 = vld [vmem:[#allocation5 + $0x640] sm:$0xff]  ;;  %784 = vmatpush2.msra.mxu1 %v326_v51  ;;  %714 = vmatprep.subr.mxu0 %v195_v52 }
  0x94   :  { %v191_v56 = vld [vmem:[#allocation5 + $0x228] sm:$0xff]  ;;  %785 = vmatprep.subr.mxu1 %v323_v53  ;;  %v190_v58 = vld [vmem:[#allocation5 + $0x220] sm:$0xff]  ;;  %715 = vmatpush2.msra.mxu0 %v194_v54 }
  0x95   :  { %v319_v57 = vld [vmem:[#allocation5 + $0x628] sm:$0xff]  ;;  %v318_v59 = vld [vmem:[#allocation5 + $0x620] sm:$0xff]  ;;  %786 = vmatpush2.msra.mxu1 %v322_v55  ;;  %716 = vmatprep.subr.mxu0 %v191_v56 }
  0x96   :  { %v187_v60 = vld [vmem:[#allocation5 + $0x208] sm:$0xff]  ;;  %787 = vmatprep.subr.mxu1 %v319_v57  ;;  %v186_v62 = vld [vmem:[#allocation5 + $0x200] sm:$0xff]  ;;  %717 = vmatpush2.msra.mxu0 %v190_v58 }
  0x97   :  { %v315_v61 = vld [vmem:[#allocation5 + $0x608] sm:$0xff]  ;;  %788 = vmatpush2.msra.mxu1 %v318_v59  ;;  %v314_v0 = vld [vmem:[#allocation5 + $0x600] sm:$0xff]  ;;  %718 = vmatprep.subr.mxu0 %v187_v60 }
  0x98   :  { %v115_v63 = vld [vmem:[#allocation2 + $0x8] sm:$0xff]  ;;  %v114_v1 = vld [vmem:[#allocation2] sm:$0xff]  ;;  %789 = vmatprep.subr.mxu1 %v315_v61  ;;  %719 = vmatpush2.msra.mxu0 %v186_v62 }
  0x99   :  { %v439_v3 = vld [vmem:[#allocation5 + $0x9e8] sm:$0xff]  ;;  %720 = vmatprep.mubr.f32.mxu0 %v115_v63  ;;  %790 = vmatpush2.msra.mxu1 %v314_v0  ;;  %v438_v6 = vld [vmem:[#allocation5 + $0x9e0] sm:$0xff] }
  0x9a   :  { %v567_v4 = vld [vmem:[#allocation5 + $0xde8] sm:$0xff]  ;;  %721 = vmatmul.mubr.f32.vlgmr.msra.gmra.mxu0 %v114_v1  ;;  %v566_v7 = vld [vmem:[#allocation5 + $0xde0] sm:$0xff]  ;;  %791 = vmatprep.mubr.f32.mxu1 %v117_v2 }
  0x9b   :  { %798 = vmatprep.subr.mxu0 %v439_v3  ;;  %v435_v8 = vld [vmem:[#allocation5 + $0x9c8] sm:$0xff]  ;;  %869 = vmatprep.subr.mxu1 %v567_v4  ;;  %v434_v10 = vld [vmem:[#allocation5 + $0x9c0] sm:$0xff] }
  0x9c   :  { %v563_v9 = vld [vmem:[#allocation5 + $0xdc8] sm:$0xff]  ;;  %792 = vmatmul.mubr.f32.vlgmr.msra.gmra.mxu1 %v116_v5  ;;  %v562_v11 = vld [vmem:[#allocation5 + $0xdc0] sm:$0xff]  ;;  %799 = vmatpush1.msra.mxu0 %v438_v6 }
  0x9d   :  { %870 = vmatpush1.msra.mxu1 %v566_v7  ;;  %v431_v12 = vld [vmem:[#allocation5 + $0x9a8] sm:$0xff]  ;;  %800 = vmatprep.subr.mxu0 %v435_v8  ;;  %v430_v14 = vld [vmem:[#allocation5 + $0x9a0] sm:$0xff] }
  0x9e   :  { %v559_v13 = vld [vmem:[#allocation5 + $0xda8] sm:$0xff]  ;;  %871 = vmatprep.subr.mxu1 %v563_v9  ;;  %v558_v15 = vld [vmem:[#allocation5 + $0xda0] sm:$0xff]  ;;  %801 = vmatpush1.msra.mxu0 %v434_v10 }
  0x9f   :  { %872 = vmatpush1.msra.mxu1 %v562_v11  ;;  %v427_v16 = vld [vmem:[#allocation5 + $0x988] sm:$0xff]  ;;  %802 = vmatprep.subr.mxu0 %v431_v12  ;;  %v426_v18 = vld [vmem:[#allocation5 + $0x980] sm:$0xff] }
  0xa0   :  { %v555_v17 = vld [vmem:[#allocation5 + $0xd88] sm:$0xff]  ;;  %873 = vmatprep.subr.mxu1 %v559_v13  ;;  %v554_v19 = vld [vmem:[#allocation5 + $0xd80] sm:$0xff]  ;;  %803 = vmatpush1.msra.mxu0 %v430_v14 }
  0xa1   :  { %874 = vmatpush1.msra.mxu1 %v558_v15  ;;  %v423_v20 = vld [vmem:[#allocation5 + $0x968] sm:$0xff]  ;;  %804 = vmatprep.subr.mxu0 %v427_v16  ;;  %v422_v22 = vld [vmem:[#allocation5 + $0x960] sm:$0xff] }
  0xa2   :  { %v551_v21 = vld [vmem:[#allocation5 + $0xd68] sm:$0xff]  ;;  %875 = vmatprep.subr.mxu1 %v555_v17  ;;  %v550_v23 = vld [vmem:[#allocation5 + $0xd60] sm:$0xff]  ;;  %805 = vmatpush1.msra.mxu0 %v426_v18 }
  0xa3   :  { %876 = vmatpush1.msra.mxu1 %v554_v19  ;;  %v419_v24 = vld [vmem:[#allocation5 + $0x948] sm:$0xff]  ;;  %806 = vmatprep.subr.mxu0 %v423_v20  ;;  %v418_v26 = vld [vmem:[#allocation5 + $0x940] sm:$0xff] }
  0xa4   :  { %v547_v25 = vld [vmem:[#allocation5 + $0xd48] sm:$0xff]  ;;  %877 = vmatprep.subr.mxu1 %v551_v21  ;;  %v546_v27 = vld [vmem:[#allocation5 + $0xd40] sm:$0xff]  ;;  %807 = vmatpush1.msra.mxu0 %v422_v22 }
  0xa5   :  { %878 = vmatpush1.msra.mxu1 %v550_v23  ;;  %v415_v28 = vld [vmem:[#allocation5 + $0x928] sm:$0xff]  ;;  %808 = vmatprep.subr.mxu0 %v419_v24  ;;  %v414_v30 = vld [vmem:[#allocation5 + $0x920] sm:$0xff] }
  0xa6   :  { %v543_v29 = vld [vmem:[#allocation5 + $0xd28] sm:$0xff]  ;;  %879 = vmatprep.subr.mxu1 %v547_v25  ;;  %v542_v31 = vld [vmem:[#allocation5 + $0xd20] sm:$0xff]  ;;  %809 = vmatpush1.msra.mxu0 %v418_v26 }
  0xa7   :  { %880 = vmatpush1.msra.mxu1 %v546_v27  ;;  %v411_v32 = vld [vmem:[#allocation5 + $0x908] sm:$0xff]  ;;  %810 = vmatprep.subr.mxu0 %v415_v28  ;;  %v410_v34 = vld [vmem:[#allocation5 + $0x900] sm:$0xff] }
  0xa8   :  { %v539_v33 = vld [vmem:[#allocation5 + $0xd08] sm:$0xff]  ;;  %881 = vmatprep.subr.mxu1 %v543_v29  ;;  %v538_v35 = vld [vmem:[#allocation5 + $0xd00] sm:$0xff]  ;;  %811 = vmatpush1.msra.mxu0 %v414_v30 }
  0xa9   :  { %882 = vmatpush1.msra.mxu1 %v542_v31  ;;  %v407_v36 = vld [vmem:[#allocation5 + $0x8e8] sm:$0xff]  ;;  %812 = vmatprep.subr.mxu0 %v411_v32  ;;  %v406_v38 = vld [vmem:[#allocation5 + $0x8e0] sm:$0xff] }
  0xaa   :  { %v535_v37 = vld [vmem:[#allocation5 + $0xce8] sm:$0xff]  ;;  %883 = vmatprep.subr.mxu1 %v539_v33  ;;  %v534_v39 = vld [vmem:[#allocation5 + $0xce0] sm:$0xff]  ;;  %813 = vmatpush1.msra.mxu0 %v410_v34 }
  0xab   :  { %884 = vmatpush1.msra.mxu1 %v538_v35  ;;  %v403_v40 = vld [vmem:[#allocation5 + $0x8c8] sm:$0xff]  ;;  %814 = vmatprep.subr.mxu0 %v407_v36  ;;  %v402_v42 = vld [vmem:[#allocation5 + $0x8c0] sm:$0xff] }
  0xac   :  { %v531_v41 = vld [vmem:[#allocation5 + $0xcc8] sm:$0xff]  ;;  %885 = vmatprep.subr.mxu1 %v535_v37  ;;  %v530_v43 = vld [vmem:[#allocation5 + $0xcc0] sm:$0xff]  ;;  %815 = vmatpush1.msra.mxu0 %v406_v38 }
  0xad   :  { %886 = vmatpush1.msra.mxu1 %v534_v39  ;;  %v399_v44 = vld [vmem:[#allocation5 + $0x8a8] sm:$0xff]  ;;  %816 = vmatprep.subr.mxu0 %v403_v40  ;;  %v398_v46 = vld [vmem:[#allocation5 + $0x8a0] sm:$0xff] }
  0xae   :  { %v527_v45 = vld [vmem:[#allocation5 + $0xca8] sm:$0xff]  ;;  %887 = vmatprep.subr.mxu1 %v531_v41  ;;  %v526_v47 = vld [vmem:[#allocation5 + $0xca0] sm:$0xff]  ;;  %817 = vmatpush1.msra.mxu0 %v402_v42 }
  0xaf   :  { %888 = vmatpush1.msra.mxu1 %v530_v43  ;;  %v395_v48 = vld [vmem:[#allocation5 + $0x888] sm:$0xff]  ;;  %818 = vmatprep.subr.mxu0 %v399_v44  ;;  %v394_v50 = vld [vmem:[#allocation5 + $0x880] sm:$0xff] }
  0xb0   :  { %v523_v49 = vld [vmem:[#allocation5 + $0xc88] sm:$0xff]  ;;  %889 = vmatprep.subr.mxu1 %v527_v45  ;;  %v522_v51 = vld [vmem:[#allocation5 + $0xc80] sm:$0xff]  ;;  %819 = vmatpush1.msra.mxu0 %v398_v46 }
  0xb1   :  { %890 = vmatpush1.msra.mxu1 %v526_v47  ;;  %v391_v52 = vld [vmem:[#allocation5 + $0x868] sm:$0xff]  ;;  %820 = vmatprep.subr.mxu0 %v395_v48  ;;  %v390_v54 = vld [vmem:[#allocation5 + $0x860] sm:$0xff] }
  0xb2   :  { %v519_v53 = vld [vmem:[#allocation5 + $0xc68] sm:$0xff]  ;;  %891 = vmatprep.subr.mxu1 %v523_v49  ;;  %v518_v55 = vld [vmem:[#allocation5 + $0xc60] sm:$0xff]  ;;  %821 = vmatpush1.msra.mxu0 %v394_v50 }
  0xb3   :  { %892 = vmatpush1.msra.mxu1 %v522_v51  ;;  %v387_v56 = vld [vmem:[#allocation5 + $0x848] sm:$0xff]  ;;  %822 = vmatprep.subr.mxu0 %v391_v52  ;;  %v386_v58 = vld [vmem:[#allocation5 + $0x840] sm:$0xff] }
  0xb4   :  { %v515_v57 = vld [vmem:[#allocation5 + $0xc48] sm:$0xff]  ;;  %893 = vmatprep.subr.mxu1 %v519_v53  ;;  %v514_v59 = vld [vmem:[#allocation5 + $0xc40] sm:$0xff]  ;;  %823 = vmatpush1.msra.mxu0 %v390_v54 }
  0xb5   :  { %894 = vmatpush1.msra.mxu1 %v518_v55  ;;  %v383_v60 = vld [vmem:[#allocation5 + $0x828] sm:$0xff]  ;;  %824 = vmatprep.subr.mxu0 %v387_v56  ;;  %v382_v62 = vld [vmem:[#allocation5 + $0x820] sm:$0xff] }
  0xb6   :  { %v511_v61 = vld [vmem:[#allocation5 + $0xc28] sm:$0xff]  ;;  %895 = vmatprep.subr.mxu1 %v515_v57  ;;  %v510_v63 = vld [vmem:[#allocation5 + $0xc20] sm:$0xff]  ;;  %825 = vmatpush1.msra.mxu0 %v386_v58 }
  0xb7   :  { %896 = vmatpush1.msra.mxu1 %v514_v59  ;;  %v379_v0 = vld [vmem:[#allocation5 + $0x808] sm:$0xff]  ;;  %826 = vmatprep.subr.mxu0 %v383_v60  ;;  %v378_v2 = vld [vmem:[#allocation5 + $0x800] sm:$0xff] }
  0xb8   :  { %v507_v1 = vld [vmem:[#allocation5 + $0xc08] sm:$0xff]  ;;  %897 = vmatprep.subr.mxu1 %v511_v61  ;;  %v506_v3 = vld [vmem:[#allocation5 + $0xc00] sm:$0xff]  ;;  %827 = vmatpush1.msra.mxu0 %v382_v62 }
  0xb9   :  { %898 = vmatpush1.msra.mxu1 %v510_v63  ;;  %v503_v4 = vld [vmem:[#allocation5 + $0xbe8] sm:$0xff]  ;;  %828 = vmatprep.subr.mxu0 %v379_v0  ;;  %v502_v6 = vld [vmem:[#allocation5 + $0xbe0] sm:$0xff] }
  0xba   :  { %v631_v5 = vld [vmem:[#allocation5 + $0xfe8] sm:$0xff]  ;;  %899 = vmatprep.subr.mxu1 %v507_v1  ;;  %v630_v7 = vld [vmem:[#allocation5 + $0xfe0] sm:$0xff]  ;;  %829 = vmatpush1.msra.mxu0 %v378_v2 }
  0xbb   :  { %900 = vmatpush1.msra.mxu1 %v506_v3  ;;  %v499_v8 = vld [vmem:[#allocation5 + $0xbc8] sm:$0xff]  ;;  %830 = vmatprep.subr.mxu0 %v503_v4  ;;  %v498_v10 = vld [vmem:[#allocation5 + $0xbc0] sm:$0xff] }
  0xbc   :  { %v627_v9 = vld [vmem:[#allocation5 + $0xfc8] sm:$0xff]  ;;  %901 = vmatprep.subr.mxu1 %v631_v5  ;;  %v626_v11 = vld [vmem:[#allocation5 + $0xfc0] sm:$0xff]  ;;  %831 = vmatpush2.msra.mxu0 %v502_v6  ;;  %v121_v6 = vld [vmem:[#allocation2 + $0x38] sm:$0xff] }
  0xbd   :  { %902 = vmatpush2.msra.mxu1 %v630_v7  ;;  %v495_v12 = vld [vmem:[#allocation5 + $0xba8] sm:$0xff]  ;;  %832 = vmatprep.subr.mxu0 %v499_v8  ;;  %v494_v14 = vld [vmem:[#allocation5 + $0xba0] sm:$0xff]  ;;  %v185_v7 = vld [vmem:[#allocation5 + $0x1f8] sm:$0xff] }
  0xbe   :  { %v623_v13 = vld [vmem:[#allocation5 + $0xfa8] sm:$0xff]  ;;  %903 = vmatprep.subr.mxu1 %v627_v9  ;;  %v622_v15 = vld [vmem:[#allocation5 + $0xfa0] sm:$0xff]  ;;  %833 = vmatpush2.msra.mxu0 %v498_v10  ;;  %v313_v8 = vld [vmem:[#allocation5 + $0x5f8] sm:$0xff] }
  0xbf   :  { %904 = vmatpush2.msra.mxu1 %v626_v11  ;;  %v491_v16 = vld [vmem:[#allocation5 + $0xb88] sm:$0xff]  ;;  %834 = vmatprep.subr.mxu0 %v495_v12  ;;  %v490_v18 = vld [vmem:[#allocation5 + $0xb80] sm:$0xff]  ;;  %v120_v9 = vld [vmem:[#allocation2 + $0x30] sm:$0xff] }
  0xc0   :  { %v619_v17 = vld [vmem:[#allocation5 + $0xf88] sm:$0xff]  ;;  %905 = vmatprep.subr.mxu1 %v623_v13  ;;  %v618_v19 = vld [vmem:[#allocation5 + $0xf80] sm:$0xff]  ;;  %835 = vmatpush2.msra.mxu0 %v494_v14  ;;  %v184_v10 = vld [vmem:[#allocation5 + $0x1f0] sm:$0xff] }
  0xc1   :  { %906 = vmatpush2.msra.mxu1 %v622_v15  ;;  %v487_v20 = vld [vmem:[#allocation5 + $0xb68] sm:$0xff]  ;;  %836 = vmatprep.subr.mxu0 %v491_v16  ;;  %v486_v22 = vld [vmem:[#allocation5 + $0xb60] sm:$0xff]  ;;  %v312_v11 = vld [vmem:[#allocation5 + $0x5f0] sm:$0xff] }
  0xc2   :  { %v615_v21 = vld [vmem:[#allocation5 + $0xf68] sm:$0xff]  ;;  %907 = vmatprep.subr.mxu1 %v619_v17  ;;  %v614_v23 = vld [vmem:[#allocation5 + $0xf60] sm:$0xff]  ;;  %837 = vmatpush2.msra.mxu0 %v490_v18  ;;  %v181_v12 = vld [vmem:[#allocation5 + $0x1d8] sm:$0xff] }
  0xc3   :  { %908 = vmatpush2.msra.mxu1 %v618_v19  ;;  %v483_v24 = vld [vmem:[#allocation5 + $0xb48] sm:$0xff]  ;;  %838 = vmatprep.subr.mxu0 %v487_v20  ;;  %v482_v26 = vld [vmem:[#allocation5 + $0xb40] sm:$0xff]  ;;  %v309_v13 = vld [vmem:[#allocation5 + $0x5d8] sm:$0xff] }
  0xc4   :  { %v611_v25 = vld [vmem:[#allocation5 + $0xf48] sm:$0xff]  ;;  %909 = vmatprep.subr.mxu1 %v615_v21  ;;  %v610_v27 = vld [vmem:[#allocation5 + $0xf40] sm:$0xff]  ;;  %839 = vmatpush2.msra.mxu0 %v486_v22  ;;  %v180_v14 = vld [vmem:[#allocation5 + $0x1d0] sm:$0xff] }
  0xc5   :  { %910 = vmatpush2.msra.mxu1 %v614_v23  ;;  %v479_v28 = vld [vmem:[#allocation5 + $0xb28] sm:$0xff]  ;;  %840 = vmatprep.subr.mxu0 %v483_v24  ;;  %v478_v30 = vld [vmem:[#allocation5 + $0xb20] sm:$0xff]  ;;  %v308_v15 = vld [vmem:[#allocation5 + $0x5d0] sm:$0xff] }
  0xc6   :  { %v607_v29 = vld [vmem:[#allocation5 + $0xf28] sm:$0xff]  ;;  %911 = vmatprep.subr.mxu1 %v611_v25  ;;  %v606_v31 = vld [vmem:[#allocation5 + $0xf20] sm:$0xff]  ;;  %841 = vmatpush2.msra.mxu0 %v482_v26  ;;  %v177_v16 = vld [vmem:[#allocation5 + $0x1b8] sm:$0xff] }
  0xc7   :  { %912 = vmatpush2.msra.mxu1 %v610_v27  ;;  %v475_v32 = vld [vmem:[#allocation5 + $0xb08] sm:$0xff]  ;;  %842 = vmatprep.subr.mxu0 %v479_v28  ;;  %v474_v34 = vld [vmem:[#allocation5 + $0xb00] sm:$0xff]  ;;  %v305_v17 = vld [vmem:[#allocation5 + $0x5b8] sm:$0xff] }
  0xc8   :  { %v603_v33 = vld [vmem:[#allocation5 + $0xf08] sm:$0xff]  ;;  %913 = vmatprep.subr.mxu1 %v607_v29  ;;  %v602_v35 = vld [vmem:[#allocation5 + $0xf00] sm:$0xff]  ;;  %843 = vmatpush2.msra.mxu0 %v478_v30  ;;  %v176_v18 = vld [vmem:[#allocation5 + $0x1b0] sm:$0xff] }
  0xc9   :  { %914 = vmatpush2.msra.mxu1 %v606_v31  ;;  %v471_v36 = vld [vmem:[#allocation5 + $0xae8] sm:$0xff]  ;;  %844 = vmatprep.subr.mxu0 %v475_v32  ;;  %v470_v38 = vld [vmem:[#allocation5 + $0xae0] sm:$0xff]  ;;  %v304_v19 = vld [vmem:[#allocation5 + $0x5b0] sm:$0xff] }
  0xca   :  { %v599_v37 = vld [vmem:[#allocation5 + $0xee8] sm:$0xff]  ;;  %915 = vmatprep.subr.mxu1 %v603_v33  ;;  %v598_v39 = vld [vmem:[#allocation5 + $0xee0] sm:$0xff]  ;;  %845 = vmatpush2.msra.mxu0 %v474_v34  ;;  %v173_v20 = vld [vmem:[#allocation5 + $0x198] sm:$0xff] }
  0xcb   :  { %916 = vmatpush2.msra.mxu1 %v602_v35  ;;  %v467_v40 = vld [vmem:[#allocation5 + $0xac8] sm:$0xff]  ;;  %846 = vmatprep.subr.mxu0 %v471_v36  ;;  %v466_v42 = vld [vmem:[#allocation5 + $0xac0] sm:$0xff]  ;;  %v301_v21 = vld [vmem:[#allocation5 + $0x598] sm:$0xff] }
  0xcc   :  { %v595_v41 = vld [vmem:[#allocation5 + $0xec8] sm:$0xff]  ;;  %917 = vmatprep.subr.mxu1 %v599_v37  ;;  %v594_v43 = vld [vmem:[#allocation5 + $0xec0] sm:$0xff]  ;;  %847 = vmatpush2.msra.mxu0 %v470_v38  ;;  %v172_v22 = vld [vmem:[#allocation5 + $0x190] sm:$0xff] }
  0xcd   :  { %918 = vmatpush2.msra.mxu1 %v598_v39  ;;  %v463_v44 = vld [vmem:[#allocation5 + $0xaa8] sm:$0xff]  ;;  %848 = vmatprep.subr.mxu0 %v467_v40  ;;  %v462_v46 = vld [vmem:[#allocation5 + $0xaa0] sm:$0xff]  ;;  %v300_v23 = vld [vmem:[#allocation5 + $0x590] sm:$0xff] }
  0xce   :  { %v591_v45 = vld [vmem:[#allocation5 + $0xea8] sm:$0xff]  ;;  %919 = vmatprep.subr.mxu1 %v595_v41  ;;  %v590_v47 = vld [vmem:[#allocation5 + $0xea0] sm:$0xff]  ;;  %849 = vmatpush2.msra.mxu0 %v466_v42  ;;  %v169_v24 = vld [vmem:[#allocation5 + $0x178] sm:$0xff] }
  0xcf   :  { %920 = vmatpush2.msra.mxu1 %v594_v43  ;;  %v459_v48 = vld [vmem:[#allocation5 + $0xa88] sm:$0xff]  ;;  %850 = vmatprep.subr.mxu0 %v463_v44  ;;  %v458_v50 = vld [vmem:[#allocation5 + $0xa80] sm:$0xff]  ;;  %v297_v25 = vld [vmem:[#allocation5 + $0x578] sm:$0xff] }
  0xd0   :  { %v587_v49 = vld [vmem:[#allocation5 + $0xe88] sm:$0xff]  ;;  %921 = vmatprep.subr.mxu1 %v591_v45  ;;  %v586_v51 = vld [vmem:[#allocation5 + $0xe80] sm:$0xff]  ;;  %851 = vmatpush2.msra.mxu0 %v462_v46  ;;  %v168_v26 = vld [vmem:[#allocation5 + $0x170] sm:$0xff] }
  0xd1   :  { %922 = vmatpush2.msra.mxu1 %v590_v47  ;;  %v455_v52 = vld [vmem:[#allocation5 + $0xa68] sm:$0xff]  ;;  %852 = vmatprep.subr.mxu0 %v459_v48  ;;  %v454_v54 = vld [vmem:[#allocation5 + $0xa60] sm:$0xff]  ;;  %v296_v27 = vld [vmem:[#allocation5 + $0x570] sm:$0xff] }
  0xd2   :  { %v583_v53 = vld [vmem:[#allocation5 + $0xe68] sm:$0xff]  ;;  %923 = vmatprep.subr.mxu1 %v587_v49  ;;  %v582_v55 = vld [vmem:[#allocation5 + $0xe60] sm:$0xff]  ;;  %853 = vmatpush2.msra.mxu0 %v458_v50  ;;  %v165_v28 = vld [vmem:[#allocation5 + $0x158] sm:$0xff] }
  0xd3   :  { %924 = vmatpush2.msra.mxu1 %v586_v51  ;;  %v451_v56 = vld [vmem:[#allocation5 + $0xa48] sm:$0xff]  ;;  %854 = vmatprep.subr.mxu0 %v455_v52  ;;  %v450_v58 = vld [vmem:[#allocation5 + $0xa40] sm:$0xff]  ;;  %v293_v29 = vld [vmem:[#allocation5 + $0x558] sm:$0xff] }
  0xd4   :  { %v579_v57 = vld [vmem:[#allocation5 + $0xe48] sm:$0xff]  ;;  %925 = vmatprep.subr.mxu1 %v583_v53  ;;  %v578_v59 = vld [vmem:[#allocation5 + $0xe40] sm:$0xff]  ;;  %855 = vmatpush2.msra.mxu0 %v454_v54  ;;  %v164_v30 = vld [vmem:[#allocation5 + $0x150] sm:$0xff] }
  0xd5   :  { %926 = vmatpush2.msra.mxu1 %v582_v55  ;;  %v447_v60 = vld [vmem:[#allocation5 + $0xa28] sm:$0xff]  ;;  %856 = vmatprep.subr.mxu0 %v451_v56  ;;  %v446_v62 = vld [vmem:[#allocation5 + $0xa20] sm:$0xff]  ;;  %v292_v31 = vld [vmem:[#allocation5 + $0x550] sm:$0xff] }
  0xd6   :  { %v575_v61 = vld [vmem:[#allocation5 + $0xe28] sm:$0xff]  ;;  %927 = vmatprep.subr.mxu1 %v579_v57  ;;  %v574_v63 = vld [vmem:[#allocation5 + $0xe20] sm:$0xff]  ;;  %857 = vmatpush2.msra.mxu0 %v450_v58  ;;  %v161_v32 = vld [vmem:[#allocation5 + $0x138] sm:$0xff] }
  0xd7   :  { %928 = vmatpush2.msra.mxu1 %v578_v59  ;;  %v443_v0 = vld [vmem:[#allocation5 + $0xa08] sm:$0xff]  ;;  %858 = vmatprep.subr.mxu0 %v447_v60  ;;  %v442_v2 = vld [vmem:[#allocation5 + $0xa00] sm:$0xff]  ;;  %v289_v33 = vld [vmem:[#allocation5 + $0x538] sm:$0xff] }
  0xd8   :  { %v571_v1 = vld [vmem:[#allocation5 + $0xe08] sm:$0xff]  ;;  %929 = vmatprep.subr.mxu1 %v575_v61  ;;  %859 = vmatpush2.msra.mxu0 %v446_v62  ;;  %v570_v4 = vld [vmem:[#allocation5 + $0xe00] sm:$0xff]  ;;  %v160_v34 = vld [vmem:[#allocation5 + $0x130] sm:$0xff] }
  0xd9   :  { %v119_v3 = vld [vmem:[#allocation2 + $0x28] sm:$0xff]  ;;  %930 = vmatpush2.msra.mxu1 %v574_v63  ;;  %v118_v5 = vld [vmem:[#allocation2 + $0x20] sm:$0xff]  ;;  %860 = vmatprep.subr.mxu0 %v443_v0  ;;  %v288_v35 = vld [vmem:[#allocation5 + $0x530] sm:$0xff] }
  0xda   :  { %931 = vmatprep.subr.mxu1 %v571_v1  ;;  %861 = vmatpush2.msra.mxu0 %v442_v2  ;;  %v157_v36 = vld [vmem:[#allocation5 + $0x118] sm:$0xff]  ;;  %v156_v38 = vld [vmem:[#allocation5 + $0x110] sm:$0xff] }
  0xdb   :  { %862 = vmatprep.mubr.f32.mxu0 %v119_v3  ;;  %932 = vmatpush2.msra.mxu1 %v570_v4  ;;  %v285_v37 = vld [vmem:[#allocation5 + $0x518] sm:$0xff]  ;;  %v284_v39 = vld [vmem:[#allocation5 + $0x510] sm:$0xff] }
  0xdc   :  { %863 = vmatmul.mubr.f32.vlgmr.msra.gmra.mxu0 %v118_v5  ;;  %933 = vmatprep.mubr.f32.mxu1 %v121_v6  ;;  %v153_v40 = vld [vmem:[#allocation5 + $0xf8] sm:$0xff]  ;;  %v152_v42 = vld [vmem:[#allocation5 + $0xf0] sm:$0xff] }
  0xdd   :  { %940 = vmatprep.subr.mxu0 %v185_v7  ;;  %1011 = vmatprep.subr.mxu1 %v313_v8  ;;  %v281_v41 = vld [vmem:[#allocation5 + $0x4f8] sm:$0xff]  ;;  %v280_v43 = vld [vmem:[#allocation5 + $0x4f0] sm:$0xff] }
  0xde   :  { %934 = vmatmul.mubr.f32.vlgmr.msra.gmra.mxu1 %v120_v9  ;;  %941 = vmatpush1.msra.mxu0 %v184_v10  ;;  %v149_v44 = vld [vmem:[#allocation5 + $0xd8] sm:$0xff]  ;;  %v148_v46 = vld [vmem:[#allocation5 + $0xd0] sm:$0xff] }
  0xdf   :  { %1012 = vmatpush1.msra.mxu1 %v312_v11  ;;  %942 = vmatprep.subr.mxu0 %v181_v12  ;;  %v277_v45 = vld [vmem:[#allocation5 + $0x4d8] sm:$0xff]  ;;  %v276_v47 = vld [vmem:[#allocation5 + $0x4d0] sm:$0xff] }
  0xe0   :  { %1013 = vmatprep.subr.mxu1 %v309_v13  ;;  %943 = vmatpush1.msra.mxu0 %v180_v14  ;;  %v145_v48 = vld [vmem:[#allocation5 + $0xb8] sm:$0xff]  ;;  %v144_v50 = vld [vmem:[#allocation5 + $0xb0] sm:$0xff] }
  0xe1   :  { %1014 = vmatpush1.msra.mxu1 %v308_v15  ;;  %944 = vmatprep.subr.mxu0 %v177_v16  ;;  %v273_v49 = vld [vmem:[#allocation5 + $0x4b8] sm:$0xff]  ;;  %v272_v51 = vld [vmem:[#allocation5 + $0x4b0] sm:$0xff] }
  0xe2   :  { %1015 = vmatprep.subr.mxu1 %v305_v17  ;;  %945 = vmatpush1.msra.mxu0 %v176_v18  ;;  %v141_v52 = vld [vmem:[#allocation5 + $0x98] sm:$0xff]  ;;  %v140_v54 = vld [vmem:[#allocation5 + $0x90] sm:$0xff] }
  0xe3   :  { %1016 = vmatpush1.msra.mxu1 %v304_v19  ;;  %946 = vmatprep.subr.mxu0 %v173_v20  ;;  %v269_v53 = vld [vmem:[#allocation5 + $0x498] sm:$0xff]  ;;  %v268_v55 = vld [vmem:[#allocation5 + $0x490] sm:$0xff] }
  0xe4   :  { %1017 = vmatprep.subr.mxu1 %v301_v21  ;;  %947 = vmatpush1.msra.mxu0 %v172_v22  ;;  %v137_v56 = vld [vmem:[#allocation5 + $0x78] sm:$0xff]  ;;  %v136_v58 = vld [vmem:[#allocation5 + $0x70] sm:$0xff] }
  0xe5   :  { %1018 = vmatpush1.msra.mxu1 %v300_v23  ;;  %948 = vmatprep.subr.mxu0 %v169_v24  ;;  %v265_v57 = vld [vmem:[#allocation5 + $0x478] sm:$0xff]  ;;  %v264_v59 = vld [vmem:[#allocation5 + $0x470] sm:$0xff] }
  0xe6   :  { %1019 = vmatprep.subr.mxu1 %v297_v25  ;;  %949 = vmatpush1.msra.mxu0 %v168_v26  ;;  %v133_v60 = vld [vmem:[#allocation5 + $0x58] sm:$0xff]  ;;  %v132_v62 = vld [vmem:[#allocation5 + $0x50] sm:$0xff] }
  0xe7   :  { %1020 = vmatpush1.msra.mxu1 %v296_v27  ;;  %950 = vmatprep.subr.mxu0 %v165_v28  ;;  %v261_v61 = vld [vmem:[#allocation5 + $0x458] sm:$0xff]  ;;  %v260_v63 = vld [vmem:[#allocation5 + $0x450] sm:$0xff] }
  0xe8   :  { %1021 = vmatprep.subr.mxu1 %v293_v29  ;;  %951 = vmatpush1.msra.mxu0 %v164_v30  ;;  %v129_v0 = vld [vmem:[#allocation5 + $0x38] sm:$0xff]  ;;  %v128_v2 = vld [vmem:[#allocation5 + $0x30] sm:$0xff] }
  0xe9   :  { %1022 = vmatpush1.msra.mxu1 %v292_v31  ;;  %952 = vmatprep.subr.mxu0 %v161_v32  ;;  %v257_v1 = vld [vmem:[#allocation5 + $0x438] sm:$0xff]  ;;  %v256_v3 = vld [vmem:[#allocation5 + $0x430] sm:$0xff] }
  0xea   :  { %1023 = vmatprep.subr.mxu1 %v289_v33  ;;  %953 = vmatpush1.msra.mxu0 %v160_v34  ;;  %v125_v4 = vld [vmem:[#allocation5 + $0x18] sm:$0xff]  ;;  %v124_v6 = vld [vmem:[#allocation5 + $0x10] sm:$0xff] }
  0xeb   :  { %1024 = vmatpush1.msra.mxu1 %v288_v35  ;;  %954 = vmatprep.subr.mxu0 %v157_v36  ;;  %v253_v5 = vld [vmem:[#allocation5 + $0x418] sm:$0xff]  ;;  %v252_v7 = vld [vmem:[#allocation5 + $0x410] sm:$0xff] }
  0xec   :  { %1025 = vmatprep.subr.mxu1 %v285_v37  ;;  %955 = vmatpush1.msra.mxu0 %v156_v38  ;;  %v249_v8 = vld [vmem:[#allocation5 + $0x3f8] sm:$0xff]  ;;  %v248_v10 = vld [vmem:[#allocation5 + $0x3f0] sm:$0xff] }
  0xed   :  { %1026 = vmatpush1.msra.mxu1 %v284_v39  ;;  %956 = vmatprep.subr.mxu0 %v153_v40  ;;  %v377_v9 = vld [vmem:[#allocation5 + $0x7f8] sm:$0xff]  ;;  %v376_v11 = vld [vmem:[#allocation5 + $0x7f0] sm:$0xff] }
  0xee   :  { %1027 = vmatprep.subr.mxu1 %v281_v41  ;;  %957 = vmatpush1.msra.mxu0 %v152_v42  ;;  %v245_v12 = vld [vmem:[#allocation5 + $0x3d8] sm:$0xff]  ;;  %v244_v14 = vld [vmem:[#allocation5 + $0x3d0] sm:$0xff] }
  0xef   :  { %1028 = vmatpush1.msra.mxu1 %v280_v43  ;;  %958 = vmatprep.subr.mxu0 %v149_v44  ;;  %v373_v13 = vld [vmem:[#allocation5 + $0x7d8] sm:$0xff]  ;;  %v372_v15 = vld [vmem:[#allocation5 + $0x7d0] sm:$0xff] }
  0xf0   :  { %1029 = vmatprep.subr.mxu1 %v277_v45  ;;  %959 = vmatpush1.msra.mxu0 %v148_v46  ;;  %v241_v16 = vld [vmem:[#allocation5 + $0x3b8] sm:$0xff]  ;;  %v240_v18 = vld [vmem:[#allocation5 + $0x3b0] sm:$0xff] }
  0xf1   :  { %1030 = vmatpush1.msra.mxu1 %v276_v47  ;;  %960 = vmatprep.subr.mxu0 %v145_v48  ;;  %v369_v17 = vld [vmem:[#allocation5 + $0x7b8] sm:$0xff]  ;;  %v368_v19 = vld [vmem:[#allocation5 + $0x7b0] sm:$0xff] }
  0xf2   :  { %1031 = vmatprep.subr.mxu1 %v273_v49  ;;  %961 = vmatpush1.msra.mxu0 %v144_v50  ;;  %v237_v20 = vld [vmem:[#allocation5 + $0x398] sm:$0xff]  ;;  %v236_v22 = vld [vmem:[#allocation5 + $0x390] sm:$0xff] }
  0xf3   :  { %1032 = vmatpush1.msra.mxu1 %v272_v51  ;;  %962 = vmatprep.subr.mxu0 %v141_v52  ;;  %v365_v21 = vld [vmem:[#allocation5 + $0x798] sm:$0xff]  ;;  %v364_v23 = vld [vmem:[#allocation5 + $0x790] sm:$0xff] }
  0xf4   :  { %1033 = vmatprep.subr.mxu1 %v269_v53  ;;  %963 = vmatpush1.msra.mxu0 %v140_v54  ;;  %v233_v24 = vld [vmem:[#allocation5 + $0x378] sm:$0xff]  ;;  %v232_v26 = vld [vmem:[#allocation5 + $0x370] sm:$0xff] }
  0xf5   :  { %1034 = vmatpush1.msra.mxu1 %v268_v55  ;;  %964 = vmatprep.subr.mxu0 %v137_v56  ;;  %v361_v25 = vld [vmem:[#allocation5 + $0x778] sm:$0xff]  ;;  %v360_v27 = vld [vmem:[#allocation5 + $0x770] sm:$0xff] }
  0xf6   :  { %1035 = vmatprep.subr.mxu1 %v265_v57  ;;  %965 = vmatpush1.msra.mxu0 %v136_v58  ;;  %v229_v28 = vld [vmem:[#allocation5 + $0x358] sm:$0xff]  ;;  %v228_v30 = vld [vmem:[#allocation5 + $0x350] sm:$0xff] }
  0xf7   :  { %1036 = vmatpush1.msra.mxu1 %v264_v59  ;;  %966 = vmatprep.subr.mxu0 %v133_v60  ;;  %v357_v29 = vld [vmem:[#allocation5 + $0x758] sm:$0xff]  ;;  %v356_v31 = vld [vmem:[#allocation5 + $0x750] sm:$0xff] }
  0xf8   :  { %1037 = vmatprep.subr.mxu1 %v261_v61  ;;  %967 = vmatpush1.msra.mxu0 %v132_v62  ;;  %v225_v32 = vld [vmem:[#allocation5 + $0x338] sm:$0xff]  ;;  %v224_v34 = vld [vmem:[#allocation5 + $0x330] sm:$0xff] }
  0xf9   :  { %1038 = vmatpush1.msra.mxu1 %v260_v63  ;;  %968 = vmatprep.subr.mxu0 %v129_v0  ;;  %v353_v33 = vld [vmem:[#allocation5 + $0x738] sm:$0xff]  ;;  %v352_v35 = vld [vmem:[#allocation5 + $0x730] sm:$0xff] }
  0xfa   :  { %1039 = vmatprep.subr.mxu1 %v257_v1  ;;  %969 = vmatpush1.msra.mxu0 %v128_v2  ;;  %v221_v36 = vld [vmem:[#allocation5 + $0x318] sm:$0xff]  ;;  %v220_v38 = vld [vmem:[#allocation5 + $0x310] sm:$0xff] }
  0xfb   :  { %1040 = vmatpush1.msra.mxu1 %v256_v3  ;;  %970 = vmatprep.subr.mxu0 %v125_v4  ;;  %v349_v37 = vld [vmem:[#allocation5 + $0x718] sm:$0xff]  ;;  %v348_v39 = vld [vmem:[#allocation5 + $0x710] sm:$0xff] }
  0xfc   :  { %1041 = vmatprep.subr.mxu1 %v253_v5  ;;  %971 = vmatpush1.msra.mxu0 %v124_v6  ;;  %v217_v40 = vld [vmem:[#allocation5 + $0x2f8] sm:$0xff]  ;;  %v216_v42 = vld [vmem:[#allocation5 + $0x2f0] sm:$0xff] }
  0xfd   :  { %1042 = vmatpush1.msra.mxu1 %v252_v7  ;;  %972 = vmatprep.subr.mxu0 %v249_v8  ;;  %v345_v41 = vld [vmem:[#allocation5 + $0x6f8] sm:$0xff]  ;;  %v344_v43 = vld [vmem:[#allocation5 + $0x6f0] sm:$0xff] }
  0xfe   :  { %1043 = vmatprep.subr.mxu1 %v377_v9  ;;  %973 = vmatpush2.msra.mxu0 %v248_v10  ;;  %v213_v44 = vld [vmem:[#allocation5 + $0x2d8] sm:$0xff]  ;;  %v212_v46 = vld [vmem:[#allocation5 + $0x2d0] sm:$0xff]  ;;  %v1690_v9 = vld [vmem:[#allocation2 + $0x8] sm:$0xff] }
  0xff   :  { %1044 = vmatpush2.msra.mxu1 %v376_v11  ;;  %974 = vmatprep.subr.mxu0 %v245_v12  ;;  %v341_v45 = vld [vmem:[#allocation5 + $0x6d8] sm:$0xff]  ;;  %v340_v47 = vld [vmem:[#allocation5 + $0x6d0] sm:$0xff]  ;;  %v1691_v11 = vld [vmem:[#allocation2] sm:$0xff] }
 0x100   :  { %1045 = vmatprep.subr.mxu1 %v373_v13  ;;  %975 = vmatpush2.msra.mxu0 %v244_v14  ;;  %v209_v48 = vld [vmem:[#allocation5 + $0x2b8] sm:$0xff]  ;;  %v208_v50 = vld [vmem:[#allocation5 + $0x2b0] sm:$0xff] }
 0x101   :  { %1046 = vmatpush2.msra.mxu1 %v372_v15  ;;  %976 = vmatprep.subr.mxu0 %v241_v16  ;;  %v337_v49 = vld [vmem:[#allocation5 + $0x6b8] sm:$0xff]  ;;  %v336_v51 = vld [vmem:[#allocation5 + $0x6b0] sm:$0xff] }
 0x102   :  { %1047 = vmatprep.subr.mxu1 %v369_v17  ;;  %977 = vmatpush2.msra.mxu0 %v240_v18  ;;  %v205_v52 = vld [vmem:[#allocation5 + $0x298] sm:$0xff]  ;;  %v204_v54 = vld [vmem:[#allocation5 + $0x290] sm:$0xff] }
 0x103   :  { %1048 = vmatpush2.msra.mxu1 %v368_v19  ;;  %978 = vmatprep.subr.mxu0 %v237_v20  ;;  %v333_v53 = vld [vmem:[#allocation5 + $0x698] sm:$0xff]  ;;  %v332_v55 = vld [vmem:[#allocation5 + $0x690] sm:$0xff] }
 0x104   :  { %1049 = vmatprep.subr.mxu1 %v365_v21  ;;  %979 = vmatpush2.msra.mxu0 %v236_v22  ;;  %v201_v56 = vld [vmem:[#allocation5 + $0x278] sm:$0xff]  ;;  %v200_v58 = vld [vmem:[#allocation5 + $0x270] sm:$0xff] }
 0x105   :  { %1050 = vmatpush2.msra.mxu1 %v364_v23  ;;  %980 = vmatprep.subr.mxu0 %v233_v24  ;;  %v329_v57 = vld [vmem:[#allocation5 + $0x678] sm:$0xff]  ;;  %v328_v59 = vld [vmem:[#allocation5 + $0x670] sm:$0xff] }
 0x106   :  { %1051 = vmatprep.subr.mxu1 %v361_v25  ;;  %981 = vmatpush2.msra.mxu0 %v232_v26  ;;  %v197_v60 = vld [vmem:[#allocation5 + $0x258] sm:$0xff]  ;;  %v196_v62 = vld [vmem:[#allocation5 + $0x250] sm:$0xff] }
 0x107   :  { %1052 = vmatpush2.msra.mxu1 %v360_v27  ;;  %982 = vmatprep.subr.mxu0 %v229_v28  ;;  %v325_v61 = vld [vmem:[#allocation5 + $0x658] sm:$0xff]  ;;  %v324_v63 = vld [vmem:[#allocation5 + $0x650] sm:$0xff] }
 0x108   :  { %1053 = vmatprep.subr.mxu1 %v357_v29  ;;  %983 = vmatpush2.msra.mxu0 %v228_v30  ;;  %v193_v0 = vld [vmem:[#allocation5 + $0x238] sm:$0xff]  ;;  %v192_v2 = vld [vmem:[#allocation5 + $0x230] sm:$0xff] }
 0x109   :  { %1054 = vmatpush2.msra.mxu1 %v356_v31  ;;  %984 = vmatprep.subr.mxu0 %v225_v32  ;;  %v321_v1 = vld [vmem:[#allocation5 + $0x638] sm:$0xff]  ;;  %v320_v3 = vld [vmem:[#allocation5 + $0x630] sm:$0xff] }
 0x10a   :  { %1055 = vmatprep.subr.mxu1 %v353_v33  ;;  %985 = vmatpush2.msra.mxu0 %v224_v34  ;;  %v189_v4 = vld [vmem:[#allocation5 + $0x218] sm:$0xff]  ;;  %v188_v6 = vld [vmem:[#allocation5 + $0x210] sm:$0xff] }
 0x10b   :  { %1056 = vmatpush2.msra.mxu1 %v352_v35  ;;  %986 = vmatprep.subr.mxu0 %v221_v36  ;;  %v317_v5 = vld [vmem:[#allocation5 + $0x618] sm:$0xff]  ;;  %v316_v7 = vld [vmem:[#allocation5 + $0x610] sm:$0xff] }
 0x10c   :  { %1057 = vmatprep.subr.mxu1 %v349_v37  ;;  %987 = vmatpush2.msra.mxu0 %v220_v38  ;;  %v441_v8 = vld [vmem:[#allocation5 + $0x9f8] sm:$0xff]  ;;  %v440_v12 = vld [vmem:[#allocation5 + $0x9f0] sm:$0xff] }
 0x10d   :  { %1058 = vmatpush2.msra.mxu1 %v348_v39  ;;  %988 = vmatprep.subr.mxu0 %v217_v40  ;;  %v569_v10 = vld [vmem:[#allocation5 + $0xdf8] sm:$0xff]  ;;  %v568_v13 = vld [vmem:[#allocation5 + $0xdf0] sm:$0xff] }
 0x10e   :  { %1059 = vmatprep.subr.mxu1 %v345_v41  ;;  %989 = vmatpush2.msra.mxu0 %v216_v42  ;;  %v1692_v14 = vld [vmem:[#allocation2 + $0x18] sm:$0xff]  ;;  %v1693_v17 = vld [vmem:[#allocation2 + $0x10] sm:$0xff] }
 0x10f   :  { %1060 = vmatpush2.msra.mxu1 %v344_v43  ;;  %990 = vmatprep.subr.mxu0 %v213_v44  ;;  %v437_v15 = vld [vmem:[#allocation5 + $0x9d8] sm:$0xff]  ;;  %v436_v18 = vld [vmem:[#allocation5 + $0x9d0] sm:$0xff] }
 0x110   :  { %1061 = vmatprep.subr.mxu1 %v341_v45  ;;  %991 = vmatpush2.msra.mxu0 %v212_v46  ;;  %v565_v16 = vld [vmem:[#allocation5 + $0xdd8] sm:$0xff]  ;;  %v564_v19 = vld [vmem:[#allocation5 + $0xdd0] sm:$0xff] }
 0x111   :  { %1062 = vmatpush2.msra.mxu1 %v340_v47  ;;  %992 = vmatprep.subr.mxu0 %v209_v48  ;;  %v433_v20 = vld [vmem:[#allocation5 + $0x9b8] sm:$0xff]  ;;  %v432_v22 = vld [vmem:[#allocation5 + $0x9b0] sm:$0xff] }
 0x112   :  { %1063 = vmatprep.subr.mxu1 %v337_v49  ;;  %993 = vmatpush2.msra.mxu0 %v208_v50  ;;  %v561_v21 = vld [vmem:[#allocation5 + $0xdb8] sm:$0xff]  ;;  %v560_v23 = vld [vmem:[#allocation5 + $0xdb0] sm:$0xff] }
 0x113   :  { %1064 = vmatpush2.msra.mxu1 %v336_v51  ;;  %994 = vmatprep.subr.mxu0 %v205_v52  ;;  %v429_v24 = vld [vmem:[#allocation5 + $0x998] sm:$0xff]  ;;  %v428_v26 = vld [vmem:[#allocation5 + $0x990] sm:$0xff] }
 0x114   :  { %1065 = vmatprep.subr.mxu1 %v333_v53  ;;  %995 = vmatpush2.msra.mxu0 %v204_v54  ;;  %v557_v25 = vld [vmem:[#allocation5 + $0xd98] sm:$0xff]  ;;  %v556_v27 = vld [vmem:[#allocation5 + $0xd90] sm:$0xff] }
 0x115   :  { %1066 = vmatpush2.msra.mxu1 %v332_v55  ;;  %996 = vmatprep.subr.mxu0 %v201_v56  ;;  %v425_v28 = vld [vmem:[#allocation5 + $0x978] sm:$0xff]  ;;  %v424_v30 = vld [vmem:[#allocation5 + $0x970] sm:$0xff] }
 0x116   :  { %1067 = vmatprep.subr.mxu1 %v329_v57  ;;  %997 = vmatpush2.msra.mxu0 %v200_v58  ;;  %v553_v29 = vld [vmem:[#allocation5 + $0xd78] sm:$0xff]  ;;  %v552_v31 = vld [vmem:[#allocation5 + $0xd70] sm:$0xff] }
 0x117   :  { %1068 = vmatpush2.msra.mxu1 %v328_v59  ;;  %998 = vmatprep.subr.mxu0 %v197_v60  ;;  %v421_v32 = vld [vmem:[#allocation5 + $0x958] sm:$0xff]  ;;  %v420_v34 = vld [vmem:[#allocation5 + $0x950] sm:$0xff] }
 0x118   :  { %1069 = vmatprep.subr.mxu1 %v325_v61  ;;  %999 = vmatpush2.msra.mxu0 %v196_v62  ;;  %v549_v33 = vld [vmem:[#allocation5 + $0xd58] sm:$0xff]  ;;  %v548_v35 = vld [vmem:[#allocation5 + $0xd50] sm:$0xff] }
 0x119   :  { %1070 = vmatpush2.msra.mxu1 %v324_v63  ;;  %1000 = vmatprep.subr.mxu0 %v193_v0  ;;  %v417_v36 = vld [vmem:[#allocation5 + $0x938] sm:$0xff]  ;;  %v416_v38 = vld [vmem:[#allocation5 + $0x930] sm:$0xff] }
 0x11a   :  { %1071 = vmatprep.subr.mxu1 %v321_v1  ;;  %1001 = vmatpush2.msra.mxu0 %v192_v2  ;;  %v545_v37 = vld [vmem:[#allocation5 + $0xd38] sm:$0xff]  ;;  %v544_v39 = vld [vmem:[#allocation5 + $0xd30] sm:$0xff] }
 0x11b   :  { %1072 = vmatpush2.msra.mxu1 %v320_v3  ;;  %1002 = vmatprep.subr.mxu0 %v189_v4  ;;  %v413_v40 = vld [vmem:[#allocation5 + $0x918] sm:$0xff]  ;;  %v412_v42 = vld [vmem:[#allocation5 + $0x910] sm:$0xff] }
 0x11c   :  { %1073 = vmatprep.subr.mxu1 %v317_v5  ;;  %1003 = vmatpush2.msra.mxu0 %v188_v6  ;;  %v541_v41 = vld [vmem:[#allocation5 + $0xd18] sm:$0xff]  ;;  %v540_v43 = vld [vmem:[#allocation5 + $0xd10] sm:$0xff] }
 0x11d   :  { %1004 = vmatprep.mubr.f32.mxu0 %v1690_v9  ;;  %1074 = vmatpush2.msra.mxu1 %v316_v7  ;;  %v409_v44 = vld [vmem:[#allocation5 + $0x8f8] sm:$0xff]  ;;  %v408_v46 = vld [vmem:[#allocation5 + $0x8f0] sm:$0xff] }
 0x11e   :  { %1005 = vmatmul.mubr.f32.vlgmr.msra.gmra.mxu0 %v1691_v11  ;;  %1075 = vmatprep.mubr.f32.mxu1 %v1692_v14  ;;  %v537_v45 = vld [vmem:[#allocation5 + $0xcf8] sm:$0xff]  ;;  %v536_v47 = vld [vmem:[#allocation5 + $0xcf0] sm:$0xff] }
 0x11f   :  { %1082 = vmatprep.subr.mxu0 %v441_v8  ;;  %1153 = vmatprep.subr.mxu1 %v569_v10  ;;  %v405_v48 = vld [vmem:[#allocation5 + $0x8d8] sm:$0xff]  ;;  %v404_v50 = vld [vmem:[#allocation5 + $0x8d0] sm:$0xff] }
 0x120   :  { %1076 = vmatmul.mubr.f32.vlgmr.msra.gmra.mxu1 %v1693_v17  ;;  %1083 = vmatpush1.msra.mxu0 %v440_v12  ;;  %v533_v49 = vld [vmem:[#allocation5 + $0xcd8] sm:$0xff]  ;;  %v532_v51 = vld [vmem:[#allocation5 + $0xcd0] sm:$0xff] }
 0x121   :  { %1154 = vmatpush1.msra.mxu1 %v568_v13  ;;  %1084 = vmatprep.subr.mxu0 %v437_v15  ;;  %v401_v52 = vld [vmem:[#allocation5 + $0x8b8] sm:$0xff]  ;;  %v400_v54 = vld [vmem:[#allocation5 + $0x8b0] sm:$0xff] }
 0x122   :  { %1155 = vmatprep.subr.mxu1 %v565_v16  ;;  %1085 = vmatpush1.msra.mxu0 %v436_v18  ;;  %v529_v53 = vld [vmem:[#allocation5 + $0xcb8] sm:$0xff]  ;;  %v528_v55 = vld [vmem:[#allocation5 + $0xcb0] sm:$0xff] }
 0x123   :  { %1156 = vmatpush1.msra.mxu1 %v564_v19  ;;  %1086 = vmatprep.subr.mxu0 %v433_v20  ;;  %v397_v56 = vld [vmem:[#allocation5 + $0x898] sm:$0xff]  ;;  %v396_v58 = vld [vmem:[#allocation5 + $0x890] sm:$0xff] }
 0x124   :  { %1157 = vmatprep.subr.mxu1 %v561_v21  ;;  %1087 = vmatpush1.msra.mxu0 %v432_v22  ;;  %v525_v57 = vld [vmem:[#allocation5 + $0xc98] sm:$0xff]  ;;  %v524_v59 = vld [vmem:[#allocation5 + $0xc90] sm:$0xff] }
 0x125   :  { %1158 = vmatpush1.msra.mxu1 %v560_v23  ;;  %1088 = vmatprep.subr.mxu0 %v429_v24  ;;  %v393_v60 = vld [vmem:[#allocation5 + $0x878] sm:$0xff]  ;;  %v392_v62 = vld [vmem:[#allocation5 + $0x870] sm:$0xff] }
 0x126   :  { %1159 = vmatprep.subr.mxu1 %v557_v25  ;;  %1089 = vmatpush1.msra.mxu0 %v428_v26  ;;  %v521_v61 = vld [vmem:[#allocation5 + $0xc78] sm:$0xff]  ;;  %v520_v63 = vld [vmem:[#allocation5 + $0xc70] sm:$0xff] }
 0x127   :  { %1160 = vmatpush1.msra.mxu1 %v556_v27  ;;  %1090 = vmatprep.subr.mxu0 %v425_v28  ;;  %v389_v0 = vld [vmem:[#allocation5 + $0x858] sm:$0xff]  ;;  %v388_v2 = vld [vmem:[#allocation5 + $0x850] sm:$0xff] }
 0x128   :  { %1161 = vmatprep.subr.mxu1 %v553_v29  ;;  %1091 = vmatpush1.msra.mxu0 %v424_v30  ;;  %v517_v1 = vld [vmem:[#allocation5 + $0xc58] sm:$0xff]  ;;  %v516_v3 = vld [vmem:[#allocation5 + $0xc50] sm:$0xff] }
 0x129   :  { %1162 = vmatpush1.msra.mxu1 %v552_v31  ;;  %1092 = vmatprep.subr.mxu0 %v421_v32  ;;  %v385_v4 = vld [vmem:[#allocation5 + $0x838] sm:$0xff]  ;;  %v384_v6 = vld [vmem:[#allocation5 + $0x830] sm:$0xff] }
 0x12a   :  { %1163 = vmatprep.subr.mxu1 %v549_v33  ;;  %1093 = vmatpush1.msra.mxu0 %v420_v34  ;;  %v513_v5 = vld [vmem:[#allocation5 + $0xc38] sm:$0xff]  ;;  %v512_v7 = vld [vmem:[#allocation5 + $0xc30] sm:$0xff] }
 0x12b   :  { %1164 = vmatpush1.msra.mxu1 %v548_v35  ;;  %1094 = vmatprep.subr.mxu0 %v417_v36  ;;  %v381_v8 = vld [vmem:[#allocation5 + $0x818] sm:$0xff]  ;;  %v380_v10 = vld [vmem:[#allocation5 + $0x810] sm:$0xff] }
 0x12c   :  { %1165 = vmatprep.subr.mxu1 %v545_v37  ;;  %1095 = vmatpush1.msra.mxu0 %v416_v38  ;;  %v509_v9 = vld [vmem:[#allocation5 + $0xc18] sm:$0xff]  ;;  %v508_v11 = vld [vmem:[#allocation5 + $0xc10] sm:$0xff] }
 0x12d   :  { %1166 = vmatpush1.msra.mxu1 %v544_v39  ;;  %1096 = vmatprep.subr.mxu0 %v413_v40  ;;  %v505_v12 = vld [vmem:[#allocation5 + $0xbf8] sm:$0xff]  ;;  %v504_v14 = vld [vmem:[#allocation5 + $0xbf0] sm:$0xff] }
 0x12e   :  { %1167 = vmatprep.subr.mxu1 %v541_v41  ;;  %1097 = vmatpush1.msra.mxu0 %v412_v42  ;;  %v633_v13 = vld [vmem:[#allocation5 + $0xff8] sm:$0xff]  ;;  %v632_v15 = vld [vmem:[#allocation5 + $0xff0] sm:$0xff] }
 0x12f   :  { %1168 = vmatpush1.msra.mxu1 %v540_v43  ;;  %1098 = vmatprep.subr.mxu0 %v409_v44  ;;  %v501_v16 = vld [vmem:[#allocation5 + $0xbd8] sm:$0xff]  ;;  %v500_v18 = vld [vmem:[#allocation5 + $0xbd0] sm:$0xff] }
 0x130   :  { %1169 = vmatprep.subr.mxu1 %v537_v45  ;;  %1099 = vmatpush1.msra.mxu0 %v408_v46  ;;  %v629_v17 = vld [vmem:[#allocation5 + $0xfd8] sm:$0xff]  ;;  %v628_v19 = vld [vmem:[#allocation5 + $0xfd0] sm:$0xff] }
 0x131   :  { %1170 = vmatpush1.msra.mxu1 %v536_v47  ;;  %1100 = vmatprep.subr.mxu0 %v405_v48  ;;  %v497_v20 = vld [vmem:[#allocation5 + $0xbb8] sm:$0xff]  ;;  %v496_v22 = vld [vmem:[#allocation5 + $0xbb0] sm:$0xff] }
 0x132   :  { %1171 = vmatprep.subr.mxu1 %v533_v49  ;;  %1101 = vmatpush1.msra.mxu0 %v404_v50  ;;  %v625_v21 = vld [vmem:[#allocation5 + $0xfb8] sm:$0xff]  ;;  %v624_v23 = vld [vmem:[#allocation5 + $0xfb0] sm:$0xff] }
 0x133   :  { %1172 = vmatpush1.msra.mxu1 %v532_v51  ;;  %1102 = vmatprep.subr.mxu0 %v401_v52  ;;  %v493_v24 = vld [vmem:[#allocation5 + $0xb98] sm:$0xff]  ;;  %v492_v26 = vld [vmem:[#allocation5 + $0xb90] sm:$0xff] }
 0x134   :  { %1173 = vmatprep.subr.mxu1 %v529_v53  ;;  %1103 = vmatpush1.msra.mxu0 %v400_v54  ;;  %v621_v25 = vld [vmem:[#allocation5 + $0xf98] sm:$0xff]  ;;  %v620_v27 = vld [vmem:[#allocation5 + $0xf90] sm:$0xff] }
 0x135   :  { %1174 = vmatpush1.msra.mxu1 %v528_v55  ;;  %1104 = vmatprep.subr.mxu0 %v397_v56  ;;  %v489_v28 = vld [vmem:[#allocation5 + $0xb78] sm:$0xff]  ;;  %v488_v30 = vld [vmem:[#allocation5 + $0xb70] sm:$0xff] }
 0x136   :  { %1175 = vmatprep.subr.mxu1 %v525_v57  ;;  %1105 = vmatpush1.msra.mxu0 %v396_v58  ;;  %v617_v29 = vld [vmem:[#allocation5 + $0xf78] sm:$0xff]  ;;  %v616_v31 = vld [vmem:[#allocation5 + $0xf70] sm:$0xff] }
 0x137   :  { %1176 = vmatpush1.msra.mxu1 %v524_v59  ;;  %1106 = vmatprep.subr.mxu0 %v393_v60  ;;  %v485_v32 = vld [vmem:[#allocation5 + $0xb58] sm:$0xff]  ;;  %v484_v34 = vld [vmem:[#allocation5 + $0xb50] sm:$0xff] }
 0x138   :  { %1177 = vmatprep.subr.mxu1 %v521_v61  ;;  %1107 = vmatpush1.msra.mxu0 %v392_v62  ;;  %v613_v33 = vld [vmem:[#allocation5 + $0xf58] sm:$0xff]  ;;  %v612_v35 = vld [vmem:[#allocation5 + $0xf50] sm:$0xff] }
 0x139   :  { %1178 = vmatpush1.msra.mxu1 %v520_v63  ;;  %1108 = vmatprep.subr.mxu0 %v389_v0  ;;  %v481_v36 = vld [vmem:[#allocation5 + $0xb38] sm:$0xff]  ;;  %v480_v38 = vld [vmem:[#allocation5 + $0xb30] sm:$0xff] }
 0x13a   :  { %1179 = vmatprep.subr.mxu1 %v517_v1  ;;  %1109 = vmatpush1.msra.mxu0 %v388_v2  ;;  %v609_v37 = vld [vmem:[#allocation5 + $0xf38] sm:$0xff]  ;;  %v608_v39 = vld [vmem:[#allocation5 + $0xf30] sm:$0xff] }
 0x13b   :  { %1180 = vmatpush1.msra.mxu1 %v516_v3  ;;  %1110 = vmatprep.subr.mxu0 %v385_v4  ;;  %v477_v40 = vld [vmem:[#allocation5 + $0xb18] sm:$0xff]  ;;  %v476_v42 = vld [vmem:[#allocation5 + $0xb10] sm:$0xff] }
 0x13c   :  { %1181 = vmatprep.subr.mxu1 %v513_v5  ;;  %1111 = vmatpush1.msra.mxu0 %v384_v6  ;;  %v605_v41 = vld [vmem:[#allocation5 + $0xf18] sm:$0xff]  ;;  %v604_v43 = vld [vmem:[#allocation5 + $0xf10] sm:$0xff] }
 0x13d   :  { %1182 = vmatpush1.msra.mxu1 %v512_v7  ;;  %1112 = vmatprep.subr.mxu0 %v381_v8  ;;  %v473_v44 = vld [vmem:[#allocation5 + $0xaf8] sm:$0xff]  ;;  %v472_v46 = vld [vmem:[#allocation5 + $0xaf0] sm:$0xff] }
 0x13e   :  { %1183 = vmatprep.subr.mxu1 %v509_v9  ;;  %1113 = vmatpush1.msra.mxu0 %v380_v10  ;;  %v601_v45 = vld [vmem:[#allocation5 + $0xef8] sm:$0xff]  ;;  %v600_v47 = vld [vmem:[#allocation5 + $0xef0] sm:$0xff] }
 0x13f   :  { %1184 = vmatpush1.msra.mxu1 %v508_v11  ;;  %1114 = vmatprep.subr.mxu0 %v505_v12  ;;  %v469_v48 = vld [vmem:[#allocation5 + $0xad8] sm:$0xff]  ;;  %v468_v50 = vld [vmem:[#allocation5 + $0xad0] sm:$0xff]  ;;  %v1694_v12 = vld [vmem:[#allocation2 + $0x28] sm:$0xff] }
 0x140   :  { %1185 = vmatprep.subr.mxu1 %v633_v13  ;;  %1115 = vmatpush2.msra.mxu0 %v504_v14  ;;  %v597_v49 = vld [vmem:[#allocation5 + $0xed8] sm:$0xff]  ;;  %v596_v51 = vld [vmem:[#allocation5 + $0xed0] sm:$0xff] }
 0x141   :  { %1186 = vmatpush2.msra.mxu1 %v632_v15  ;;  %1116 = vmatprep.subr.mxu0 %v501_v16  ;;  %v465_v52 = vld [vmem:[#allocation5 + $0xab8] sm:$0xff]  ;;  %v464_v54 = vld [vmem:[#allocation5 + $0xab0] sm:$0xff]  ;;  %v1696_v16 = vld [vmem:[#allocation2 + $0x20] sm:$0xff] }
 0x142   :  { %1187 = vmatprep.subr.mxu1 %v629_v17  ;;  %1117 = vmatpush2.msra.mxu0 %v500_v18  ;;  %v593_v53 = vld [vmem:[#allocation5 + $0xeb8] sm:$0xff]  ;;  %v592_v55 = vld [vmem:[#allocation5 + $0xeb0] sm:$0xff] }
 0x143   :  { %1188 = vmatpush2.msra.mxu1 %v628_v19  ;;  %1118 = vmatprep.subr.mxu0 %v497_v20  ;;  %v461_v56 = vld [vmem:[#allocation5 + $0xa98] sm:$0xff]  ;;  %v460_v58 = vld [vmem:[#allocation5 + $0xa90] sm:$0xff]  ;;  %v1256_v19 = vld [vmem:[#allocation8 + $0xe0] sm:$0xff] }
 0x144   :  { %1189 = vmatprep.subr.mxu1 %v625_v21  ;;  %1119 = vmatpush2.msra.mxu0 %v496_v22  ;;  %v589_v57 = vld [vmem:[#allocation5 + $0xe98] sm:$0xff]  ;;  %v588_v59 = vld [vmem:[#allocation5 + $0xe90] sm:$0xff] }
 0x145   :  { %1190 = vmatpush2.msra.mxu1 %v624_v23  ;;  %1120 = vmatprep.subr.mxu0 %v493_v24  ;;  %v457_v60 = vld [vmem:[#allocation5 + $0xa78] sm:$0xff]  ;;  %v456_v62 = vld [vmem:[#allocation5 + $0xa70] sm:$0xff] }
 0x146   :  { %1191 = vmatprep.subr.mxu1 %v621_v25  ;;  %1121 = vmatpush2.msra.mxu0 %v492_v26  ;;  %v585_v61 = vld [vmem:[#allocation5 + $0xe78] sm:$0xff]  ;;  %v584_v63 = vld [vmem:[#allocation5 + $0xe70] sm:$0xff]  ;;  %v1320_v25 = vld [vmem:[#allocation8 + $0x2e0] sm:$0xff] }
 0x147   :  { %1192 = vmatpush2.msra.mxu1 %v620_v27  ;;  %1122 = vmatprep.subr.mxu0 %v489_v28  ;;  %v453_v0 = vld [vmem:[#allocation5 + $0xa58] sm:$0xff]  ;;  %v452_v2 = vld [vmem:[#allocation5 + $0xa50] sm:$0xff]  ;;  %v1252_v28 = vld [vmem:[#allocation8 + $0xc0] sm:$0xff] }
 0x148   :  { %1193 = vmatprep.subr.mxu1 %v617_v29  ;;  %1123 = vmatpush2.msra.mxu0 %v488_v30  ;;  %v581_v1 = vld [vmem:[#allocation5 + $0xe58] sm:$0xff]  ;;  %v580_v3 = vld [vmem:[#allocation5 + $0xe50] sm:$0xff] }
 0x149   :  { %1194 = vmatpush2.msra.mxu1 %v616_v31  ;;  %1124 = vmatprep.subr.mxu0 %v485_v32  ;;  %v449_v4 = vld [vmem:[#allocation5 + $0xa38] sm:$0xff]  ;;  %v448_v6 = vld [vmem:[#allocation5 + $0xa30] sm:$0xff] }
 0x14a   :  { %1195 = vmatprep.subr.mxu1 %v613_v33  ;;  %1125 = vmatpush2.msra.mxu0 %v484_v34  ;;  %v577_v5 = vld [vmem:[#allocation5 + $0xe38] sm:$0xff]  ;;  %v576_v7 = vld [vmem:[#allocation5 + $0xe30] sm:$0xff]  ;;  %v1316_v33 = vld [vmem:[#allocation8 + $0x2c0] sm:$0xff] }
 0x14b   :  { %1196 = vmatpush2.msra.mxu1 %v612_v35  ;;  %1126 = vmatprep.subr.mxu0 %v481_v36  ;;  %v445_v8 = vld [vmem:[#allocation5 + $0xa18] sm:$0xff]  ;;  %v444_v10 = vld [vmem:[#allocation5 + $0xa10] sm:$0xff]  ;;  %v1248_v36 = vld [vmem:[#allocation8 + $0xa0] sm:$0xff] }
 0x14c   :  { %1197 = vmatprep.subr.mxu1 %v609_v37  ;;  %1127 = vmatpush2.msra.mxu0 %v480_v38  ;;  %v573_v9 = vld [vmem:[#allocation5 + $0xe18] sm:$0xff]  ;;  %v572_v11 = vld [vmem:[#allocation5 + $0xe10] sm:$0xff] }
 0x14d   :  { %1198 = vmatpush2.msra.mxu1 %v608_v39  ;;  %1128 = vmatprep.subr.mxu0 %v477_v40  ;;  %v1259_v13 = vld [vmem:[#allocation8 + $0xf8] sm:$0xff]  ;;  %v1258_v15 = vld [vmem:[#allocation8 + $0xf0] sm:$0xff]  ;;  %v1257_v18 = vld [vmem:[#allocation8 + $0xe8] sm:$0xff] }
 0x14e   :  { %1199 = vmatprep.subr.mxu1 %v605_v41  ;;  %1129 = vmatpush2.msra.mxu0 %v476_v42  ;;  %v1695_v14 = vld [vmem:[#allocation2 + $0x38] sm:$0xff]  ;;  %v1697_v17 = vld [vmem:[#allocation2 + $0x30] sm:$0xff]  ;;  %v1312_v41 = vld [vmem:[#allocation8 + $0x2a0] sm:$0xff] }
 0x14f   :  { %1200 = vmatpush2.msra.mxu1 %v604_v43  ;;  %1130 = vmatprep.subr.mxu0 %v473_v44  ;;  %v1255_v20 = vld [vmem:[#allocation8 + $0xd8] sm:$0xff]  ;;  %v1322_v22 = vld [vmem:[#allocation8 + $0x2f0] sm:$0xff]  ;;  %v1321_v23 = vld [vmem:[#allocation8 + $0x2e8] sm:$0xff] }
 0x150   :  { %1201 = vmatprep.subr.mxu1 %v601_v45  ;;  %1131 = vmatpush2.msra.mxu0 %v472_v46  ;;  %v1323_v21 = vld [vmem:[#allocation8 + $0x2f8] sm:$0xff]  ;;  %v1254_v24 = vld [vmem:[#allocation8 + $0xd0] sm:$0xff]  ;;  %v1253_v26 = vld [vmem:[#allocation8 + $0xc8] sm:$0xff] }
 0x151   :  { %1202 = vmatpush2.msra.mxu1 %v600_v47  ;;  %1132 = vmatprep.subr.mxu0 %v469_v48  ;;  %v1319_v27 = vld [vmem:[#allocation8 + $0x2d8] sm:$0xff]  ;;  %v1318_v29 = vld [vmem:[#allocation8 + $0x2d0] sm:$0xff]  ;;  %v1317_v31 = vld [vmem:[#allocation8 + $0x2c8] sm:$0xff] }
 0x152   :  { %1203 = vmatprep.subr.mxu1 %v597_v49  ;;  %1133 = vmatpush2.msra.mxu0 %v468_v50  ;;  %v1251_v30 = vld [vmem:[#allocation8 + $0xb8] sm:$0xff]  ;;  %v1250_v32 = vld [vmem:[#allocation8 + $0xb0] sm:$0xff]  ;;  %v1249_v34 = vld [vmem:[#allocation8 + $0xa8] sm:$0xff] }
 0x153   :  { %1204 = vmatpush2.msra.mxu1 %v596_v51  ;;  %1134 = vmatprep.subr.mxu0 %v465_v52  ;;  %v1315_v35 = vld [vmem:[#allocation8 + $0x2b8] sm:$0xff]  ;;  %v1314_v37 = vld [vmem:[#allocation8 + $0x2b0] sm:$0xff]  ;;  %v1313_v39 = vld [vmem:[#allocation8 + $0x2a8] sm:$0xff] }
 0x154   :  { %1205 = vmatprep.subr.mxu1 %v593_v53  ;;  %1135 = vmatpush2.msra.mxu0 %v464_v54  ;;  %v1247_v38 = vld [vmem:[#allocation8 + $0x98] sm:$0xff]  ;;  %v1246_v40 = vld [vmem:[#allocation8 + $0x90] sm:$0xff]  ;;  %v1245_v42 = vld [vmem:[#allocation8 + $0x88] sm:$0xff] }
 0x155   :  { %1206 = vmatpush2.msra.mxu1 %v592_v55  ;;  %1136 = vmatprep.subr.mxu0 %v461_v56  ;;  %v1311_v43 = vld [vmem:[#allocation8 + $0x298] sm:$0xff]  ;;  %v1244_v44 = vld [vmem:[#allocation8 + $0x80] sm:$0xff]  ;;  %v1310_v45 = vld [vmem:[#allocation8 + $0x290] sm:$0xff] }
 0x156   :  { %1207 = vmatprep.subr.mxu1 %v589_v57  ;;  %1137 = vmatpush2.msra.mxu0 %v460_v58  ;;  %v1243_v46 = vld [vmem:[#allocation8 + $0x78] sm:$0xff]  ;;  %v1309_v47 = vld [vmem:[#allocation8 + $0x288] sm:$0xff]  ;;  %v1242_v48 = vld [vmem:[#allocation8 + $0x70] sm:$0xff] }
 0x157   :  { %1208 = vmatpush2.msra.mxu1 %v588_v59  ;;  %1138 = vmatprep.subr.mxu0 %v457_v60  ;;  %v1308_v49 = vld [vmem:[#allocation8 + $0x280] sm:$0xff]  ;;  %v1241_v50 = vld [vmem:[#allocation8 + $0x68] sm:$0xff]  ;;  %v1307_v51 = vld [vmem:[#allocation8 + $0x278] sm:$0xff] }
 0x158   :  { %1209 = vmatprep.subr.mxu1 %v585_v61  ;;  %1139 = vmatpush2.msra.mxu0 %v456_v62  ;;  %v1240_v52 = vld [vmem:[#allocation8 + $0x60] sm:$0xff]  ;;  %v1306_v53 = vld [vmem:[#allocation8 + $0x270] sm:$0xff]  ;;  %v1239_v54 = vld [vmem:[#allocation8 + $0x58] sm:$0xff] }
 0x159   :  { %1210 = vmatpush2.msra.mxu1 %v584_v63  ;;  %1140 = vmatprep.subr.mxu0 %v453_v0  ;;  %v1305_v55 = vld [vmem:[#allocation8 + $0x268] sm:$0xff]  ;;  %v1238_v56 = vld [vmem:[#allocation8 + $0x50] sm:$0xff]  ;;  %v1304_v57 = vld [vmem:[#allocation8 + $0x260] sm:$0xff] }
 0x15a   :  { %1211 = vmatprep.subr.mxu1 %v581_v1  ;;  %1141 = vmatpush2.msra.mxu0 %v452_v2  ;;  %v1237_v58 = vld [vmem:[#allocation8 + $0x48] sm:$0xff]  ;;  %v1303_v59 = vld [vmem:[#allocation8 + $0x258] sm:$0xff]  ;;  %v1236_v60 = vld [vmem:[#allocation8 + $0x40] sm:$0xff] }
 0x15b   :  { %1212 = vmatpush2.msra.mxu1 %v580_v3  ;;  %1142 = vmatprep.subr.mxu0 %v449_v4  ;;  %v1302_v61 = vld [vmem:[#allocation8 + $0x250] sm:$0xff]  ;;  %v1235_v62 = vld [vmem:[#allocation8 + $0x38] sm:$0xff]  ;;  %v1301_v63 = vld [vmem:[#allocation8 + $0x248] sm:$0xff] }
 0x15c   :  { %1213 = vmatprep.subr.mxu1 %v577_v5  ;;  %1143 = vmatpush2.msra.mxu0 %v448_v6  ;;  %v1234_v0 = vld [vmem:[#allocation8 + $0x30] sm:$0xff]  ;;  %v1300_v1 = vld [vmem:[#allocation8 + $0x240] sm:$0xff]  ;;  %v1233_v2 = vld [vmem:[#allocation8 + $0x28] sm:$0xff] }
 0x15d   :  { %1214 = vmatpush2.msra.mxu1 %v576_v7  ;;  %1144 = vmatprep.subr.mxu0 %v445_v8  ;;  %v1299_v3 = vld [vmem:[#allocation8 + $0x238] sm:$0xff]  ;;  %v1232_v4 = vld [vmem:[#allocation8 + $0x20] sm:$0xff]  ;;  %v1298_v5 = vld [vmem:[#allocation8 + $0x230] sm:$0xff] }
 0x15e   :  { %1215 = vmatprep.subr.mxu1 %v573_v9  ;;  %1145 = vmatpush2.msra.mxu0 %v444_v10  ;;  %v1231_v6 = vld [vmem:[#allocation8 + $0x18] sm:$0xff]  ;;  %v1297_v7 = vld [vmem:[#allocation8 + $0x228] sm:$0xff]  ;;  %v1230_v8 = vld [vmem:[#allocation8 + $0x10] sm:$0xff] }
 0x15f   :  { %1146 = vmatprep.mubr.f32.mxu0 %v1694_v12  ;;  %1216 = vmatpush2.msra.mxu1 %v572_v11  ;;  %v1296_v9 = vld [vmem:[#allocation8 + $0x220] sm:$0xff]  ;;  %v1229_v10 = vld [vmem:[#allocation8 + $0x8] sm:$0xff]  ;;  %v1295_v11 = vld [vmem:[#allocation8 + $0x218] sm:$0xff] }
 0x160   :  { %1217 = vmatprep.mubr.f32.mxu1 %v1695_v14  ;;  %1147 = vmatmul.mubr.f32.vlgmr.msra.gmra.mxu0 %v1696_v16  ;;  %v1228_v12 = vld [vmem:[#allocation8] sm:$0xff]  ;;  %v1291_v14 = vld [vmem:[#allocation8 + $0x1f8] sm:$0xff]  ;;  %v1290_v16 = vld [vmem:[#allocation8 + $0x1f0] sm:$0xff] }
 0x161   :  { %1218 = vmatmul.mubr.f32.vlgmr.msra.gmra.mxu1 %v1697_v17  ;;  %1368 = vmatprep.subr.mxu0 %v1259_v13  ;;  %v1294_v13 = vld [vmem:[#allocation8 + $0x210] sm:$0xff]  ;;  %v1292_v17 = vld [vmem:[#allocation8 + $0x200] sm:$0xff] }
 0x162   :  { %1369 = vmatpush1.msra.mxu0 %v1258_v15  ;;  %1439 = vmatprep.subr.mxu1 %v1323_v21  ;;  %v1293_v15 = vld [vmem:[#allocation8 + $0x208] sm:$0xff]  ;;  %v1354_v21 = vld [vmem:[#allocation8 + $0x3f0] sm:$0xff] }
 0x163   :  { %1370 = vmatprep.subr.mxu0 %v1257_v18  ;;  %1440 = vmatpush1.msra.mxu1 %v1322_v22  ;;  %v1289_v18 = vld [vmem:[#allocation8 + $0x1e8] sm:$0xff]  ;;  %v1287_v22 = vld [vmem:[#allocation8 + $0x1d8] sm:$0xff] }
 0x164   :  { %1371 = vmatpush1.msra.mxu0 %v1256_v19  ;;  %1441 = vmatprep.subr.mxu1 %v1321_v23  ;;  %v1355_v19 = vld [vmem:[#allocation8 + $0x3f8] sm:$0xff]  ;;  %v1353_v23 = vld [vmem:[#allocation8 + $0x3e8] sm:$0xff] }
 0x165   :  { %1372 = vmatprep.subr.mxu0 %v1255_v20  ;;  %1442 = vmatpush1.msra.mxu1 %v1320_v25  ;;  %v1288_v20 = vld [vmem:[#allocation8 + $0x1e0] sm:$0xff] }
 0x166   :  { %1373 = vmatpush1.msra.mxu0 %v1254_v24  ;;  %1443 = vmatprep.subr.mxu1 %v1319_v27  ;;  %v1286_v24 = vld [vmem:[#allocation8 + $0x1d0] sm:$0xff]  ;;  %v1352_v25 = vld [vmem:[#allocation8 + $0x3e0] sm:$0xff]  ;;  %v1351_v27 = vld [vmem:[#allocation8 + $0x3d8] sm:$0xff] }
 0x167   :  { %1374 = vmatprep.subr.mxu0 %v1253_v26  ;;  %1444 = vmatpush1.msra.mxu1 %v1318_v29  ;;  %v1285_v26 = vld [vmem:[#allocation8 + $0x1c8] sm:$0xff]  ;;  %v1350_v29 = vld [vmem:[#allocation8 + $0x3d0] sm:$0xff] }
 0x168   :  { %1375 = vmatpush1.msra.mxu0 %v1252_v28  ;;  %1445 = vmatprep.subr.mxu1 %v1317_v31  ;;  %v1284_v28 = vld [vmem:[#allocation8 + $0x1c0] sm:$0xff]  ;;  %v1283_v31 = vld [vmem:[#allocation8 + $0x1b8] sm:$0xff] }
 0x169   :  { %1376 = vmatprep.subr.mxu0 %v1251_v30  ;;  %1446 = vmatpush1.msra.mxu1 %v1316_v33  ;;  %v636_v30 = vlaneseq  ;;  %v1282_v33 = vld [vmem:[#allocation8 + $0x1b0] sm:$0xff] }
 0x16a   :  { %1377 = vmatpush1.msra.mxu0 %v1250_v32  ;;  %1447 = vmatprep.subr.mxu1 %v1315_v35  ;;  %v1349_v32 = vld [vmem:[#allocation8 + $0x3c8] sm:$0xff] }
 0x16b   :  { %1378 = vmatprep.subr.mxu0 %v1249_v34  ;;  %1448 = vmatpush1.msra.mxu1 %v1314_v37  ;;  %v1348_v34 = vld [vmem:[#allocation8 + $0x3c0] sm:$0xff]  ;;  %v1281_v35 = vld [vmem:[#allocation8 + $0x1a8] sm:$0xff] }
 0x16c   :  { %1379 = vmatpush1.msra.mxu0 %v1248_v36  ;;  %1449 = vmatprep.subr.mxu1 %v1313_v39  ;;  %v1347_v36 = vld [vmem:[#allocation8 + $0x3b8] sm:$0xff]  ;;  %v1280_v37 = vld [vmem:[#allocation8 + $0x1a0] sm:$0xff]  ;;  %v1943_v39 = vshrl.u32 %v636_v30, 7 }
 0x16d   :  { %1380 = vmatprep.subr.mxu0 %v1247_v38  ;;  %1450 = vmatpush1.msra.mxu1 %v1312_v41  ;;  %v1346_v38 = vld [vmem:[#allocation8 + $0x3b0] sm:$0xff]  ;;  %v1345_v41 = vld [vmem:[#allocation8 + $0x3a8] sm:$0xff]  ;;  %v1332_v30 = vld [vmem:[#allocation8 + $0x340] sm:$0xff] }
 0x16e   :  { %1381 = vmatpush1.msra.mxu0 %v1246_v40  ;;  %1451 = vmatprep.subr.mxu1 %v1311_v43  ;;  %v1279_v40 = vld [vmem:[#allocation8 + $0x198] sm:$0xff]  ;;  %v1344_v43 = vld [vmem:[#allocation8 + $0x3a0] sm:$0xff] }
 0x16f   :  { %1382 = vmatprep.subr.mxu0 %v1245_v42  ;;  %1452 = vmatpush1.msra.mxu1 %v1310_v45  ;;  %v1278_v42 = vld [vmem:[#allocation8 + $0x190] sm:$0xff]  ;;  %v1343_v45 = vld [vmem:[#allocation8 + $0x398] sm:$0xff] }
 0x170   :  { %1383 = vmatpush1.msra.mxu0 %v1244_v44  ;;  %1453 = vmatprep.subr.mxu1 %v1309_v47  ;;  %v1277_v44 = vld [vmem:[#allocation8 + $0x188] sm:$0xff]  ;;  %v1342_v47 = vld [vmem:[#allocation8 + $0x390] sm:$0xff] }
 0x171   :  { %1384 = vmatprep.subr.mxu0 %v1243_v46  ;;  %1454 = vmatpush1.msra.mxu1 %v1308_v49  ;;  %v1276_v46 = vld [vmem:[#allocation8 + $0x180] sm:$0xff]  ;;  %v1275_v49 = vld [vmem:[#allocation8 + $0x178] sm:$0xff] }
 0x172   :  { %1385 = vmatpush1.msra.mxu0 %v1242_v48  ;;  %1455 = vmatprep.subr.mxu1 %v1307_v51  ;;  %v638_v48 = vsub.s32 0, %v1943_v39  ;;  %v1946_v51 = vld [vmem:[#allocation7] sm:$0xf] }
 0x173   :  { %1386 = vmatprep.subr.mxu0 %v1241_v50  ;;  %1456 = vmatpush1.msra.mxu1 %v1306_v53  ;;  %v1341_v50 = vld [vmem:[#allocation8 + $0x388] sm:$0xff]  ;;  %v1340_v53 = vld [vmem:[#allocation8 + $0x380] sm:$0xff] }
 0x174   :  { %1387 = vmatpush1.msra.mxu0 %v1240_v52  ;;  %1457 = vmatprep.subr.mxu1 %v1305_v55  ;;  %v1274_v52 = vld [vmem:[#allocation8 + $0x170] sm:$0xff]  ;;  %v1273_v55 = vld [vmem:[#allocation8 + $0x168] sm:$0xff] }
 0x175   :  { %1388 = vmatprep.subr.mxu0 %v1239_v54  ;;  %1458 = vmatpush1.msra.mxu1 %v1304_v57  ;;  %v642_v54 = vsub.s32 1, %v1943_v39  ;;  %v722_v57 = vpop.f32.mrf.mxu0 }
 0x176   :  { %1389 = vmatpush1.msra.mxu0 %v1238_v56  ;;  %1459 = vmatprep.subr.mxu1 %v1303_v59  ;;  %v1339_v56 = vld [vmem:[#allocation8 + $0x378] sm:$0xff]  ;;  %v1338_v59 = vld [vmem:[#allocation8 + $0x370] sm:$0xff] }
 0x177   :  { %1390 = vmatprep.subr.mxu0 %v1237_v58  ;;  %1460 = vmatpush1.msra.mxu1 %v1302_v61  ;;  %v1272_v58 = vld [vmem:[#allocation8 + $0x160] sm:$0xff]  ;;  %v1271_v61 = vld [vmem:[#allocation8 + $0x158] sm:$0xff] }
 0x178   :  { %1391 = vmatpush1.msra.mxu0 %v1236_v60  ;;  %1461 = vmatprep.subr.mxu1 %v1301_v63  ;;  %v639_v60 = vrot.slane %v1946_v51, %v638_v48  ;;  %v1270_v63 = vld [vmem:[#allocation8 + $0x150] sm:$0xff] }
 0x179   :  { %1392 = vmatprep.subr.mxu0 %v1235_v62  ;;  %1462 = vmatpush1.msra.mxu1 %v1300_v1  ;;  %v1337_v62 = vld [vmem:[#allocation8 + $0x368] sm:$0xff]  ;;  %v643_v1 = vrot.slane %v1946_v51, %v642_v54 }
 0x17a   :  { %1393 = vmatpush1.msra.mxu0 %v1234_v0  ;;  %1463 = vmatprep.subr.mxu1 %v1299_v3  ;;  %v1336_v0 = vld [vmem:[#allocation8 + $0x360] sm:$0xff]  ;;  %v1335_v3 = vld [vmem:[#allocation8 + $0x358] sm:$0xff] }
 0x17b   :  { %1394 = vmatprep.subr.mxu0 %v1233_v2  ;;  %1464 = vmatpush1.msra.mxu1 %v1298_v5  ;;  %v1269_v2 = vld [vmem:[#allocation8 + $0x148] sm:$0xff]  ;;  %v724_v5 = vpop.f32.mrf.mxu0 }
 0x17c   :  { %1395 = vmatpush1.msra.mxu0 %v1232_v4  ;;  %1465 = vmatprep.subr.mxu1 %v1297_v7  ;;  %v793_v4 = vpop.f32.mrf.mxu1  ;;  %v1334_v7 = vld [vmem:[#allocation8 + $0x350] sm:$0xff] }
 0x17d   :  { %1396 = vmatprep.subr.mxu0 %v1231_v6  ;;  %1466 = vmatpush1.msra.mxu1 %v1296_v9  ;;  %v1268_v6 = vld [vmem:[#allocation8 + $0x140] sm:$0xff]  ;;  %v1267_v9 = vld [vmem:[#allocation8 + $0x138] sm:$0xff] }
 0x17e   :  { %1397 = vmatpush1.msra.mxu0 %v1230_v8  ;;  %1467 = vmatprep.subr.mxu1 %v1295_v11  ;;  %v723_v8 = vadd.f32 %v722_v57, %v639_v60  ;;  %v725_v11 = vadd.f32 %v724_v5, %v643_v1  ;;  %v1537_v57 = vld [vmem:[#allocation11 + $0xc8] sm:$0xff]  ;;  %v1520_v60 = vld [vmem:[#allocation11 + $0x40] sm:$0xff]  ;;  %v646_v5 = vsub.s32 2, %v1943_v39 }
 0x17f   :  { %1398 = vmatprep.subr.mxu0 %v1229_v10  ;;  %1468 = vmatpush1.msra.mxu1 %v1294_v13  ;;  %v1266_v10 = vld [vmem:[#allocation8 + $0x130] sm:$0xff]  ;;  %v795_v13 = vpop.f32.mrf.mxu1 }
 0x180   :  { %1399 = vmatpush1.msra.mxu0 %v1228_v12  ;;  %1469 = vmatprep.subr.mxu1 %v1293_v15  ;;  %v1265_v12 = vld [vmem:[#allocation8 + $0x128] sm:$0xff]  ;;  %v794_v15 = vadd.f32 %v793_v4, %v723_v8  ;;  %v647_v8 = vrot.slane %v1946_v51, %v646_v5 }
 0x181   :  { %1400 = vmatprep.subr.mxu0 %v1291_v14  ;;  %1470 = vmatpush1.msra.mxu1 %v1292_v17  ;;  %v1264_v14 = vld [vmem:[#allocation8 + $0x120] sm:$0xff]  ;;  %v1533_v1 = vld [vmem:[#allocation11 + $0xa8] sm:$0xff] }
 0x182   :  { %1401 = vmatpush2.msra.mxu0 %v1290_v16  ;;  %1471 = vmatprep.subr.mxu1 %v1355_v19  ;;  %v1263_v16 = vld [vmem:[#allocation8 + $0x118] sm:$0xff]  ;;  %v796_v19 = vadd.f32 %v795_v13, %v725_v11  ;;  %v1516_v4 = vld [vmem:[#allocation11 + $0x20] sm:$0xff] }
 0x183   :  { %1402 = vmatprep.subr.mxu0 %v1289_v18  ;;  %1472 = vmatpush2.msra.mxu1 %v1354_v21  ;;  %v1262_v18 = vld [vmem:[#allocation8 + $0x110] sm:$0xff]  ;;  %v1261_v21 = vld [vmem:[#allocation8 + $0x108] sm:$0xff] }
 0x184   :  { %1403 = vmatpush2.msra.mxu0 %v1288_v20  ;;  %1473 = vmatprep.subr.mxu1 %v1353_v23 }
 0x185   :  { %1404 = vmatprep.subr.mxu0 %v1287_v22  ;;  %1474 = vmatpush2.msra.mxu1 %v1352_v25 }
 0x186   :  { %1405 = vmatpush2.msra.mxu0 %v1286_v24  ;;  %1475 = vmatprep.subr.mxu1 %v1351_v27  ;;  %v1260_v24 = vld [vmem:[#allocation8 + $0x100] sm:$0xff] }
 0x187   :  { %1406 = vmatprep.subr.mxu0 %v1285_v26  ;;  %1476 = vmatpush2.msra.mxu1 %v1350_v29 }
 0x188   :  { %1407 = vmatpush2.msra.mxu0 %v1284_v28  ;;  %1477 = vmatprep.subr.mxu1 %v1349_v32  ;;  %v1333_v28 = vld [vmem:[#allocation8 + $0x348] sm:$0xff] }
 0x189   :  { %1408 = vmatprep.subr.mxu0 %v1283_v31  ;;  %1478 = vmatpush2.msra.mxu1 %v1348_v34  ;;  %v1331_v31 = vld [vmem:[#allocation8 + $0x338] sm:$0xff] }
 0x18a   :  { %1409 = vmatpush2.msra.mxu0 %v1282_v33  ;;  %1479 = vmatprep.subr.mxu1 %v1347_v36  ;;  %v1330_v33 = vld [vmem:[#allocation8 + $0x330] sm:$0xff]  ;;  %v1328_v36 = vld [vmem:[#allocation8 + $0x320] sm:$0xff] }
 0x18b   :  { %1410 = vmatprep.subr.mxu0 %v1281_v35  ;;  %1480 = vmatpush2.msra.mxu1 %v1346_v38  ;;  %v1329_v35 = vld [vmem:[#allocation8 + $0x328] sm:$0xff]  ;;  %v1326_v38 = vld [vmem:[#allocation8 + $0x310] sm:$0xff] }
 0x18c   :  { %1411 = vmatpush2.msra.mxu0 %v1280_v37  ;;  %1481 = vmatprep.subr.mxu1 %v1345_v41  ;;  %v1327_v37 = vld [vmem:[#allocation8 + $0x318] sm:$0xff]  ;;  %v1324_v41 = vld [vmem:[#allocation8 + $0x300] sm:$0xff] }
 0x18d   :  { %1412 = vmatprep.subr.mxu0 %v1279_v40  ;;  %1482 = vmatpush2.msra.mxu1 %v1344_v43  ;;  %v1325_v40 = vld [vmem:[#allocation8 + $0x308] sm:$0xff]  ;;  %v1527_v43 = vld [vmem:[#allocation11 + $0x78] sm:$0xff] }
 0x18e   :  { %1413 = vmatpush2.msra.mxu0 %v1278_v42  ;;  %1483 = vmatprep.subr.mxu1 %v1343_v45  ;;  %v1543_v42 = vld [vmem:[#allocation11 + $0xf8] sm:$0xff]  ;;  %v1526_v45 = vld [vmem:[#allocation11 + $0x70] sm:$0xff] }
 0x18f   :  { %1414 = vmatprep.subr.mxu0 %v1277_v44  ;;  %1484 = vmatpush2.msra.mxu1 %v1342_v47  ;;  %v1542_v44 = vld [vmem:[#allocation11 + $0xf0] sm:$0xff]  ;;  %v1525_v47 = vld [vmem:[#allocation11 + $0x68] sm:$0xff] }
 0x190   :  { %1415 = vmatpush2.msra.mxu0 %v1276_v46  ;;  %1485 = vmatprep.subr.mxu1 %v1341_v50  ;;  %v1541_v46 = vld [vmem:[#allocation11 + $0xe8] sm:$0xff]  ;;  %v1524_v50 = vld [vmem:[#allocation11 + $0x60] sm:$0xff] }
 0x191   :  { %1416 = vmatprep.subr.mxu0 %v1275_v49  ;;  %1486 = vmatpush2.msra.mxu1 %v1340_v53  ;;  %v1540_v49 = vld [vmem:[#allocation11 + $0xe0] sm:$0xff]  ;;  %v1523_v53 = vld [vmem:[#allocation11 + $0x58] sm:$0xff] }
 0x192   :  { %1417 = vmatpush2.msra.mxu0 %v1274_v52  ;;  %1487 = vmatprep.subr.mxu1 %v1339_v56  ;;  %v1539_v52 = vld [vmem:[#allocation11 + $0xd8] sm:$0xff]  ;;  %v1522_v56 = vld [vmem:[#allocation11 + $0x50] sm:$0xff] }
 0x193   :  { %1418 = vmatprep.subr.mxu0 %v1273_v55  ;;  %1488 = vmatpush2.msra.mxu1 %v1338_v59  ;;  %v1538_v55 = vld [vmem:[#allocation11 + $0xd0] sm:$0xff]  ;;  %v1536_v59 = vld [vmem:[#allocation11 + $0xc0] sm:$0xff] }
 0x194   :  { %1419 = vmatpush2.msra.mxu0 %v1272_v58  ;;  %1489 = vmatprep.subr.mxu1 %v1337_v62  ;;  %v1521_v58 = vld [vmem:[#allocation11 + $0x48] sm:$0xff]  ;;  %v1519_v62 = vld [vmem:[#allocation11 + $0x38] sm:$0xff] }
 0x195   :  { %1420 = vmatprep.subr.mxu0 %v1271_v61  ;;  %1490 = vmatpush2.msra.mxu1 %v1336_v0  ;;  %v1535_v61 = vld [vmem:[#allocation11 + $0xb8] sm:$0xff]  ;;  %v1518_v0 = vld [vmem:[#allocation11 + $0x30] sm:$0xff] }
 0x196   :  { %1421 = vmatpush2.msra.mxu0 %v1270_v63  ;;  %1491 = vmatprep.subr.mxu1 %v1335_v3  ;;  %v1534_v63 = vld [vmem:[#allocation11 + $0xb0] sm:$0xff]  ;;  %v1532_v3 = vld [vmem:[#allocation11 + $0xa0] sm:$0xff] }
 0x197   :  { %1422 = vmatprep.subr.mxu0 %v1269_v2  ;;  %1492 = vmatpush2.msra.mxu1 %v1334_v7  ;;  %v1517_v2 = vld [vmem:[#allocation11 + $0x28] sm:$0xff] }
 0x198   :  { %1423 = vmatpush2.msra.mxu0 %v1268_v6  ;;  %1493 = vmatprep.subr.mxu1 %v1333_v28  ;;  %v650_v6 = vsub.s32 3, %v1943_v39  ;;  %v1530_v28 = vld [vmem:[#allocation11 + $0x90] sm:$0xff] }
 0x199   :  { %1424 = vmatprep.subr.mxu0 %v1267_v9  ;;  %1494 = vmatpush2.msra.mxu1 %v1332_v30  ;;  %v1529_v30 = vld [vmem:[#allocation11 + $0x88] sm:$0xff] }
 0x19a   :  { %1425 = vmatpush2.msra.mxu0 %v1266_v10  ;;  %1495 = vmatprep.subr.mxu1 %v1331_v31  ;;  %v651_v9 = vrot.slane %v1946_v51, %v650_v6  ;;  %v1531_v51 = vld [vmem:[#allocation11 + $0x98] sm:$0xff]  ;;  %v1513_v31 = vld [vmem:[#allocation11 + $0x8] sm:$0xff] }
 0x19b   :  { %1426 = vmatprep.subr.mxu0 %v1265_v12  ;;  %1496 = vmatpush2.msra.mxu1 %v1330_v33  ;;  %v1512_v33 = vld [vmem:[#allocation11] sm:$0xff] }
 0x19c   :  { %v864_v17 = vpop.f32.mrf.mxu0  ;;  %1427 = vmatpush2.msra.mxu0 %v1264_v14  ;;  %1497 = vmatprep.subr.mxu1 %v1329_v35 }
 0x19d   :  { %v865_v20 = vadd.f32 %v864_v17, %v794_v15  ;;  %1428 = vmatprep.subr.mxu0 %v1263_v16  ;;  %1498 = vmatpush2.msra.mxu1 %v1328_v36 }
 0x19e   :  { %v935_v22 = vpop.f32.mrf.mxu1  ;;  %v866_v23 = vpop.f32.mrf.mxu0  ;;  %1429 = vmatpush2.msra.mxu0 %v1262_v18  ;;  %1499 = vmatprep.subr.mxu1 %v1327_v37 }
 0x19f   :  { %v867_v25 = vadd.f32 %v866_v23, %v796_v19  ;;  %v936_v26 = vadd.f32 %v935_v22, %v865_v20  ;;  %1430 = vmatprep.subr.mxu0 %v1261_v21  ;;  %1500 = vmatpush2.msra.mxu1 %v1326_v38 }
 0x1a0   :  { %v937_v27 = vpop.f32.mrf.mxu1  ;;  %1431 = vmatpush2.msra.mxu0 %v1260_v24  ;;  %1501 = vmatprep.subr.mxu1 %v1325_v40 }
 0x1a1   :  { %v938_v29 = vadd.f32 %v937_v27, %v867_v25  ;;  %v1224_v34 = vmax.f32 %v936_v26, 0.0  ;;  %1502 = vmatpush2.msra.mxu1 %v1324_v41  ;;  %1641 = vmatprep.subr.mxu0 %v1543_v42  ;;  %v1515_v27 = vld [vmem:[#allocation11 + $0x18] sm:$0xff] }
 0x1a3   :  { %v1225_v32 = vmax.f32 %v938_v29, 0.0  ;;  %v1514_v29 = vld [vmem:[#allocation11 + $0x10] sm:$0xff] }
 0x1a5   :  { %1432 = vmatprep.mubr.f32.mxu0 %v1225_v32  ;;  %v1528_v32 = vld [vmem:[#allocation11 + $0x80] sm:$0xff] }
 0x1a6   :  { %1433 = vmatmul.mubr.f32.vlgmr.msra.gmra.mxu0 %v1224_v34  ;;  %v1356_v34 = vld [vmem:[#allocation10] sm:$0x3] }
 0x1a7   :  { %1642 = vmatpush3.msra.mxu0 %v1527_v43  ;;  %v1361_v36 = vrot.slane %v1356_v34, %v638_v48  ;;  %v1365_v37 = vrot.slane %v1356_v34, %v642_v54 }
 0x1a8   :  { %1643 = vmatprep.subr.mxu0 %v1542_v44 }
 0x1a9   :  { %1644 = vmatpush3.msra.mxu0 %v1526_v45 }
 0x1aa   :  { %1645 = vmatprep.subr.mxu0 %v1541_v46 }
 0x1ab   :  { %1646 = vmatpush3.msra.mxu0 %v1525_v47 }
 0x1ac   :  { %1647 = vmatprep.subr.mxu0 %v1540_v49 }
 0x1ad   :  { %1648 = vmatpush3.msra.mxu0 %v1524_v50  ;;  %v1640_v50 = vld [vmem:[#allocation13] ss:$0 sm:$0xff] }
 0x1ae   :  { %1649 = vmatprep.subr.mxu0 %v1539_v52 }
 0x1af   :  { %1650 = vmatpush3.msra.mxu0 %v1523_v53 }
 0x1b0   :  { %1651 = vmatprep.subr.mxu0 %v1538_v55 }
 0x1b1   :  { %1652 = vmatpush3.msra.mxu0 %v1522_v56 }
 0x1b2   :  { %1653 = vmatprep.subr.mxu0 %v1537_v57 }
 0x1b3   :  { %1654 = vmatpush3.msra.mxu0 %v1521_v58 }
 0x1b4   :  { %1655 = vmatprep.subr.mxu0 %v1536_v59 }
 0x1b5   :  { %1656 = vmatpush3.msra.mxu0 %v1520_v60 }
 0x1b6   :  { %1657 = vmatprep.subr.mxu0 %v1535_v61 }
 0x1b7   :  { %1658 = vmatpush3.msra.mxu0 %v1519_v62 }
 0x1b8   :  { %1659 = vmatprep.subr.mxu0 %v1534_v63 }
 0x1b9   :  { %1660 = vmatpush3.msra.mxu0 %v1518_v0 }
 0x1ba   :  { %1661 = vmatprep.subr.mxu0 %v1533_v1 }
 0x1bb   :  { %1662 = vmatpush3.msra.mxu0 %v1517_v2 }
 0x1bc   :  { %1663 = vmatprep.subr.mxu0 %v1532_v3 }
 0x1bd   :  { %1664 = vmatpush3.msra.mxu0 %v1516_v4 }
 0x1be   :  { %1665 = vmatprep.subr.mxu0 %v1531_v51 }
 0x1bf   :  { %1666 = vmatpush3.msra.mxu0 %v1515_v27 }
 0x1c0   :  { %1667 = vmatprep.subr.mxu0 %v1530_v28 }
 0x1c1   :  { %1668 = vmatpush3.msra.mxu0 %v1514_v29 }
 0x1c2   :  { %1669 = vmatprep.subr.mxu0 %v1529_v30 }
 0x1c3   :  { %1670 = vmatpush3.msra.mxu0 %v1513_v31 }
 0x1c4   :  { %1671 = vmatprep.subr.mxu0 %v1528_v32 }
 0x1c5   :  { %1672 = vmatpush3.msra.mxu0 %v1512_v33 }
 0x1de   :  { %v1006_v7 = vpop.f32.mrf.mxu0 }
 0x1df   :  { %v1007_v12 = vadd.f32 %v1006_v7, %v647_v8 }
 0x1e0   :  { %v1077_v10 = vpop.f32.mrf.mxu1  ;;  %v1008_v11 = vpop.f32.mrf.mxu0 }
 0x1e1   :  { %v1009_v13 = vadd.f32 %v1008_v11, %v651_v9  ;;  %v1078_v15 = vadd.f32 %v1077_v10, %v1007_v12 }
 0x1e2   :  { %v1079_v14 = vpop.f32.mrf.mxu1 }
 0x1e3   :  { %v1080_v18 = vadd.f32 %v1079_v14, %v1009_v13 }
 0x220   :  { %v1148_v16 = vpop.f32.mrf.mxu0 }
 0x221   :  { %v1219_v17 = vpop.f32.mrf.mxu1  ;;  %v1149_v19 = vadd.f32 %v1148_v16, %v1078_v15 }
 0x222   :  { %v1150_v20 = vpop.f32.mrf.mxu0 }
 0x223   :  { %v1151_v21 = vadd.f32 %v1150_v20, %v1080_v18  ;;  %v1220_v22 = vadd.f32 %v1219_v17, %v1149_v19  ;;  %v1221_v23 = vpop.f32.mrf.mxu1 }
 0x225   :  { %v1222_v24 = vadd.f32 %v1221_v23, %v1151_v21  ;;  %v1226_v26 = vmax.f32 %v1220_v22, 0.0 }
 0x227   :  { %v1227_v25 = vmax.f32 %v1222_v24, 0.0 }
 0x229   :  { %1503 = vmatprep.mubr.f32.mxu1 %v1227_v25 }
 0x22a   :  { %1504 = vmatmul.mubr.f32.vlgmr.msra.gmra.mxu1 %v1226_v26 }
 0x266   :  { %v1434_v35 = vpop.f32.mrf.mxu0 }
 0x267   :  { %v1435_v40 = vadd.f32 %v1434_v35, %v1361_v36 }
 0x268   :  { %v1436_v38 = vpop.f32.mrf.mxu0 }
 0x269   :  { %v1437_v42 = vadd.f32 %v1436_v38, %v1365_v37 }
 0x2ea   :  { %v1505_v41 = vpop.f32.mrf.mxu1 }
 0x2eb   :  { %v1506_v43 = vadd.f32 %v1505_v41, %v1435_v40 }
 0x2ec   :  { %v1507_v44 = vpop.f32.mrf.mxu1 }
 0x2ed   :  { %v1508_v45 = vadd.f32 %v1507_v44, %v1437_v42  ;;  %v1510_v47 = vmax.f32 %v1506_v43, 0.0 }
 0x2ef   :  { %v1511_v46 = vmax.f32 %v1508_v45, 0.0 }
 0x2f1   :  { %1615 = vmatprep.mubr.f32.mxu0 %v1511_v46 }
 0x2f2   :  { %1616 = vmatmul.mubr.f32.vlgmr.msra.gmra.mxu0 %v1510_v47 }
 0x3b2   :  { %v1673_v49 = vpop.f32.mrf.mxu0 }
 0x3b4   :  { %v1674_v52 = vpop.f32.mrf.mxu0 }
 0x3b5   :  { %v1675_v48 = vadd.f32 %v1674_v52, %v1673_v49 }
 0x3b7   :  { %v1618_v53 = vadd.f32 %v1675_v48, %v1640_v50 }
 0x3b9   :  { %1621 = vst [vmem:[#allocation14] sm:$0xff] %v1618_v53 }
 0x3ba   :  { %1849 = shalt.err (!%p1846_p11)
}
 0x3bb   :  { %1631 = dma.vmem_to_hbm [thread:$0]  %s1629_s6, 128, %s1973_s7, [#allocation4]  }
 0x3bc   :  { %1866 = dma.done.wait [#allocation4], 128  }
 0x3bd   :  { %1867 = vsyncadd [#allocation4], 4294967168 }
 0x3be   :  { %1635 = vsyncpa [#allocation3], 1 }
 0x3bf   :  { %1636 = vsyncpa [#allocation6], 1 }
 0x3c0   :  { %1637 = vsyncpa [#allocation9], 1 }
 0x3c1   :  { %1638 = vsyncpa [#allocation12], 1 }
 0x3c2   :  { %1639 = vsyncpa [#allocation4], 1 }

// kernel: tpu_custom_call.1
= control target key start
LH: loop header
LB: loop body
LE: loop exit
PB: predicated region body
PF: predicated region fallthrough
CT: control target
= control target key end

     0   :  { %12 = vsyncpa [#allocation3], 0  ;;  %s1966_s0 = inlined_call_operand.hbm [shape: f32[8,1024], index: 0, kind: input, shape index: {}]   ;;  %s1967_s1 = inlined_call_operand.hbm [shape: f32[1024,512], index: 1, kind: input, shape index: {}]   ;;  %s1968_s2 = inlined_call_operand.hbm [shape: f32[1,512], index: 2, kind: input, shape index: {}]   ;;  %s1969_s3 = inlined_call_operand.hbm [shape: f32[512,256], index: 3, kind: input, shape index: {}]   ;;  %s1970_s4 = inlined_call_operand.hbm [shape: f32[1,256], index: 4, kind: input, shape index: {}]   ;;  %s1971_s5 = inlined_call_operand.hbm [shape: f32[256,128], index: 5, kind: input, shape index: {}]   ;;  %s1972_s6 = inlined_call_operand.hbm [shape: f32[1,128], index: 6, kind: input, shape index: {}]   ;;  %s1973_s7 = inlined_call_operand.hbm [shape: f32[8,128], index: 7, kind: output, shape index: {}]  }
   0x1   :  { %13 = vsyncpa [#allocation6], 0 }
   0x2   :  { %14 = vsyncpa [#allocation9], 0 }
   0x3   :  { %15 = vsyncpa [#allocation12], 0 }
   0x4   :  { %16 = vsyncpa [#allocation4], 0  ;;  %s1868_s24 = smov [#allocation5]  }
   0x5   :  { %s32_s25 = sshll.u32 %s1868_s24, 4  ;;  %s33_s25 = int_to_ptr.vmem [resolvable:$true] %s32_s25 }
   0x6   :  { %s1706_s26 = scalar_lea.vmem %s33_s25, 65536  ;;  %p1711_p1 = scmp.lt.s32.totalorder %s33_s25, %s33_s25 }
   0x7   :  { %p1707_p0 = scmp.ne.s32.totalorder %s33_s25, %s1706_s26  ;;  %p1712_p2 = scmp.lt.s32.totalorder %s1706_s26, %s1706_s26 }
   0x9   :  { %p1713_p3 = por %p1712_p2, %p1711_p1 }
   0xb   :  { %p1714_p4 = pnand %p1713_p3, %p1707_p0 }
   0xd   :  { %1717 = shalt.err (!%p1714_p4)
}
   0xe   :  { %s1869_s27 = smov 512   ;;  %s1870_s28 = smov 32  }
   0xf   :  { %38 = dma.hbm_to_vmem [thread:$0]  %s1967_s1, 65536, %s33_s25, [#allocation6], %s1869_s27, %s1869_s27, %s1870_s28  }
  0x10   :  { %s1871_s8 = smov [#allocation8]  }
  0x11   :  { %s54_s9 = sshll.u32 %s1871_s8, 4  ;;  %s55_s9 = int_to_ptr.vmem [resolvable:$true] %s54_s9 }
  0x12   :  { %s1726_s10 = scalar_lea.vmem %s55_s9, 16384  ;;  %p1731_p6 = scmp.lt.s32.totalorder %s55_s9, %s55_s9 }
  0x13   :  { %p1727_p5 = scmp.ne.s32.totalorder %s55_s9, %s1726_s10  ;;  %p1732_p7 = scmp.lt.s32.totalorder %s1726_s10, %s1726_s10 }
  0x15   :  { %p1733_p8 = por %p1732_p7, %p1731_p6 }
  0x17   :  { %p1734_p9 = pnand %p1733_p8, %p1727_p5 }
  0x19   :  { %1737 = shalt.err (!%p1734_p9)
}
  0x1a   :  { %s1872_s11 = smov 256   ;;  %s1873_s12 = smov 16  }
  0x1b   :  { %60 = dma.hbm_to_vmem [thread:$0]  %s1969_s3, 16384, %s55_s9, [#allocation9], %s1872_s11, %s1872_s11, %s1873_s12  }
  0x1c   :  { %s1874_s15 = smov [#allocation11]  }
  0x1d   :  { %s76_s16 = sshll.u32 %s1874_s15, 4  ;;  %s77_s16 = int_to_ptr.vmem [resolvable:$true] %s76_s16 }
  0x1e   :  { %s1746_s1 = scalar_lea.vmem %s77_s16, 4096  ;;  %p1751_p11 = scmp.lt.s32.totalorder %s77_s16, %s77_s16 }
  0x1f   :  { %p1747_p10 = scmp.ne.s32.totalorder %s77_s16, %s1746_s1  ;;  %p1752_p12 = scmp.lt.s32.totalorder %s1746_s1, %s1746_s1 }
  0x21   :  { %p1753_p13 = por %p1752_p12, %p1751_p11 }
  0x23   :  { %p1754_p0 = pnand %p1753_p13, %p1747_p10 }
  0x25   :  { %1757 = shalt.err (!%p1754_p0)
}
  0x26   :  { %s1875_s17 = smov 128   ;;  %s1876_s18 = smov 8  }
  0x27   :  { %82 = dma.hbm_to_vmem [thread:$0]  %s1971_s5, 4096, %s77_s16, [#allocation12], %s1875_s17, %s1875_s17, %s1876_s18  }
  0x28   :  { %s1877_s21 = smov [#allocation2]   ;;  %s1878_s3 = smov [#allocation7]  }
  0x29   :  { %s23_s22 = sshll.u32 %s1877_s21, 4  ;;  %s45_s23 = sshll.u32 %s1878_s3, 4  ;;  %s24_s22 = int_to_ptr.vmem [resolvable:$true] %s23_s22  ;;  %s46_s23 = int_to_ptr.vmem [resolvable:$true] %s45_s23 }
  0x2a   :  { %s1766_s24 = scalar_lea.vmem %s24_s22, 1024  ;;  %p1771_p2 = scmp.lt.s32.totalorder %s24_s22, %s24_s22 }
  0x2b   :  { %p1767_p1 = scmp.ne.s32.totalorder %s24_s22, %s1766_s24  ;;  %p1772_p3 = scmp.lt.s32.totalorder %s1766_s24, %s1766_s24 }
  0x2d   :  { %p1773_p4 = por %p1772_p3, %p1771_p2 }
  0x2f   :  { %p1774_p5 = pnand %p1773_p4, %p1767_p1 }
  0x31   :  { %1777 = shalt.err (!%p1774_p5)
}
  0x32   :  { %26 = dma.hbm_to_vmem [thread:$0]  %s1966_s0, 1024, %s24_s22, [#allocation3]  }
  0x33   :  { %s1786_s27 = scalar_lea.vmem %s46_s23, 64  ;;  %p1791_p7 = scmp.lt.s32.totalorder %s46_s23, %s46_s23 }
  0x34   :  { %p1787_p6 = scmp.ne.s32.totalorder %s46_s23, %s1786_s27  ;;  %p1792_p8 = scmp.lt.s32.totalorder %s1786_s27, %s1786_s27 }
  0x36   :  { %p1793_p9 = por %p1792_p8, %p1791_p7 }
  0x38   :  { %p1794_p10 = pnand %p1793_p9, %p1787_p6 }
  0x3a   :  { %1797 = shalt.err (!%p1794_p10)
}
  0x3b   :  { %48 = dma.hbm_to_vmem [thread:$0]  %s1968_s2, 64, %s46_s23, [#allocation6]  }
  0x3c   :  { %s1879_s29 = smov [#allocation10]   ;;  %s1880_s8 = smov [#allocation13]  }
  0x3d   :  { %s67_s30 = sshll.u32 %s1879_s29, 4  ;;  %s89_s9 = sshll.u32 %s1880_s8, 4  ;;  %s68_s30 = int_to_ptr.vmem [resolvable:$true] %s67_s30  ;;  %s90_s9 = int_to_ptr.vmem [resolvable:$true] %s89_s9 }
  0x3e   :  { %s1806_s10 = scalar_lea.vmem %s68_s30, 32  ;;  %p1811_p12 = scmp.lt.s32.totalorder %s68_s30, %s68_s30 }
  0x3f   :  { %p1807_p11 = scmp.ne.s32.totalorder %s68_s30, %s1806_s10  ;;  %p1812_p13 = scmp.lt.s32.totalorder %s1806_s10, %s1806_s10 }
  0x41   :  { %p1813_p0 = por %p1812_p13, %p1811_p12 }
  0x43   :  { %p1814_p1 = pnand %p1813_p0, %p1807_p11 }
  0x45   :  { %1817 = shalt.err (!%p1814_p1)
}
  0x46   :  { %70 = dma.hbm_to_vmem [thread:$0]  %s1970_s4, 32, %s68_s30, [#allocation9]  }
  0x47   :  { %s1826_s12 = scalar_lea.vmem %s90_s9, 16  ;;  %s1830_s2 = scalar_lea.vmem %s90_s9, 32 }
  0x48   :  { %p1827_p2 = scmp.ne.s32.totalorder %s90_s9, %s1826_s12  ;;  %p1831_p3 = scmp.lt.s32.totalorder %s90_s9, %s90_s9 }
  0x49   :  { %p1832_p4 = scmp.lt.s32.totalorder %s1830_s2, %s1826_s12 }
  0x4b   :  { %p1833_p5 = por %p1832_p4, %p1831_p3 }
  0x4d   :  { %p1834_p6 = pnand %p1833_p5, %p1827_p2 }
  0x4f   :  { %1837 = shalt.err (!%p1834_p6)
}
  0x50   :  { %92 = dma.hbm_to_vmem [thread:$0]  %s1972_s6, 16, %s90_s9, [#allocation12]  }
  0x51   :  { %1858 = dma.done.wait [#allocation3], 1024  }
  0x52   :  { %1859 = vsyncadd [#allocation3], 4294966272 }
  0x53   :  { %1860 = dma.done.wait [#allocation6], 65600  }
  0x54   :  { %1861 = vsyncadd [#allocation6], 4294901696 }
  0x55   :  { %1862 = dma.done.wait [#allocation9], 16416  }
  0x56   :  { %1863 = vsyncadd [#allocation9], 4294950880 }
  0x57   :  { %1864 = dma.done.wait [#allocation12], 4112  }
  0x58   :  { %1865 = vsyncadd [#allocation12], 4294963184  ;;  %v183_v0 = vld [vmem:[#allocation5 + $0x1e8] sm:$0xff]  ;;  %v182_v2 = vld [vmem:[#allocation5 + $0x1e0] sm:$0xff]  ;;  %s1881_s4 = smov [#allocation14]  }
  0x59   :  { %v311_v1 = vld [vmem:[#allocation5 + $0x5e8] sm:$0xff]  ;;  %656 = vmatprep.subr.mxu0 %v183_v0  ;;  %v310_v3 = vld [vmem:[#allocation5 + $0x5e0] sm:$0xff]  ;;  %s1628_s6 = sshll.u32 %s1881_s4, 4  ;;  %s1629_s6 = int_to_ptr.vmem [resolvable:$true] %s1628_s6 }
  0x5a   :  { %727 = vmatprep.subr.mxu1 %v311_v1  ;;  %v179_v4 = vld [vmem:[#allocation5 + $0x1c8] sm:$0xff]  ;;  %657 = vmatpush1.msra.mxu0 %v182_v2  ;;  %v178_v6 = vld [vmem:[#allocation5 + $0x1c0] sm:$0xff]  ;;  %s1838_s15 = scalar_lea.vmem %s1629_s6, 128  ;;  %p1843_p8 = scmp.lt.s32.totalorder %s1629_s6, %s1629_s6 }
  0x5b   :  { %v307_v5 = vld [vmem:[#allocation5 + $0x5c8] sm:$0xff]  ;;  %728 = vmatpush1.msra.mxu1 %v310_v3  ;;  %v306_v7 = vld [vmem:[#allocation5 + $0x5c0] sm:$0xff]  ;;  %658 = vmatprep.subr.mxu0 %v179_v4  ;;  %p1839_p7 = scmp.ne.s32.totalorder %s1629_s6, %s1838_s15  ;;  %p1844_p9 = scmp.lt.s32.totalorder %s1838_s15, %s1838_s15 }
  0x5c   :  { %v175_v8 = vld [vmem:[#allocation5 + $0x1a8] sm:$0xff]  ;;  %729 = vmatprep.subr.mxu1 %v307_v5  ;;  %v174_v10 = vld [vmem:[#allocation5 + $0x1a0] sm:$0xff]  ;;  %659 = vmatpush1.msra.mxu0 %v178_v6 }
  0x5d   :  { %v303_v9 = vld [vmem:[#allocation5 + $0x5a8] sm:$0xff]  ;;  %v302_v11 = vld [vmem:[#allocation5 + $0x5a0] sm:$0xff]  ;;  %730 = vmatpush1.msra.mxu1 %v306_v7  ;;  %660 = vmatprep.subr.mxu0 %v175_v8  ;;  %p1845_p10 = por %p1844_p9, %p1843_p8 }
  0x5e   :  { %v171_v12 = vld [vmem:[#allocation5 + $0x188] sm:$0xff]  ;;  %731 = vmatprep.subr.mxu1 %v303_v9  ;;  %v170_v14 = vld [vmem:[#allocation5 + $0x180] sm:$0xff]  ;;  %661 = vmatpush1.msra.mxu0 %v174_v10 }
  0x5f   :  { %v299_v13 = vld [vmem:[#allocation5 + $0x588] sm:$0xff]  ;;  %v298_v15 = vld [vmem:[#allocation5 + $0x580] sm:$0xff]  ;;  %732 = vmatpush1.msra.mxu1 %v302_v11  ;;  %662 = vmatprep.subr.mxu0 %v171_v12  ;;  %p1846_p11 = pnand %p1845_p10, %p1839_p7 }
  0x60   :  { %v167_v16 = vld [vmem:[#allocation5 + $0x168] sm:$0xff]  ;;  %733 = vmatprep.subr.mxu1 %v299_v13  ;;  %v166_v18 = vld [vmem:[#allocation5 + $0x160] sm:$0xff]  ;;  %663 = vmatpush1.msra.mxu0 %v170_v14 }
  0x61   :  { %v295_v17 = vld [vmem:[#allocation5 + $0x568] sm:$0xff]  ;;  %v294_v19 = vld [vmem:[#allocation5 + $0x560] sm:$0xff]  ;;  %734 = vmatpush1.msra.mxu1 %v298_v15  ;;  %664 = vmatprep.subr.mxu0 %v167_v16 }
  0x62   :  { %v163_v20 = vld [vmem:[#allocation5 + $0x148] sm:$0xff]  ;;  %735 = vmatprep.subr.mxu1 %v295_v17  ;;  %v162_v22 = vld [vmem:[#allocation5 + $0x140] sm:$0xff]  ;;  %665 = vmatpush1.msra.mxu0 %v166_v18 }
  0x63   :  { %v291_v21 = vld [vmem:[#allocation5 + $0x548] sm:$0xff]  ;;  %v290_v23 = vld [vmem:[#allocation5 + $0x540] sm:$0xff]  ;;  %736 = vmatpush1.msra.mxu1 %v294_v19  ;;  %666 = vmatprep.subr.mxu0 %v163_v20 }
  0x64   :  { %v159_v24 = vld [vmem:[#allocation5 + $0x128] sm:$0xff]  ;;  %737 = vmatprep.subr.mxu1 %v291_v21  ;;  %v158_v26 = vld [vmem:[#allocation5 + $0x120] sm:$0xff]  ;;  %667 = vmatpush1.msra.mxu0 %v162_v22 }
  0x65   :  { %v287_v25 = vld [vmem:[#allocation5 + $0x528] sm:$0xff]  ;;  %v286_v27 = vld [vmem:[#allocation5 + $0x520] sm:$0xff]  ;;  %738 = vmatpush1.msra.mxu1 %v290_v23  ;;  %668 = vmatprep.subr.mxu0 %v159_v24 }
  0x66   :  { %v155_v28 = vld [vmem:[#allocation5 + $0x108] sm:$0xff]  ;;  %739 = vmatprep.subr.mxu1 %v287_v25  ;;  %v154_v30 = vld [vmem:[#allocation5 + $0x100] sm:$0xff]  ;;  %669 = vmatpush1.msra.mxu0 %v158_v26 }
  0x67   :  { %v283_v29 = vld [vmem:[#allocation5 + $0x508] sm:$0xff]  ;;  %v282_v31 = vld [vmem:[#allocation5 + $0x500] sm:$0xff]  ;;  %740 = vmatpush1.msra.mxu1 %v286_v27  ;;  %670 = vmatprep.subr.mxu0 %v155_v28 }
  0x68   :  { %v151_v32 = vld [vmem:[#allocation5 + $0xe8] sm:$0xff]  ;;  %741 = vmatprep.subr.mxu1 %v283_v29  ;;  %v150_v34 = vld [vmem:[#allocation5 + $0xe0] sm:$0xff]  ;;  %671 = vmatpush1.msra.mxu0 %v154_v30 }
  0x69   :  { %v279_v33 = vld [vmem:[#allocation5 + $0x4e8] sm:$0xff]  ;;  %v278_v35 = vld [vmem:[#allocation5 + $0x4e0] sm:$0xff]  ;;  %742 = vmatpush1.msra.mxu1 %v282_v31  ;;  %672 = vmatprep.subr.mxu0 %v151_v32 }
  0x6a   :  { %v147_v36 = vld [vmem:[#allocation5 + $0xc8] sm:$0xff]  ;;  %743 = vmatprep.subr.mxu1 %v279_v33  ;;  %v146_v38 = vld [vmem:[#allocation5 + $0xc0] sm:$0xff]  ;;  %673 = vmatpush1.msra.mxu0 %v150_v34 }
  0x6b   :  { %v275_v37 = vld [vmem:[#allocation5 + $0x4c8] sm:$0xff]  ;;  %v274_v39 = vld [vmem:[#allocation5 + $0x4c0] sm:$0xff]  ;;  %744 = vmatpush1.msra.mxu1 %v278_v35  ;;  %674 = vmatprep.subr.mxu0 %v147_v36 }
  0x6c   :  { %v143_v40 = vld [vmem:[#allocation5 + $0xa8] sm:$0xff]  ;;  %745 = vmatprep.subr.mxu1 %v275_v37  ;;  %v142_v42 = vld [vmem:[#allocation5 + $0xa0] sm:$0xff]  ;;  %675 = vmatpush1.msra.mxu0 %v146_v38 }
  0x6d   :  { %v271_v41 = vld [vmem:[#allocation5 + $0x4a8] sm:$0xff]  ;;  %v270_v43 = vld [vmem:[#allocation5 + $0x4a0] sm:$0xff]  ;;  %746 = vmatpush1.msra.mxu1 %v274_v39  ;;  %676 = vmatprep.subr.mxu0 %v143_v40 }
  0x6e   :  { %v139_v44 = vld [vmem:[#allocation5 + $0x88] sm:$0xff]  ;;  %747 = vmatprep.subr.mxu1 %v271_v41  ;;  %v138_v46 = vld [vmem:[#allocation5 + $0x80] sm:$0xff]  ;;  %677 = vmatpush1.msra.mxu0 %v142_v42 }
  0x6f   :  { %v267_v45 = vld [vmem:[#allocation5 + $0x488] sm:$0xff]  ;;  %v266_v47 = vld [vmem:[#allocation5 + $0x480] sm:$0xff]  ;;  %748 = vmatpush1.msra.mxu1 %v270_v43  ;;  %678 = vmatprep.subr.mxu0 %v139_v44 }
  0x70   :  { %v135_v48 = vld [vmem:[#allocation5 + $0x68] sm:$0xff]  ;;  %749 = vmatprep.subr.mxu1 %v267_v45  ;;  %v134_v50 = vld [vmem:[#allocation5 + $0x60] sm:$0xff]  ;;  %679 = vmatpush1.msra.mxu0 %v138_v46 }
  0x71   :  { %v263_v49 = vld [vmem:[#allocation5 + $0x468] sm:$0xff]  ;;  %v262_v51 = vld [vmem:[#allocation5 + $0x460] sm:$0xff]  ;;  %750 = vmatpush1.msra.mxu1 %v266_v47  ;;  %680 = vmatprep.subr.mxu0 %v135_v48 }
  0x72   :  { %v131_v52 = vld [vmem:[#allocation5 + $0x48] sm:$0xff]  ;;  %751 = vmatprep.subr.mxu1 %v263_v49  ;;  %v130_v54 = vld [vmem:[#allocation5 + $0x40] sm:$0xff]  ;;  %681 = vmatpush1.msra.mxu0 %v134_v50 }
  0x73   :  { %v259_v53 = vld [vmem:[#allocation5 + $0x448] sm:$0xff]  ;;  %v258_v55 = vld [vmem:[#allocation5 + $0x440] sm:$0xff]  ;;  %752 = vmatpush1.msra.mxu1 %v262_v51  ;;  %682 = vmatprep.subr.mxu0 %v131_v52 }
  0x74   :  { %v127_v56 = vld [vmem:[#allocation5 + $0x28] sm:$0xff]  ;;  %753 = vmatprep.subr.mxu1 %v259_v53  ;;  %v126_v58 = vld [vmem:[#allocation5 + $0x20] sm:$0xff]  ;;  %683 = vmatpush1.msra.mxu0 %v130_v54 }
  0x75   :  { %v255_v57 = vld [vmem:[#allocation5 + $0x428] sm:$0xff]  ;;  %v254_v59 = vld [vmem:[#allocation5 + $0x420] sm:$0xff]  ;;  %754 = vmatpush1.msra.mxu1 %v258_v55  ;;  %684 = vmatprep.subr.mxu0 %v127_v56 }
  0x76   :  { %v123_v60 = vld [vmem:[#allocation5 + $0x8] sm:$0xff]  ;;  %755 = vmatprep.subr.mxu1 %v255_v57  ;;  %v122_v62 = vld [vmem:[#allocation5] sm:$0xff]  ;;  %685 = vmatpush1.msra.mxu0 %v126_v58 }
  0x77   :  { %v251_v61 = vld [vmem:[#allocation5 + $0x408] sm:$0xff]  ;;  %v250_v63 = vld [vmem:[#allocation5 + $0x400] sm:$0xff]  ;;  %756 = vmatpush1.msra.mxu1 %v254_v59  ;;  %686 = vmatprep.subr.mxu0 %v123_v60 }
  0x78   :  { %v247_v0 = vld [vmem:[#allocation5 + $0x3e8] sm:$0xff]  ;;  %757 = vmatprep.subr.mxu1 %v251_v61  ;;  %v246_v2 = vld [vmem:[#allocation5 + $0x3e0] sm:$0xff]  ;;  %687 = vmatpush1.msra.mxu0 %v122_v62 }
  0x79   :  { %v375_v1 = vld [vmem:[#allocation5 + $0x7e8] sm:$0xff]  ;;  %v374_v3 = vld [vmem:[#allocation5 + $0x7e0] sm:$0xff]  ;;  %758 = vmatpush1.msra.mxu1 %v250_v63  ;;  %688 = vmatprep.subr.mxu0 %v247_v0 }
  0x7a   :  { %v243_v4 = vld [vmem:[#allocation5 + $0x3c8] sm:$0xff]  ;;  %759 = vmatprep.subr.mxu1 %v375_v1  ;;  %v242_v6 = vld [vmem:[#allocation5 + $0x3c0] sm:$0xff]  ;;  %689 = vmatpush2.msra.mxu0 %v246_v2  ;;  %v117_v2 = vld [vmem:[#allocation2 + $0x18] sm:$0xff] }
  0x7b   :  { %v371_v5 = vld [vmem:[#allocation5 + $0x7c8] sm:$0xff]  ;;  %v370_v7 = vld [vmem:[#allocation5 + $0x7c0] sm:$0xff]  ;;  %760 = vmatpush2.msra.mxu1 %v374_v3  ;;  %690 = vmatprep.subr.mxu0 %v243_v4 }
  0x7c   :  { %v239_v8 = vld [vmem:[#allocation5 + $0x3a8] sm:$0xff]  ;;  %761 = vmatprep.subr.mxu1 %v371_v5  ;;  %v238_v10 = vld [vmem:[#allocation5 + $0x3a0] sm:$0xff]  ;;  %691 = vmatpush2.msra.mxu0 %v242_v6  ;;  %v116_v5 = vld [vmem:[#allocation2 + $0x10] sm:$0xff] }
  0x7d   :  { %v367_v9 = vld [vmem:[#allocation5 + $0x7a8] sm:$0xff]  ;;  %v366_v11 = vld [vmem:[#allocation5 + $0x7a0] sm:$0xff]  ;;  %762 = vmatpush2.msra.mxu1 %v370_v7  ;;  %692 = vmatprep.subr.mxu0 %v239_v8 }
  0x7e   :  { %v235_v12 = vld [vmem:[#allocation5 + $0x388] sm:$0xff]  ;;  %763 = vmatprep.subr.mxu1 %v367_v9  ;;  %v234_v14 = vld [vmem:[#allocation5 + $0x380] sm:$0xff]  ;;  %693 = vmatpush2.msra.mxu0 %v238_v10 }
  0x7f   :  { %v363_v13 = vld [vmem:[#allocation5 + $0x788] sm:$0xff]  ;;  %v362_v15 = vld [vmem:[#allocation5 + $0x780] sm:$0xff]  ;;  %764 = vmatpush2.msra.mxu1 %v366_v11  ;;  %694 = vmatprep.subr.mxu0 %v235_v12 }
  0x80   :  { %v231_v16 = vld [vmem:[#allocation5 + $0x368] sm:$0xff]  ;;  %765 = vmatprep.subr.mxu1 %v363_v13  ;;  %v230_v18 = vld [vmem:[#allocation5 + $0x360] sm:$0xff]  ;;  %695 = vmatpush2.msra.mxu0 %v234_v14 }
  0x81   :  { %v359_v17 = vld [vmem:[#allocation5 + $0x768] sm:$0xff]  ;;  %v358_v19 = vld [vmem:[#allocation5 + $0x760] sm:$0xff]  ;;  %766 = vmatpush2.msra.mxu1 %v362_v15  ;;  %696 = vmatprep.subr.mxu0 %v231_v16 }
  0x82   :  { %v227_v20 = vld [vmem:[#allocation5 + $0x348] sm:$0xff]  ;;  %767 = vmatprep.subr.mxu1 %v359_v17  ;;  %v226_v22 = vld [vmem:[#allocation5 + $0x340] sm:$0xff]  ;;  %697 = vmatpush2.msra.mxu0 %v230_v18 }
  0x83   :  { %v355_v21 = vld [vmem:[#allocation5 + $0x748] sm:$0xff]  ;;  %v354_v23 = vld [vmem:[#allocation5 + $0x740] sm:$0xff]  ;;  %768 = vmatpush2.msra.mxu1 %v358_v19  ;;  %698 = vmatprep.subr.mxu0 %v227_v20 }
  0x84   :  { %v223_v24 = vld [vmem:[#allocation5 + $0x328] sm:$0xff]  ;;  %769 = vmatprep.subr.mxu1 %v355_v21  ;;  %v222_v26 = vld [vmem:[#allocation5 + $0x320] sm:$0xff]  ;;  %699 = vmatpush2.msra.mxu0 %v226_v22 }
  0x85   :  { %v351_v25 = vld [vmem:[#allocation5 + $0x728] sm:$0xff]  ;;  %v350_v27 = vld [vmem:[#allocation5 + $0x720] sm:$0xff]  ;;  %770 = vmatpush2.msra.mxu1 %v354_v23  ;;  %700 = vmatprep.subr.mxu0 %v223_v24 }
  0x86   :  { %v219_v28 = vld [vmem:[#allocation5 + $0x308] sm:$0xff]  ;;  %771 = vmatprep.subr.mxu1 %v351_v25  ;;  %v218_v30 = vld [vmem:[#allocation5 + $0x300] sm:$0xff]  ;;  %701 = vmatpush2.msra.mxu0 %v222_v26 }
  0x87   :  { %v347_v29 = vld [vmem:[#allocation5 + $0x708] sm:$0xff]  ;;  %v346_v31 = vld [vmem:[#allocation5 + $0x700] sm:$0xff]  ;;  %772 = vmatpush2.msra.mxu1 %v350_v27  ;;  %702 = vmatprep.subr.mxu0 %v219_v28 }
  0x88   :  { %v215_v32 = vld [vmem:[#allocation5 + $0x2e8] sm:$0xff]  ;;  %773 = vmatprep.subr.mxu1 %v347_v29  ;;  %v214_v34 = vld [vmem:[#allocation5 + $0x2e0] sm:$0xff]  ;;  %703 = vmatpush2.msra.mxu0 %v218_v30 }
  0x89   :  { %v343_v33 = vld [vmem:[#allocation5 + $0x6e8] sm:$0xff]  ;;  %v342_v35 = vld [vmem:[#allocation5 + $0x6e0] sm:$0xff]  ;;  %774 = vmatpush2.msra.mxu1 %v346_v31  ;;  %704 = vmatprep.subr.mxu0 %v215_v32 }
  0x8a   :  { %v211_v36 = vld [vmem:[#allocation5 + $0x2c8] sm:$0xff]  ;;  %775 = vmatprep.subr.mxu1 %v343_v33  ;;  %v210_v38 = vld [vmem:[#allocation5 + $0x2c0] sm:$0xff]  ;;  %705 = vmatpush2.msra.mxu0 %v214_v34 }
  0x8b   :  { %v339_v37 = vld [vmem:[#allocation5 + $0x6c8] sm:$0xff]  ;;  %v338_v39 = vld [vmem:[#allocation5 + $0x6c0] sm:$0xff]  ;;  %776 = vmatpush2.msra.mxu1 %v342_v35  ;;  %706 = vmatprep.subr.mxu0 %v211_v36 }
  0x8c   :  { %v207_v40 = vld [vmem:[#allocation5 + $0x2a8] sm:$0xff]  ;;  %777 = vmatprep.subr.mxu1 %v339_v37  ;;  %v206_v42 = vld [vmem:[#allocation5 + $0x2a0] sm:$0xff]  ;;  %707 = vmatpush2.msra.mxu0 %v210_v38 }
  0x8d   :  { %v335_v41 = vld [vmem:[#allocation5 + $0x6a8] sm:$0xff]  ;;  %v334_v43 = vld [vmem:[#allocation5 + $0x6a0] sm:$0xff]  ;;  %778 = vmatpush2.msra.mxu1 %v338_v39  ;;  %708 = vmatprep.subr.mxu0 %v207_v40 }
  0x8e   :  { %v203_v44 = vld [vmem:[#allocation5 + $0x288] sm:$0xff]  ;;  %779 = vmatprep.subr.mxu1 %v335_v41  ;;  %v202_v46 = vld [vmem:[#allocation5 + $0x280] sm:$0xff]  ;;  %709 = vmatpush2.msra.mxu0 %v206_v42 }
  0x8f   :  { %v331_v45 = vld [vmem:[#allocation5 + $0x688] sm:$0xff]  ;;  %v330_v47 = vld [vmem:[#allocation5 + $0x680] sm:$0xff]  ;;  %780 = vmatpush2.msra.mxu1 %v334_v43  ;;  %710 = vmatprep.subr.mxu0 %v203_v44 }
  0x90   :  { %v199_v48 = vld [vmem:[#allocation5 + $0x268] sm:$0xff]  ;;  %781 = vmatprep.subr.mxu1 %v331_v45  ;;  %v198_v50 = vld [vmem:[#allocation5 + $0x260] sm:$0xff]  ;;  %711 = vmatpush2.msra.mxu0 %v202_v46 }
  0x91   :  { %v327_v49 = vld [vmem:[#allocation5 + $0x668] sm:$0xff]  ;;  %v326_v51 = vld [vmem:[#allocation5 + $0x660] sm:$0xff]  ;;  %782 = vmatpush2.msra.mxu1 %v330_v47  ;;  %712 = vmatprep.subr.mxu0 %v199_v48 }
  0x92   :  { %v195_v52 = vld [vmem:[#allocation5 + $0x248] sm:$0xff]  ;;  %783 = vmatprep.subr.mxu1 %v327_v49  ;;  %v194_v54 = vld [vmem:[#allocation5 + $0x240] sm:$0xff]  ;;  %713 = vmatpush2.msra.mxu0 %v198_v50 }
  0x93   :  { %v323_v53 = vld [vmem:[#allocation5 + $0x648] sm:$0xff]  ;;  %v322_v55 = vld [vmem:[#allocation5 + $0x640] sm:$0xff]  ;;  %784 = vmatpush2.msra.mxu1 %v326_v51  ;;  %714 = vmatprep.subr.mxu0 %v195_v52 }
  0x94   :  { %v191_v56 = vld [vmem:[#allocation5 + $0x228] sm:$0xff]  ;;  %785 = vmatprep.subr.mxu1 %v323_v53  ;;  %v190_v58 = vld [vmem:[#allocation5 + $0x220] sm:$0xff]  ;;  %715 = vmatpush2.msra.mxu0 %v194_v54 }
  0x95   :  { %v319_v57 = vld [vmem:[#allocation5 + $0x628] sm:$0xff]  ;;  %v318_v59 = vld [vmem:[#allocation5 + $0x620] sm:$0xff]  ;;  %786 = vmatpush2.msra.mxu1 %v322_v55  ;;  %716 = vmatprep.subr.mxu0 %v191_v56 }
  0x96   :  { %v187_v60 = vld [vmem:[#allocation5 + $0x208] sm:$0xff]  ;;  %787 = vmatprep.subr.mxu1 %v319_v57  ;;  %v186_v62 = vld [vmem:[#allocation5 + $0x200] sm:$0xff]  ;;  %717 = vmatpush2.msra.mxu0 %v190_v58 }
  0x97   :  { %v315_v61 = vld [vmem:[#allocation5 + $0x608] sm:$0xff]  ;;  %788 = vmatpush2.msra.mxu1 %v318_v59  ;;  %v314_v0 = vld [vmem:[#allocation5 + $0x600] sm:$0xff]  ;;  %718 = vmatprep.subr.mxu0 %v187_v60 }
  0x98   :  { %v115_v63 = vld [vmem:[#allocation2 + $0x8] sm:$0xff]  ;;  %v114_v1 = vld [vmem:[#allocation2] sm:$0xff]  ;;  %789 = vmatprep.subr.mxu1 %v315_v61  ;;  %719 = vmatpush2.msra.mxu0 %v186_v62 }
  0x99   :  { %v439_v3 = vld [vmem:[#allocation5 + $0x9e8] sm:$0xff]  ;;  %720 = vmatprep.mubr.f32.mxu0 %v115_v63  ;;  %790 = vmatpush2.msra.mxu1 %v314_v0  ;;  %v438_v6 = vld [vmem:[#allocation5 + $0x9e0] sm:$0xff] }
  0x9a   :  { %v567_v4 = vld [vmem:[#allocation5 + $0xde8] sm:$0xff]  ;;  %721 = vmatmul.mubr.f32.vlgmr.msra.gmra.mxu0 %v114_v1  ;;  %v566_v7 = vld [vmem:[#allocation5 + $0xde0] sm:$0xff]  ;;  %791 = vmatprep.mubr.f32.mxu1 %v117_v2 }
  0x9b   :  { %798 = vmatprep.subr.mxu0 %v439_v3  ;;  %v435_v8 = vld [vmem:[#allocation5 + $0x9c8] sm:$0xff]  ;;  %869 = vmatprep.subr.mxu1 %v567_v4  ;;  %v434_v10 = vld [vmem:[#allocation5 + $0x9c0] sm:$0xff] }
  0x9c   :  { %v563_v9 = vld [vmem:[#allocation5 + $0xdc8] sm:$0xff]  ;;  %792 = vmatmul.mubr.f32.vlgmr.msra.gmra.mxu1 %v116_v5  ;;  %v562_v11 = vld [vmem:[#allocation5 + $0xdc0] sm:$0xff]  ;;  %799 = vmatpush1.msra.mxu0 %v438_v6 }
  0x9d   :  { %870 = vmatpush1.msra.mxu1 %v566_v7  ;;  %v431_v12 = vld [vmem:[#allocation5 + $0x9a8] sm:$0xff]  ;;  %800 = vmatprep.subr.mxu0 %v435_v8  ;;  %v430_v14 = vld [vmem:[#allocation5 + $0x9a0] sm:$0xff] }
  0x9e   :  { %v559_v13 = vld [vmem:[#allocation5 + $0xda8] sm:$0xff]  ;;  %871 = vmatprep.subr.mxu1 %v563_v9  ;;  %v558_v15 = vld [vmem:[#allocation5 + $0xda0] sm:$0xff]  ;;  %801 = vmatpush1.msra.mxu0 %v434_v10 }
  0x9f   :  { %872 = vmatpush1.msra.mxu1 %v562_v11  ;;  %v427_v16 = vld [vmem:[#allocation5 + $0x988] sm:$0xff]  ;;  %802 = vmatprep.subr.mxu0 %v431_v12  ;;  %v426_v18 = vld [vmem:[#allocation5 + $0x980] sm:$0xff] }
  0xa0   :  { %v555_v17 = vld [vmem:[#allocation5 + $0xd88] sm:$0xff]  ;;  %873 = vmatprep.subr.mxu1 %v559_v13  ;;  %v554_v19 = vld [vmem:[#allocation5 + $0xd80] sm:$0xff]  ;;  %803 = vmatpush1.msra.mxu0 %v430_v14 }
  0xa1   :  { %874 = vmatpush1.msra.mxu1 %v558_v15  ;;  %v423_v20 = vld [vmem:[#allocation5 + $0x968] sm:$0xff]  ;;  %804 = vmatprep.subr.mxu0 %v427_v16  ;;  %v422_v22 = vld [vmem:[#allocation5 + $0x960] sm:$0xff] }
  0xa2   :  { %v551_v21 = vld [vmem:[#allocation5 + $0xd68] sm:$0xff]  ;;  %875 = vmatprep.subr.mxu1 %v555_v17  ;;  %v550_v23 = vld [vmem:[#allocation5 + $0xd60] sm:$0xff]  ;;  %805 = vmatpush1.msra.mxu0 %v426_v18 }
  0xa3   :  { %876 = vmatpush1.msra.mxu1 %v554_v19  ;;  %v419_v24 = vld [vmem:[#allocation5 + $0x948] sm:$0xff]  ;;  %806 = vmatprep.subr.mxu0 %v423_v20  ;;  %v418_v26 = vld [vmem:[#allocation5 + $0x940] sm:$0xff] }
  0xa4   :  { %v547_v25 = vld [vmem:[#allocation5 + $0xd48] sm:$0xff]  ;;  %877 = vmatprep.subr.mxu1 %v551_v21  ;;  %v546_v27 = vld [vmem:[#allocation5 + $0xd40] sm:$0xff]  ;;  %807 = vmatpush1.msra.mxu0 %v422_v22 }
  0xa5   :  { %878 = vmatpush1.msra.mxu1 %v550_v23  ;;  %v415_v28 = vld [vmem:[#allocation5 + $0x928] sm:$0xff]  ;;  %808 = vmatprep.subr.mxu0 %v419_v24  ;;  %v414_v30 = vld [vmem:[#allocation5 + $0x920] sm:$0xff] }
  0xa6   :  { %v543_v29 = vld [vmem:[#allocation5 + $0xd28] sm:$0xff]  ;;  %879 = vmatprep.subr.mxu1 %v547_v25  ;;  %v542_v31 = vld [vmem:[#allocation5 + $0xd20] sm:$0xff]  ;;  %809 = vmatpush1.msra.mxu0 %v418_v26 }
  0xa7   :  { %880 = vmatpush1.msra.mxu1 %v546_v27  ;;  %v411_v32 = vld [vmem:[#allocation5 + $0x908] sm:$0xff]  ;;  %810 = vmatprep.subr.mxu0 %v415_v28  ;;  %v410_v34 = vld [vmem:[#allocation5 + $0x900] sm:$0xff] }
  0xa8   :  { %v539_v33 = vld [vmem:[#allocation5 + $0xd08] sm:$0xff]  ;;  %881 = vmatprep.subr.mxu1 %v543_v29  ;;  %v538_v35 = vld [vmem:[#allocation5 + $0xd00] sm:$0xff]  ;;  %811 = vmatpush1.msra.mxu0 %v414_v30 }
  0xa9   :  { %882 = vmatpush1.msra.mxu1 %v542_v31  ;;  %v407_v36 = vld [vmem:[#allocation5 + $0x8e8] sm:$0xff]  ;;  %812 = vmatprep.subr.mxu0 %v411_v32  ;;  %v406_v38 = vld [vmem:[#allocation5 + $0x8e0] sm:$0xff] }
  0xaa   :  { %v535_v37 = vld [vmem:[#allocation5 + $0xce8] sm:$0xff]  ;;  %883 = vmatprep.subr.mxu1 %v539_v33  ;;  %v534_v39 = vld [vmem:[#allocation5 + $0xce0] sm:$0xff]  ;;  %813 = vmatpush1.msra.mxu0 %v410_v34 }
  0xab   :  { %884 = vmatpush1.msra.mxu1 %v538_v35  ;;  %v403_v40 = vld [vmem:[#allocation5 + $0x8c8] sm:$0xff]  ;;  %814 = vmatprep.subr.mxu0 %v407_v36  ;;  %v402_v42 = vld [vmem:[#allocation5 + $0x8c0] sm:$0xff] }
  0xac   :  { %v531_v41 = vld [vmem:[#allocation5 + $0xcc8] sm:$0xff]  ;;  %885 = vmatprep.subr.mxu1 %v535_v37  ;;  %v530_v43 = vld [vmem:[#allocation5 + $0xcc0] sm:$0xff]  ;;  %815 = vmatpush1.msra.mxu0 %v406_v38 }
  0xad   :  { %886 = vmatpush1.msra.mxu1 %v534_v39  ;;  %v399_v44 = vld [vmem:[#allocation5 + $0x8a8] sm:$0xff]  ;;  %816 = vmatprep.subr.mxu0 %v403_v40  ;;  %v398_v46 = vld [vmem:[#allocation5 + $0x8a0] sm:$0xff] }
  0xae   :  { %v527_v45 = vld [vmem:[#allocation5 + $0xca8] sm:$0xff]  ;;  %887 = vmatprep.subr.mxu1 %v531_v41  ;;  %v526_v47 = vld [vmem:[#allocation5 + $0xca0] sm:$0xff]  ;;  %817 = vmatpush1.msra.mxu0 %v402_v42 }
  0xaf   :  { %888 = vmatpush1.msra.mxu1 %v530_v43  ;;  %v395_v48 = vld [vmem:[#allocation5 + $0x888] sm:$0xff]  ;;  %818 = vmatprep.subr.mxu0 %v399_v44  ;;  %v394_v50 = vld [vmem:[#allocation5 + $0x880] sm:$0xff] }
  0xb0   :  { %v523_v49 = vld [vmem:[#allocation5 + $0xc88] sm:$0xff]  ;;  %889 = vmatprep.subr.mxu1 %v527_v45  ;;  %v522_v51 = vld [vmem:[#allocation5 + $0xc80] sm:$0xff]  ;;  %819 = vmatpush1.msra.mxu0 %v398_v46 }
  0xb1   :  { %890 = vmatpush1.msra.mxu1 %v526_v47  ;;  %v391_v52 = vld [vmem:[#allocation5 + $0x868] sm:$0xff]  ;;  %820 = vmatprep.subr.mxu0 %v395_v48  ;;  %v390_v54 = vld [vmem:[#allocation5 + $0x860] sm:$0xff] }
  0xb2   :  { %v519_v53 = vld [vmem:[#allocation5 + $0xc68] sm:$0xff]  ;;  %891 = vmatprep.subr.mxu1 %v523_v49  ;;  %v518_v55 = vld [vmem:[#allocation5 + $0xc60] sm:$0xff]  ;;  %821 = vmatpush1.msra.mxu0 %v394_v50 }
  0xb3   :  { %892 = vmatpush1.msra.mxu1 %v522_v51  ;;  %v387_v56 = vld [vmem:[#allocation5 + $0x848] sm:$0xff]  ;;  %822 = vmatprep.subr.mxu0 %v391_v52  ;;  %v386_v58 = vld [vmem:[#allocation5 + $0x840] sm:$0xff] }
  0xb4   :  { %v515_v57 = vld [vmem:[#allocation5 + $0xc48] sm:$0xff]  ;;  %893 = vmatprep.subr.mxu1 %v519_v53  ;;  %v514_v59 = vld [vmem:[#allocation5 + $0xc40] sm:$0xff]  ;;  %823 = vmatpush1.msra.mxu0 %v390_v54 }
  0xb5   :  { %894 = vmatpush1.msra.mxu1 %v518_v55  ;;  %v383_v60 = vld [vmem:[#allocation5 + $0x828] sm:$0xff]  ;;  %824 = vmatprep.subr.mxu0 %v387_v56  ;;  %v382_v62 = vld [vmem:[#allocation5 + $0x820] sm:$0xff] }
  0xb6   :  { %v511_v61 = vld [vmem:[#allocation5 + $0xc28] sm:$0xff]  ;;  %895 = vmatprep.subr.mxu1 %v515_v57  ;;  %v510_v63 = vld [vmem:[#allocation5 + $0xc20] sm:$0xff]  ;;  %825 = vmatpush1.msra.mxu0 %v386_v58 }
  0xb7   :  { %896 = vmatpush1.msra.mxu1 %v514_v59  ;;  %v379_v0 = vld [vmem:[#allocation5 + $0x808] sm:$0xff]  ;;  %826 = vmatprep.subr.mxu0 %v383_v60  ;;  %v378_v2 = vld [vmem:[#allocation5 + $0x800] sm:$0xff] }
  0xb8   :  { %v507_v1 = vld [vmem:[#allocation5 + $0xc08] sm:$0xff]  ;;  %897 = vmatprep.subr.mxu1 %v511_v61  ;;  %v506_v3 = vld [vmem:[#allocation5 + $0xc00] sm:$0xff]  ;;  %827 = vmatpush1.msra.mxu0 %v382_v62 }
  0xb9   :  { %898 = vmatpush1.msra.mxu1 %v510_v63  ;;  %v503_v4 = vld [vmem:[#allocation5 + $0xbe8] sm:$0xff]  ;;  %828 = vmatprep.subr.mxu0 %v379_v0  ;;  %v502_v6 = vld [vmem:[#allocation5 + $0xbe0] sm:$0xff] }
  0xba   :  { %v631_v5 = vld [vmem:[#allocation5 + $0xfe8] sm:$0xff]  ;;  %899 = vmatprep.subr.mxu1 %v507_v1  ;;  %v630_v7 = vld [vmem:[#allocation5 + $0xfe0] sm:$0xff]  ;;  %829 = vmatpush1.msra.mxu0 %v378_v2 }
  0xbb   :  { %900 = vmatpush1.msra.mxu1 %v506_v3  ;;  %v499_v8 = vld [vmem:[#allocation5 + $0xbc8] sm:$0xff]  ;;  %830 = vmatprep.subr.mxu0 %v503_v4  ;;  %v498_v10 = vld [vmem:[#allocation5 + $0xbc0] sm:$0xff] }
  0xbc   :  { %v627_v9 = vld [vmem:[#allocation5 + $0xfc8] sm:$0xff]  ;;  %901 = vmatprep.subr.mxu1 %v631_v5  ;;  %v626_v11 = vld [vmem:[#allocation5 + $0xfc0] sm:$0xff]  ;;  %831 = vmatpush2.msra.mxu0 %v502_v6  ;;  %v121_v6 = vld [vmem:[#allocation2 + $0x38] sm:$0xff] }
  0xbd   :  { %902 = vmatpush2.msra.mxu1 %v630_v7  ;;  %v495_v12 = vld [vmem:[#allocation5 + $0xba8] sm:$0xff]  ;;  %832 = vmatprep.subr.mxu0 %v499_v8  ;;  %v494_v14 = vld [vmem:[#allocation5 + $0xba0] sm:$0xff]  ;;  %v185_v7 = vld [vmem:[#allocation5 + $0x1f8] sm:$0xff] }
  0xbe   :  { %v623_v13 = vld [vmem:[#allocation5 + $0xfa8] sm:$0xff]  ;;  %903 = vmatprep.subr.mxu1 %v627_v9  ;;  %v622_v15 = vld [vmem:[#allocation5 + $0xfa0] sm:$0xff]  ;;  %833 = vmatpush2.msra.mxu0 %v498_v10  ;;  %v313_v8 = vld [vmem:[#allocation5 + $0x5f8] sm:$0xff] }
  0xbf   :  { %904 = vmatpush2.msra.mxu1 %v626_v11  ;;  %v491_v16 = vld [vmem:[#allocation5 + $0xb88] sm:$0xff]  ;;  %834 = vmatprep.subr.mxu0 %v495_v12  ;;  %v490_v18 = vld [vmem:[#allocation5 + $0xb80] sm:$0xff]  ;;  %v120_v9 = vld [vmem:[#allocation2 + $0x30] sm:$0xff] }
  0xc0   :  { %v619_v17 = vld [vmem:[#allocation5 + $0xf88] sm:$0xff]  ;;  %905 = vmatprep.subr.mxu1 %v623_v13  ;;  %v618_v19 = vld [vmem:[#allocation5 + $0xf80] sm:$0xff]  ;;  %835 = vmatpush2.msra.mxu0 %v494_v14  ;;  %v184_v10 = vld [vmem:[#allocation5 + $0x1f0] sm:$0xff] }
  0xc1   :  { %906 = vmatpush2.msra.mxu1 %v622_v15  ;;  %v487_v20 = vld [vmem:[#allocation5 + $0xb68] sm:$0xff]  ;;  %836 = vmatprep.subr.mxu0 %v491_v16  ;;  %v486_v22 = vld [vmem:[#allocation5 + $0xb60] sm:$0xff]  ;;  %v312_v11 = vld [vmem:[#allocation5 + $0x5f0] sm:$0xff] }
  0xc2   :  { %v615_v21 = vld [vmem:[#allocation5 + $0xf68] sm:$0xff]  ;;  %907 = vmatprep.subr.mxu1 %v619_v17  ;;  %v614_v23 = vld [vmem:[#allocation5 + $0xf60] sm:$0xff]  ;;  %837 = vmatpush2.msra.mxu0 %v490_v18  ;;  %v181_v12 = vld [vmem:[#allocation5 + $0x1d8] sm:$0xff] }
  0xc3   :  { %908 = vmatpush2.msra.mxu1 %v618_v19  ;;  %v483_v24 = vld [vmem:[#allocation5 + $0xb48] sm:$0xff]  ;;  %838 = vmatprep.subr.mxu0 %v487_v20  ;;  %v482_v26 = vld [vmem:[#allocation5 + $0xb40] sm:$0xff]  ;;  %v309_v13 = vld [vmem:[#allocation5 + $0x5d8] sm:$0xff] }
  0xc4   :  { %v611_v25 = vld [vmem:[#allocation5 + $0xf48] sm:$0xff]  ;;  %909 = vmatprep.subr.mxu1 %v615_v21  ;;  %v610_v27 = vld [vmem:[#allocation5 + $0xf40] sm:$0xff]  ;;  %839 = vmatpush2.msra.mxu0 %v486_v22  ;;  %v180_v14 = vld [vmem:[#allocation5 + $0x1d0] sm:$0xff] }
  0xc5   :  { %910 = vmatpush2.msra.mxu1 %v614_v23  ;;  %v479_v28 = vld [vmem:[#allocation5 + $0xb28] sm:$0xff]  ;;  %840 = vmatprep.subr.mxu0 %v483_v24  ;;  %v478_v30 = vld [vmem:[#allocation5 + $0xb20] sm:$0xff]  ;;  %v308_v15 = vld [vmem:[#allocation5 + $0x5d0] sm:$0xff] }
  0xc6   :  { %v607_v29 = vld [vmem:[#allocation5 + $0xf28] sm:$0xff]  ;;  %911 = vmatprep.subr.mxu1 %v611_v25  ;;  %v606_v31 = vld [vmem:[#allocation5 + $0xf20] sm:$0xff]  ;;  %841 = vmatpush2.msra.mxu0 %v482_v26  ;;  %v177_v16 = vld [vmem:[#allocation5 + $0x1b8] sm:$0xff] }
  0xc7   :  { %912 = vmatpush2.msra.mxu1 %v610_v27  ;;  %v475_v32 = vld [vmem:[#allocation5 + $0xb08] sm:$0xff]  ;;  %842 = vmatprep.subr.mxu0 %v479_v28  ;;  %v474_v34 = vld [vmem:[#allocation5 + $0xb00] sm:$0xff]  ;;  %v305_v17 = vld [vmem:[#allocation5 + $0x5b8] sm:$0xff] }
  0xc8   :  { %v603_v33 = vld [vmem:[#allocation5 + $0xf08] sm:$0xff]  ;;  %913 = vmatprep.subr.mxu1 %v607_v29  ;;  %v602_v35 = vld [vmem:[#allocation5 + $0xf00] sm:$0xff]  ;;  %843 = vmatpush2.msra.mxu0 %v478_v30  ;;  %v176_v18 = vld [vmem:[#allocation5 + $0x1b0] sm:$0xff] }
  0xc9   :  { %914 = vmatpush2.msra.mxu1 %v606_v31  ;;  %v471_v36 = vld [vmem:[#allocation5 + $0xae8] sm:$0xff]  ;;  %844 = vmatprep.subr.mxu0 %v475_v32  ;;  %v470_v38 = vld [vmem:[#allocation5 + $0xae0] sm:$0xff]  ;;  %v304_v19 = vld [vmem:[#allocation5 + $0x5b0] sm:$0xff] }
  0xca   :  { %v599_v37 = vld [vmem:[#allocation5 + $0xee8] sm:$0xff]  ;;  %915 = vmatprep.subr.mxu1 %v603_v33  ;;  %v598_v39 = vld [vmem:[#allocation5 + $0xee0] sm:$0xff]  ;;  %845 = vmatpush2.msra.mxu0 %v474_v34  ;;  %v173_v20 = vld [vmem:[#allocation5 + $0x198] sm:$0xff] }
  0xcb   :  { %916 = vmatpush2.msra.mxu1 %v602_v35  ;;  %v467_v40 = vld [vmem:[#allocation5 + $0xac8] sm:$0xff]  ;;  %846 = vmatprep.subr.mxu0 %v471_v36  ;;  %v466_v42 = vld [vmem:[#allocation5 + $0xac0] sm:$0xff]  ;;  %v301_v21 = vld [vmem:[#allocation5 + $0x598] sm:$0xff] }
  0xcc   :  { %v595_v41 = vld [vmem:[#allocation5 + $0xec8] sm:$0xff]  ;;  %917 = vmatprep.subr.mxu1 %v599_v37  ;;  %v594_v43 = vld [vmem:[#allocation5 + $0xec0] sm:$0xff]  ;;  %847 = vmatpush2.msra.mxu0 %v470_v38  ;;  %v172_v22 = vld [vmem:[#allocation5 + $0x190] sm:$0xff] }
  0xcd   :  { %918 = vmatpush2.msra.mxu1 %v598_v39  ;;  %v463_v44 = vld [vmem:[#allocation5 + $0xaa8] sm:$0xff]  ;;  %848 = vmatprep.subr.mxu0 %v467_v40  ;;  %v462_v46 = vld [vmem:[#allocation5 + $0xaa0] sm:$0xff]  ;;  %v300_v23 = vld [vmem:[#allocation5 + $0x590] sm:$0xff] }
  0xce   :  { %v591_v45 = vld [vmem:[#allocation5 + $0xea8] sm:$0xff]  ;;  %919 = vmatprep.subr.mxu1 %v595_v41  ;;  %v590_v47 = vld [vmem:[#allocation5 + $0xea0] sm:$0xff]  ;;  %849 = vmatpush2.msra.mxu0 %v466_v42  ;;  %v169_v24 = vld [vmem:[#allocation5 + $0x178] sm:$0xff] }
  0xcf   :  { %920 = vmatpush2.msra.mxu1 %v594_v43  ;;  %v459_v48 = vld [vmem:[#allocation5 + $0xa88] sm:$0xff]  ;;  %850 = vmatprep.subr.mxu0 %v463_v44  ;;  %v458_v50 = vld [vmem:[#allocation5 + $0xa80] sm:$0xff]  ;;  %v297_v25 = vld [vmem:[#allocation5 + $0x578] sm:$0xff] }
  0xd0   :  { %v587_v49 = vld [vmem:[#allocation5 + $0xe88] sm:$0xff]  ;;  %921 = vmatprep.subr.mxu1 %v591_v45  ;;  %v586_v51 = vld [vmem:[#allocation5 + $0xe80] sm:$0xff]  ;;  %851 = vmatpush2.msra.mxu0 %v462_v46  ;;  %v168_v26 = vld [vmem:[#allocation5 + $0x170] sm:$0xff] }
  0xd1   :  { %922 = vmatpush2.msra.mxu1 %v590_v47  ;;  %v455_v52 = vld [vmem:[#allocation5 + $0xa68] sm:$0xff]  ;;  %852 = vmatprep.subr.mxu0 %v459_v48  ;;  %v454_v54 = vld [vmem:[#allocation5 + $0xa60] sm:$0xff]  ;;  %v296_v27 = vld [vmem:[#allocation5 + $0x570] sm:$0xff] }
  0xd2   :  { %v583_v53 = vld [vmem:[#allocation5 + $0xe68] sm:$0xff]  ;;  %923 = vmatprep.subr.mxu1 %v587_v49  ;;  %v582_v55 = vld [vmem:[#allocation5 + $0xe60] sm:$0xff]  ;;  %853 = vmatpush2.msra.mxu0 %v458_v50  ;;  %v165_v28 = vld [vmem:[#allocation5 + $0x158] sm:$0xff] }
  0xd3   :  { %924 = vmatpush2.msra.mxu1 %v586_v51  ;;  %v451_v56 = vld [vmem:[#allocation5 + $0xa48] sm:$0xff]  ;;  %854 = vmatprep.subr.mxu0 %v455_v52  ;;  %v450_v58 = vld [vmem:[#allocation5 + $0xa40] sm:$0xff]  ;;  %v293_v29 = vld [vmem:[#allocation5 + $0x558] sm:$0xff] }
  0xd4   :  { %v579_v57 = vld [vmem:[#allocation5 + $0xe48] sm:$0xff]  ;;  %925 = vmatprep.subr.mxu1 %v583_v53  ;;  %v578_v59 = vld [vmem:[#allocation5 + $0xe40] sm:$0xff]  ;;  %855 = vmatpush2.msra.mxu0 %v454_v54  ;;  %v164_v30 = vld [vmem:[#allocation5 + $0x150] sm:$0xff] }
  0xd5   :  { %926 = vmatpush2.msra.mxu1 %v582_v55  ;;  %v447_v60 = vld [vmem:[#allocation5 + $0xa28] sm:$0xff]  ;;  %856 = vmatprep.subr.mxu0 %v451_v56  ;;  %v446_v62 = vld [vmem:[#allocation5 + $0xa20] sm:$0xff]  ;;  %v292_v31 = vld [vmem:[#allocation5 + $0x550] sm:$0xff] }
  0xd6   :  { %v575_v61 = vld [vmem:[#allocation5 + $0xe28] sm:$0xff]  ;;  %927 = vmatprep.subr.mxu1 %v579_v57  ;;  %v574_v63 = vld [vmem:[#allocation5 + $0xe20] sm:$0xff]  ;;  %857 = vmatpush2.msra.mxu0 %v450_v58  ;;  %v161_v32 = vld [vmem:[#allocation5 + $0x138] sm:$0xff] }
  0xd7   :  { %928 = vmatpush2.msra.mxu1 %v578_v59  ;;  %v443_v0 = vld [vmem:[#allocation5 + $0xa08] sm:$0xff]  ;;  %858 = vmatprep.subr.mxu0 %v447_v60  ;;  %v442_v2 = vld [vmem:[#allocation5 + $0xa00] sm:$0xff]  ;;  %v289_v33 = vld [vmem:[#allocation5 + $0x538] sm:$0xff] }
  0xd8   :  { %v571_v1 = vld [vmem:[#allocation5 + $0xe08] sm:$0xff]  ;;  %929 = vmatprep.subr.mxu1 %v575_v61  ;;  %859 = vmatpush2.msra.mxu0 %v446_v62  ;;  %v570_v4 = vld [vmem:[#allocation5 + $0xe00] sm:$0xff]  ;;  %v160_v34 = vld [vmem:[#allocation5 + $0x130] sm:$0xff] }
  0xd9   :  { %v119_v3 = vld [vmem:[#allocation2 + $0x28] sm:$0xff]  ;;  %930 = vmatpush2.msra.mxu1 %v574_v63  ;;  %v118_v5 = vld [vmem:[#allocation2 + $0x20] sm:$0xff]  ;;  %860 = vmatprep.subr.mxu0 %v443_v0  ;;  %v288_v35 = vld [vmem:[#allocation5 + $0x530] sm:$0xff] }
  0xda   :  { %931 = vmatprep.subr.mxu1 %v571_v1  ;;  %861 = vmatpush2.msra.mxu0 %v442_v2  ;;  %v157_v36 = vld [vmem:[#allocation5 + $0x118] sm:$0xff]  ;;  %v156_v38 = vld [vmem:[#allocation5 + $0x110] sm:$0xff] }
  0xdb   :  { %862 = vmatprep.mubr.f32.mxu0 %v119_v3  ;;  %932 = vmatpush2.msra.mxu1 %v570_v4  ;;  %v285_v37 = vld [vmem:[#allocation5 + $0x518] sm:$0xff]  ;;  %v284_v39 = vld [vmem:[#allocation5 + $0x510] sm:$0xff] }
  0xdc   :  { %863 = vmatmul.mubr.f32.vlgmr.msra.gmra.mxu0 %v118_v5  ;;  %933 = vmatprep.mubr.f32.mxu1 %v121_v6  ;;  %v153_v40 = vld [vmem:[#allocation5 + $0xf8] sm:$0xff]  ;;  %v152_v42 = vld [vmem:[#allocation5 + $0xf0] sm:$0xff] }
  0xdd   :  { %940 = vmatprep.subr.mxu0 %v185_v7  ;;  %1011 = vmatprep.subr.mxu1 %v313_v8  ;;  %v281_v41 = vld [vmem:[#allocation5 + $0x4f8] sm:$0xff]  ;;  %v280_v43 = vld [vmem:[#allocation5 + $0x4f0] sm:$0xff] }
  0xde   :  { %934 = vmatmul.mubr.f32.vlgmr.msra.gmra.mxu1 %v120_v9  ;;  %941 = vmatpush1.msra.mxu0 %v184_v10  ;;  %v149_v44 = vld [vmem:[#allocation5 + $0xd8] sm:$0xff]  ;;  %v148_v46 = vld [vmem:[#allocation5 + $0xd0] sm:$0xff] }
  0xdf   :  { %1012 = vmatpush1.msra.mxu1 %v312_v11  ;;  %942 = vmatprep.subr.mxu0 %v181_v12  ;;  %v277_v45 = vld [vmem:[#allocation5 + $0x4d8] sm:$0xff]  ;;  %v276_v47 = vld [vmem:[#allocation5 + $0x4d0] sm:$0xff] }
  0xe0   :  { %1013 = vmatprep.subr.mxu1 %v309_v13  ;;  %943 = vmatpush1.msra.mxu0 %v180_v14  ;;  %v145_v48 = vld [vmem:[#allocation5 + $0xb8] sm:$0xff]  ;;  %v144_v50 = vld [vmem:[#allocation5 + $0xb0] sm:$0xff] }
  0xe1   :  { %1014 = vmatpush1.msra.mxu1 %v308_v15  ;;  %944 = vmatprep.subr.mxu0 %v177_v16  ;;  %v273_v49 = vld [vmem:[#allocation5 + $0x4b8] sm:$0xff]  ;;  %v272_v51 = vld [vmem:[#allocation5 + $0x4b0] sm:$0xff] }
  0xe2   :  { %1015 = vmatprep.subr.mxu1 %v305_v17  ;;  %945 = vmatpush1.msra.mxu0 %v176_v18  ;;  %v141_v52 = vld [vmem:[#allocation5 + $0x98] sm:$0xff]  ;;  %v140_v54 = vld [vmem:[#allocation5 + $0x90] sm:$0xff] }
  0xe3   :  { %1016 = vmatpush1.msra.mxu1 %v304_v19  ;;  %946 = vmatprep.subr.mxu0 %v173_v20  ;;  %v269_v53 = vld [vmem:[#allocation5 + $0x498] sm:$0xff]  ;;  %v268_v55 = vld [vmem:[#allocation5 + $0x490] sm:$0xff] }
  0xe4   :  { %1017 = vmatprep.subr.mxu1 %v301_v21  ;;  %947 = vmatpush1.msra.mxu0 %v172_v22  ;;  %v137_v56 = vld [vmem:[#allocation5 + $0x78] sm:$0xff]  ;;  %v136_v58 = vld [vmem:[#allocation5 + $0x70] sm:$0xff] }
  0xe5   :  { %1018 = vmatpush1.msra.mxu1 %v300_v23  ;;  %948 = vmatprep.subr.mxu0 %v169_v24  ;;  %v265_v57 = vld [vmem:[#allocation5 + $0x478] sm:$0xff]  ;;  %v264_v59 = vld [vmem:[#allocation5 + $0x470] sm:$0xff] }
  0xe6   :  { %1019 = vmatprep.subr.mxu1 %v297_v25  ;;  %949 = vmatpush1.msra.mxu0 %v168_v26  ;;  %v133_v60 = vld [vmem:[#allocation5 + $0x58] sm:$0xff]  ;;  %v132_v62 = vld [vmem:[#allocation5 + $0x50] sm:$0xff] }
  0xe7   :  { %1020 = vmatpush1.msra.mxu1 %v296_v27  ;;  %950 = vmatprep.subr.mxu0 %v165_v28  ;;  %v261_v61 = vld [vmem:[#allocation5 + $0x458] sm:$0xff]  ;;  %v260_v63 = vld [vmem:[#allocation5 + $0x450] sm:$0xff] }
  0xe8   :  { %1021 = vmatprep.subr.mxu1 %v293_v29  ;;  %951 = vmatpush1.msra.mxu0 %v164_v30  ;;  %v129_v0 = vld [vmem:[#allocation5 + $0x38] sm:$0xff]  ;;  %v128_v2 = vld [vmem:[#allocation5 + $0x30] sm:$0xff] }
  0xe9   :  { %1022 = vmatpush1.msra.mxu1 %v292_v31  ;;  %952 = vmatprep.subr.mxu0 %v161_v32  ;;  %v257_v1 = vld [vmem:[#allocation5 + $0x438] sm:$0xff]  ;;  %v256_v3 = vld [vmem:[#allocation5 + $0x430] sm:$0xff] }
  0xea   :  { %1023 = vmatprep.subr.mxu1 %v289_v33  ;;  %953 = vmatpush1.msra.mxu0 %v160_v34  ;;  %v125_v4 = vld [vmem:[#allocation5 + $0x18] sm:$0xff]  ;;  %v124_v6 = vld [vmem:[#allocation5 + $0x10] sm:$0xff] }
  0xeb   :  { %1024 = vmatpush1.msra.mxu1 %v288_v35  ;;  %954 = vmatprep.subr.mxu0 %v157_v36  ;;  %v253_v5 = vld [vmem:[#allocation5 + $0x418] sm:$0xff]  ;;  %v252_v7 = vld [vmem:[#allocation5 + $0x410] sm:$0xff] }
  0xec   :  { %1025 = vmatprep.subr.mxu1 %v285_v37  ;;  %955 = vmatpush1.msra.mxu0 %v156_v38  ;;  %v249_v8 = vld [vmem:[#allocation5 + $0x3f8] sm:$0xff]  ;;  %v248_v10 = vld [vmem:[#allocation5 + $0x3f0] sm:$0xff] }
  0xed   :  { %1026 = vmatpush1.msra.mxu1 %v284_v39  ;;  %956 = vmatprep.subr.mxu0 %v153_v40  ;;  %v377_v9 = vld [vmem:[#allocation5 + $0x7f8] sm:$0xff]  ;;  %v376_v11 = vld [vmem:[#allocation5 + $0x7f0] sm:$0xff] }
  0xee   :  { %1027 = vmatprep.subr.mxu1 %v281_v41  ;;  %957 = vmatpush1.msra.mxu0 %v152_v42  ;;  %v245_v12 = vld [vmem:[#allocation5 + $0x3d8] sm:$0xff]  ;;  %v244_v14 = vld [vmem:[#allocation5 + $0x3d0] sm:$0xff] }
  0xef   :  { %1028 = vmatpush1.msra.mxu1 %v280_v43  ;;  %958 = vmatprep.subr.mxu0 %v149_v44  ;;  %v373_v13 = vld [vmem:[#allocation5 + $0x7d8] sm:$0xff]  ;;  %v372_v15 = vld [vmem:[#allocation5 + $0x7d0] sm:$0xff] }
  0xf0   :  { %1029 = vmatprep.subr.mxu1 %v277_v45  ;;  %959 = vmatpush1.msra.mxu0 %v148_v46  ;;  %v241_v16 = vld [vmem:[#allocation5 + $0x3b8] sm:$0xff]  ;;  %v240_v18 = vld [vmem:[#allocation5 + $0x3b0] sm:$0xff] }
  0xf1   :  { %1030 = vmatpush1.msra.mxu1 %v276_v47  ;;  %960 = vmatprep.subr.mxu0 %v145_v48  ;;  %v369_v17 = vld [vmem:[#allocation5 + $0x7b8] sm:$0xff]  ;;  %v368_v19 = vld [vmem:[#allocation5 + $0x7b0] sm:$0xff] }
  0xf2   :  { %1031 = vmatprep.subr.mxu1 %v273_v49  ;;  %961 = vmatpush1.msra.mxu0 %v144_v50  ;;  %v237_v20 = vld [vmem:[#allocation5 + $0x398] sm:$0xff]  ;;  %v236_v22 = vld [vmem:[#allocation5 + $0x390] sm:$0xff] }
  0xf3   :  { %1032 = vmatpush1.msra.mxu1 %v272_v51  ;;  %962 = vmatprep.subr.mxu0 %v141_v52  ;;  %v365_v21 = vld [vmem:[#allocation5 + $0x798] sm:$0xff]  ;;  %v364_v23 = vld [vmem:[#allocation5 + $0x790] sm:$0xff] }
  0xf4   :  { %1033 = vmatprep.subr.mxu1 %v269_v53  ;;  %963 = vmatpush1.msra.mxu0 %v140_v54  ;;  %v233_v24 = vld [vmem:[#allocation5 + $0x378] sm:$0xff]  ;;  %v232_v26 = vld [vmem:[#allocation5 + $0x370] sm:$0xff] }
  0xf5   :  { %1034 = vmatpush1.msra.mxu1 %v268_v55  ;;  %964 = vmatprep.subr.mxu0 %v137_v56  ;;  %v361_v25 = vld [vmem:[#allocation5 + $0x778] sm:$0xff]  ;;  %v360_v27 = vld [vmem:[#allocation5 + $0x770] sm:$0xff] }
  0xf6   :  { %1035 = vmatprep.subr.mxu1 %v265_v57  ;;  %965 = vmatpush1.msra.mxu0 %v136_v58  ;;  %v229_v28 = vld [vmem:[#allocation5 + $0x358] sm:$0xff]  ;;  %v228_v30 = vld [vmem:[#allocation5 + $0x350] sm:$0xff] }
  0xf7   :  { %1036 = vmatpush1.msra.mxu1 %v264_v59  ;;  %966 = vmatprep.subr.mxu0 %v133_v60  ;;  %v357_v29 = vld [vmem:[#allocation5 + $0x758] sm:$0xff]  ;;  %v356_v31 = vld [vmem:[#allocation5 + $0x750] sm:$0xff] }
  0xf8   :  { %1037 = vmatprep.subr.mxu1 %v261_v61  ;;  %967 = vmatpush1.msra.mxu0 %v132_v62  ;;  %v225_v32 = vld [vmem:[#allocation5 + $0x338] sm:$0xff]  ;;  %v224_v34 = vld [vmem:[#allocation5 + $0x330] sm:$0xff] }
  0xf9   :  { %1038 = vmatpush1.msra.mxu1 %v260_v63  ;;  %968 = vmatprep.subr.mxu0 %v129_v0  ;;  %v353_v33 = vld [vmem:[#allocation5 + $0x738] sm:$0xff]  ;;  %v352_v35 = vld [vmem:[#allocation5 + $0x730] sm:$0xff] }
  0xfa   :  { %1039 = vmatprep.subr.mxu1 %v257_v1  ;;  %969 = vmatpush1.msra.mxu0 %v128_v2  ;;  %v221_v36 = vld [vmem:[#allocation5 + $0x318] sm:$0xff]  ;;  %v220_v38 = vld [vmem:[#allocation5 + $0x310] sm:$0xff] }
  0xfb   :  { %1040 = vmatpush1.msra.mxu1 %v256_v3  ;;  %970 = vmatprep.subr.mxu0 %v125_v4  ;;  %v349_v37 = vld [vmem:[#allocation5 + $0x718] sm:$0xff]  ;;  %v348_v39 = vld [vmem:[#allocation5 + $0x710] sm:$0xff] }
  0xfc   :  { %1041 = vmatprep.subr.mxu1 %v253_v5  ;;  %971 = vmatpush1.msra.mxu0 %v124_v6  ;;  %v217_v40 = vld [vmem:[#allocation5 + $0x2f8] sm:$0xff]  ;;  %v216_v42 = vld [vmem:[#allocation5 + $0x2f0] sm:$0xff] }
  0xfd   :  { %1042 = vmatpush1.msra.mxu1 %v252_v7  ;;  %972 = vmatprep.subr.mxu0 %v249_v8  ;;  %v345_v41 = vld [vmem:[#allocation5 + $0x6f8] sm:$0xff]  ;;  %v344_v43 = vld [vmem:[#allocation5 + $0x6f0] sm:$0xff] }
  0xfe   :  { %1043 = vmatprep.subr.mxu1 %v377_v9  ;;  %973 = vmatpush2.msra.mxu0 %v248_v10  ;;  %v213_v44 = vld [vmem:[#allocation5 + $0x2d8] sm:$0xff]  ;;  %v212_v46 = vld [vmem:[#allocation5 + $0x2d0] sm:$0xff]  ;;  %v1690_v9 = vld [vmem:[#allocation2 + $0x8] sm:$0xff] }
  0xff   :  { %1044 = vmatpush2.msra.mxu1 %v376_v11  ;;  %974 = vmatprep.subr.mxu0 %v245_v12  ;;  %v341_v45 = vld [vmem:[#allocation5 + $0x6d8] sm:$0xff]  ;;  %v340_v47 = vld [vmem:[#allocation5 + $0x6d0] sm:$0xff]  ;;  %v1691_v11 = vld [vmem:[#allocation2] sm:$0xff] }
 0x100   :  { %1045 = vmatprep.subr.mxu1 %v373_v13  ;;  %975 = vmatpush2.msra.mxu0 %v244_v14  ;;  %v209_v48 = vld [vmem:[#allocation5 + $0x2b8] sm:$0xff]  ;;  %v208_v50 = vld [vmem:[#allocation5 + $0x2b0] sm:$0xff] }
 0x101   :  { %1046 = vmatpush2.msra.mxu1 %v372_v15  ;;  %976 = vmatprep.subr.mxu0 %v241_v16  ;;  %v337_v49 = vld [vmem:[#allocation5 + $0x6b8] sm:$0xff]  ;;  %v336_v51 = vld [vmem:[#allocation5 + $0x6b0] sm:$0xff] }
 0x102   :  { %1047 = vmatprep.subr.mxu1 %v369_v17  ;;  %977 = vmatpush2.msra.mxu0 %v240_v18  ;;  %v205_v52 = vld [vmem:[#allocation5 + $0x298] sm:$0xff]  ;;  %v204_v54 = vld [vmem:[#allocation5 + $0x290] sm:$0xff] }
 0x103   :  { %1048 = vmatpush2.msra.mxu1 %v368_v19  ;;  %978 = vmatprep.subr.mxu0 %v237_v20  ;;  %v333_v53 = vld [vmem:[#allocation5 + $0x698] sm:$0xff]  ;;  %v332_v55 = vld [vmem:[#allocation5 + $0x690] sm:$0xff] }
 0x104   :  { %1049 = vmatprep.subr.mxu1 %v365_v21  ;;  %979 = vmatpush2.msra.mxu0 %v236_v22  ;;  %v201_v56 = vld [vmem:[#allocation5 + $0x278] sm:$0xff]  ;;  %v200_v58 = vld [vmem:[#allocation5 + $0x270] sm:$0xff] }
 0x105   :  { %1050 = vmatpush2.msra.mxu1 %v364_v23  ;;  %980 = vmatprep.subr.mxu0 %v233_v24  ;;  %v329_v57 = vld [vmem:[#allocation5 + $0x678] sm:$0xff]  ;;  %v328_v59 = vld [vmem:[#allocation5 + $0x670] sm:$0xff] }
 0x106   :  { %1051 = vmatprep.subr.mxu1 %v361_v25  ;;  %981 = vmatpush2.msra.mxu0 %v232_v26  ;;  %v197_v60 = vld [vmem:[#allocation5 + $0x258] sm:$0xff]  ;;  %v196_v62 = vld [vmem:[#allocation5 + $0x250] sm:$0xff] }
 0x107   :  { %1052 = vmatpush2.msra.mxu1 %v360_v27  ;;  %982 = vmatprep.subr.mxu0 %v229_v28  ;;  %v325_v61 = vld [vmem:[#allocation5 + $0x658] sm:$0xff]  ;;  %v324_v63 = vld [vmem:[#allocation5 + $0x650] sm:$0xff] }
 0x108   :  { %1053 = vmatprep.subr.mxu1 %v357_v29  ;;  %983 = vmatpush2.msra.mxu0 %v228_v30  ;;  %v193_v0 = vld [vmem:[#allocation5 + $0x238] sm:$0xff]  ;;  %v192_v2 = vld [vmem:[#allocation5 + $0x230] sm:$0xff] }
 0x109   :  { %1054 = vmatpush2.msra.mxu1 %v356_v31  ;;  %984 = vmatprep.subr.mxu0 %v225_v32  ;;  %v321_v1 = vld [vmem:[#allocation5 + $0x638] sm:$0xff]  ;;  %v320_v3 = vld [vmem:[#allocation5 + $0x630] sm:$0xff] }
 0x10a   :  { %1055 = vmatprep.subr.mxu1 %v353_v33  ;;  %985 = vmatpush2.msra.mxu0 %v224_v34  ;;  %v189_v4 = vld [vmem:[#allocation5 + $0x218] sm:$0xff]  ;;  %v188_v6 = vld [vmem:[#allocation5 + $0x210] sm:$0xff] }
 0x10b   :  { %1056 = vmatpush2.msra.mxu1 %v352_v35  ;;  %986 = vmatprep.subr.mxu0 %v221_v36  ;;  %v317_v5 = vld [vmem:[#allocation5 + $0x618] sm:$0xff]  ;;  %v316_v7 = vld [vmem:[#allocation5 + $0x610] sm:$0xff] }
 0x10c   :  { %1057 = vmatprep.subr.mxu1 %v349_v37  ;;  %987 = vmatpush2.msra.mxu0 %v220_v38  ;;  %v441_v8 = vld [vmem:[#allocation5 + $0x9f8] sm:$0xff]  ;;  %v440_v12 = vld [vmem:[#allocation5 + $0x9f0] sm:$0xff] }
 0x10d   :  { %1058 = vmatpush2.msra.mxu1 %v348_v39  ;;  %988 = vmatprep.subr.mxu0 %v217_v40  ;;  %v569_v10 = vld [vmem:[#allocation5 + $0xdf8] sm:$0xff]  ;;  %v568_v13 = vld [vmem:[#allocation5 + $0xdf0] sm:$0xff] }
 0x10e   :  { %1059 = vmatprep.subr.mxu1 %v345_v41  ;;  %989 = vmatpush2.msra.mxu0 %v216_v42  ;;  %v1692_v14 = vld [vmem:[#allocation2 + $0x18] sm:$0xff]  ;;  %v1693_v17 = vld [vmem:[#allocation2 + $0x10] sm:$0xff] }
 0x10f   :  { %1060 = vmatpush2.msra.mxu1 %v344_v43  ;;  %990 = vmatprep.subr.mxu0 %v213_v44  ;;  %v437_v15 = vld [vmem:[#allocation5 + $0x9d8] sm:$0xff]  ;;  %v436_v18 = vld [vmem:[#allocation5 + $0x9d0] sm:$0xff] }
 0x110   :  { %1061 = vmatprep.subr.mxu1 %v341_v45  ;;  %991 = vmatpush2.msra.mxu0 %v212_v46  ;;  %v565_v16 = vld [vmem:[#allocation5 + $0xdd8] sm:$0xff]  ;;  %v564_v19 = vld [vmem:[#allocation5 + $0xdd0] sm:$0xff] }
 0x111   :  { %1062 = vmatpush2.msra.mxu1 %v340_v47  ;;  %992 = vmatprep.subr.mxu0 %v209_v48  ;;  %v433_v20 = vld [vmem:[#allocation5 + $0x9b8] sm:$0xff]  ;;  %v432_v22 = vld [vmem:[#allocation5 + $0x9b0] sm:$0xff] }
 0x112   :  { %1063 = vmatprep.subr.mxu1 %v337_v49  ;;  %993 = vmatpush2.msra.mxu0 %v208_v50  ;;  %v561_v21 = vld [vmem:[#allocation5 + $0xdb8] sm:$0xff]  ;;  %v560_v23 = vld [vmem:[#allocation5 + $0xdb0] sm:$0xff] }
 0x113   :  { %1064 = vmatpush2.msra.mxu1 %v336_v51  ;;  %994 = vmatprep.subr.mxu0 %v205_v52  ;;  %v429_v24 = vld [vmem:[#allocation5 + $0x998] sm:$0xff]  ;;  %v428_v26 = vld [vmem:[#allocation5 + $0x990] sm:$0xff] }
 0x114   :  { %1065 = vmatprep.subr.mxu1 %v333_v53  ;;  %995 = vmatpush2.msra.mxu0 %v204_v54  ;;  %v557_v25 = vld [vmem:[#allocation5 + $0xd98] sm:$0xff]  ;;  %v556_v27 = vld [vmem:[#allocation5 + $0xd90] sm:$0xff] }
 0x115   :  { %1066 = vmatpush2.msra.mxu1 %v332_v55  ;;  %996 = vmatprep.subr.mxu0 %v201_v56  ;;  %v425_v28 = vld [vmem:[#allocation5 + $0x978] sm:$0xff]  ;;  %v424_v30 = vld [vmem:[#allocation5 + $0x970] sm:$0xff] }
 0x116   :  { %1067 = vmatprep.subr.mxu1 %v329_v57  ;;  %997 = vmatpush2.msra.mxu0 %v200_v58  ;;  %v553_v29 = vld [vmem:[#allocation5 + $0xd78] sm:$0xff]  ;;  %v552_v31 = vld [vmem:[#allocation5 + $0xd70] sm:$0xff] }
 0x117   :  { %1068 = vmatpush2.msra.mxu1 %v328_v59  ;;  %998 = vmatprep.subr.mxu0 %v197_v60  ;;  %v421_v32 = vld [vmem:[#allocation5 + $0x958] sm:$0xff]  ;;  %v420_v34 = vld [vmem:[#allocation5 + $0x950] sm:$0xff] }
 0x118   :  { %1069 = vmatprep.subr.mxu1 %v325_v61  ;;  %999 = vmatpush2.msra.mxu0 %v196_v62  ;;  %v549_v33 = vld [vmem:[#allocation5 + $0xd58] sm:$0xff]  ;;  %v548_v35 = vld [vmem:[#allocation5 + $0xd50] sm:$0xff] }
 0x119   :  { %1070 = vmatpush2.msra.mxu1 %v324_v63  ;;  %1000 = vmatprep.subr.mxu0 %v193_v0  ;;  %v417_v36 = vld [vmem:[#allocation5 + $0x938] sm:$0xff]  ;;  %v416_v38 = vld [vmem:[#allocation5 + $0x930] sm:$0xff] }
 0x11a   :  { %1071 = vmatprep.subr.mxu1 %v321_v1  ;;  %1001 = vmatpush2.msra.mxu0 %v192_v2  ;;  %v545_v37 = vld [vmem:[#allocation5 + $0xd38] sm:$0xff]  ;;  %v544_v39 = vld [vmem:[#allocation5 + $0xd30] sm:$0xff] }
 0x11b   :  { %1072 = vmatpush2.msra.mxu1 %v320_v3  ;;  %1002 = vmatprep.subr.mxu0 %v189_v4  ;;  %v413_v40 = vld [vmem:[#allocation5 + $0x918] sm:$0xff]  ;;  %v412_v42 = vld [vmem:[#allocation5 + $0x910] sm:$0xff] }
 0x11c   :  { %1073 = vmatprep.subr.mxu1 %v317_v5  ;;  %1003 = vmatpush2.msra.mxu0 %v188_v6  ;;  %v541_v41 = vld [vmem:[#allocation5 + $0xd18] sm:$0xff]  ;;  %v540_v43 = vld [vmem:[#allocation5 + $0xd10] sm:$0xff] }
 0x11d   :  { %1004 = vmatprep.mubr.f32.mxu0 %v1690_v9  ;;  %1074 = vmatpush2.msra.mxu1 %v316_v7  ;;  %v409_v44 = vld [vmem:[#allocation5 + $0x8f8] sm:$0xff]  ;;  %v408_v46 = vld [vmem:[#allocation5 + $0x8f0] sm:$0xff] }
 0x11e   :  { %1005 = vmatmul.mubr.f32.vlgmr.msra.gmra.mxu0 %v1691_v11  ;;  %1075 = vmatprep.mubr.f32.mxu1 %v1692_v14  ;;  %v537_v45 = vld [vmem:[#allocation5 + $0xcf8] sm:$0xff]  ;;  %v536_v47 = vld [vmem:[#allocation5 + $0xcf0] sm:$0xff] }
 0x11f   :  { %1082 = vmatprep.subr.mxu0 %v441_v8  ;;  %1153 = vmatprep.subr.mxu1 %v569_v10  ;;  %v405_v48 = vld [vmem:[#allocation5 + $0x8d8] sm:$0xff]  ;;  %v404_v50 = vld [vmem:[#allocation5 + $0x8d0] sm:$0xff] }
 0x120   :  { %1076 = vmatmul.mubr.f32.vlgmr.msra.gmra.mxu1 %v1693_v17  ;;  %1083 = vmatpush1.msra.mxu0 %v440_v12  ;;  %v533_v49 = vld [vmem:[#allocation5 + $0xcd8] sm:$0xff]  ;;  %v532_v51 = vld [vmem:[#allocation5 + $0xcd0] sm:$0xff] }
 0x121   :  { %1154 = vmatpush1.msra.mxu1 %v568_v13  ;;  %1084 = vmatprep.subr.mxu0 %v437_v15  ;;  %v401_v52 = vld [vmem:[#allocation5 + $0x8b8] sm:$0xff]  ;;  %v400_v54 = vld [vmem:[#allocation5 + $0x8b0] sm:$0xff] }
 0x122   :  { %1155 = vmatprep.subr.mxu1 %v565_v16  ;;  %1085 = vmatpush1.msra.mxu0 %v436_v18  ;;  %v529_v53 = vld [vmem:[#allocation5 + $0xcb8] sm:$0xff]  ;;  %v528_v55 = vld [vmem:[#allocation5 + $0xcb0] sm:$0xff] }
 0x123   :  { %1156 = vmatpush1.msra.mxu1 %v564_v19  ;;  %1086 = vmatprep.subr.mxu0 %v433_v20  ;;  %v397_v56 = vld [vmem:[#allocation5 + $0x898] sm:$0xff]  ;;  %v396_v58 = vld [vmem:[#allocation5 + $0x890] sm:$0xff] }
 0x124   :  { %1157 = vmatprep.subr.mxu1 %v561_v21  ;;  %1087 = vmatpush1.msra.mxu0 %v432_v22  ;;  %v525_v57 = vld [vmem:[#allocation5 + $0xc98] sm:$0xff]  ;;  %v524_v59 = vld [vmem:[#allocation5 + $0xc90] sm:$0xff] }
 0x125   :  { %1158 = vmatpush1.msra.mxu1 %v560_v23  ;;  %1088 = vmatprep.subr.mxu0 %v429_v24  ;;  %v393_v60 = vld [vmem:[#allocation5 + $0x878] sm:$0xff]  ;;  %v392_v62 = vld [vmem:[#allocation5 + $0x870] sm:$0xff] }
 0x126   :  { %1159 = vmatprep.subr.mxu1 %v557_v25  ;;  %1089 = vmatpush1.msra.mxu0 %v428_v26  ;;  %v521_v61 = vld [vmem:[#allocation5 + $0xc78] sm:$0xff]  ;;  %v520_v63 = vld [vmem:[#allocation5 + $0xc70] sm:$0xff] }
 0x127   :  { %1160 = vmatpush1.msra.mxu1 %v556_v27  ;;  %1090 = vmatprep.subr.mxu0 %v425_v28  ;;  %v389_v0 = vld [vmem:[#allocation5 + $0x858] sm:$0xff]  ;;  %v388_v2 = vld [vmem:[#allocation5 + $0x850] sm:$0xff] }
 0x128   :  { %1161 = vmatprep.subr.mxu1 %v553_v29  ;;  %1091 = vmatpush1.msra.mxu0 %v424_v30  ;;  %v517_v1 = vld [vmem:[#allocation5 + $0xc58] sm:$0xff]  ;;  %v516_v3 = vld [vmem:[#allocation5 + $0xc50] sm:$0xff] }
 0x129   :  { %1162 = vmatpush1.msra.mxu1 %v552_v31  ;;  %1092 = vmatprep.subr.mxu0 %v421_v32  ;;  %v385_v4 = vld [vmem:[#allocation5 + $0x838] sm:$0xff]  ;;  %v384_v6 = vld [vmem:[#allocation5 + $0x830] sm:$0xff] }
 0x12a   :  { %1163 = vmatprep.subr.mxu1 %v549_v33  ;;  %1093 = vmatpush1.msra.mxu0 %v420_v34  ;;  %v513_v5 = vld [vmem:[#allocation5 + $0xc38] sm:$0xff]  ;;  %v512_v7 = vld [vmem:[#allocation5 + $0xc30] sm:$0xff] }
 0x12b   :  { %1164 = vmatpush1.msra.mxu1 %v548_v35  ;;  %1094 = vmatprep.subr.mxu0 %v417_v36  ;;  %v381_v8 = vld [vmem:[#allocation5 + $0x818] sm:$0xff]  ;;  %v380_v10 = vld [vmem:[#allocation5 + $0x810] sm:$0xff] }
 0x12c   :  { %1165 = vmatprep.subr.mxu1 %v545_v37  ;;  %1095 = vmatpush1.msra.mxu0 %v416_v38  ;;  %v509_v9 = vld [vmem:[#allocation5 + $0xc18] sm:$0xff]  ;;  %v508_v11 = vld [vmem:[#allocation5 + $0xc10] sm:$0xff] }
 0x12d   :  { %1166 = vmatpush1.msra.mxu1 %v544_v39  ;;  %1096 = vmatprep.subr.mxu0 %v413_v40  ;;  %v505_v12 = vld [vmem:[#allocation5 + $0xbf8] sm:$0xff]  ;;  %v504_v14 = vld [vmem:[#allocation5 + $0xbf0] sm:$0xff] }
 0x12e   :  { %1167 = vmatprep.subr.mxu1 %v541_v41  ;;  %1097 = vmatpush1.msra.mxu0 %v412_v42  ;;  %v633_v13 = vld [vmem:[#allocation5 + $0xff8] sm:$0xff]  ;;  %v632_v15 = vld [vmem:[#allocation5 + $0xff0] sm:$0xff] }
 0x12f   :  { %1168 = vmatpush1.msra.mxu1 %v540_v43  ;;  %1098 = vmatprep.subr.mxu0 %v409_v44  ;;  %v501_v16 = vld [vmem:[#allocation5 + $0xbd8] sm:$0xff]  ;;  %v500_v18 = vld [vmem:[#allocation5 + $0xbd0] sm:$0xff] }
 0x130   :  { %1169 = vmatprep.subr.mxu1 %v537_v45  ;;  %1099 = vmatpush1.msra.mxu0 %v408_v46  ;;  %v629_v17 = vld [vmem:[#allocation5 + $0xfd8] sm:$0xff]  ;;  %v628_v19 = vld [vmem:[#allocation5 + $0xfd0] sm:$0xff] }
 0x131   :  { %1170 = vmatpush1.msra.mxu1 %v536_v47  ;;  %1100 = vmatprep.subr.mxu0 %v405_v48  ;;  %v497_v20 = vld [vmem:[#allocation5 + $0xbb8] sm:$0xff]  ;;  %v496_v22 = vld [vmem:[#allocation5 + $0xbb0] sm:$0xff] }
 0x132   :  { %1171 = vmatprep.subr.mxu1 %v533_v49  ;;  %1101 = vmatpush1.msra.mxu0 %v404_v50  ;;  %v625_v21 = vld [vmem:[#allocation5 + $0xfb8] sm:$0xff]  ;;  %v624_v23 = vld [vmem:[#allocation5 + $0xfb0] sm:$0xff] }
 0x133   :  { %1172 = vmatpush1.msra.mxu1 %v532_v51  ;;  %1102 = vmatprep.subr.mxu0 %v401_v52  ;;  %v493_v24 = vld [vmem:[#allocation5 + $0xb98] sm:$0xff]  ;;  %v492_v26 = vld [vmem:[#allocation5 + $0xb90] sm:$0xff] }
 0x134   :  { %1173 = vmatprep.subr.mxu1 %v529_v53  ;;  %1103 = vmatpush1.msra.mxu0 %v400_v54  ;;  %v621_v25 = vld [vmem:[#allocation5 + $0xf98] sm:$0xff]  ;;  %v620_v27 = vld [vmem:[#allocation5 + $0xf90] sm:$0xff] }
 0x135   :  { %1174 = vmatpush1.msra.mxu1 %v528_v55  ;;  %1104 = vmatprep.subr.mxu0 %v397_v56  ;;  %v489_v28 = vld [vmem:[#allocation5 + $0xb78] sm:$0xff]  ;;  %v488_v30 = vld [vmem:[#allocation5 + $0xb70] sm:$0xff] }
 0x136   :  { %1175 = vmatprep.subr.mxu1 %v525_v57  ;;  %1105 = vmatpush1.msra.mxu0 %v396_v58  ;;  %v617_v29 = vld [vmem:[#allocation5 + $0xf78] sm:$0xff]  ;;  %v616_v31 = vld [vmem:[#allocation5 + $0xf70] sm:$0xff] }
 0x137   :  { %1176 = vmatpush1.msra.mxu1 %v524_v59  ;;  %1106 = vmatprep.subr.mxu0 %v393_v60  ;;  %v485_v32 = vld [vmem:[#allocation5 + $0xb58] sm:$0xff]  ;;  %v484_v34 = vld [vmem:[#allocation5 + $0xb50] sm:$0xff] }
 0x138   :  { %1177 = vmatprep.subr.mxu1 %v521_v61  ;;  %1107 = vmatpush1.msra.mxu0 %v392_v62  ;;  %v613_v33 = vld [vmem:[#allocation5 + $0xf58] sm:$0xff]  ;;  %v612_v35 = vld [vmem:[#allocation5 + $0xf50] sm:$0xff] }
 0x139   :  { %1178 = vmatpush1.msra.mxu1 %v520_v63  ;;  %1108 = vmatprep.subr.mxu0 %v389_v0  ;;  %v481_v36 = vld [vmem:[#allocation5 + $0xb38] sm:$0xff]  ;;  %v480_v38 = vld [vmem:[#allocation5 + $0xb30] sm:$0xff] }
 0x13a   :  { %1179 = vmatprep.subr.mxu1 %v517_v1  ;;  %1109 = vmatpush1.msra.mxu0 %v388_v2  ;;  %v609_v37 = vld [vmem:[#allocation5 + $0xf38] sm:$0xff]  ;;  %v608_v39 = vld [vmem:[#allocation5 + $0xf30] sm:$0xff] }
 0x13b   :  { %1180 = vmatpush1.msra.mxu1 %v516_v3  ;;  %1110 = vmatprep.subr.mxu0 %v385_v4  ;;  %v477_v40 = vld [vmem:[#allocation5 + $0xb18] sm:$0xff]  ;;  %v476_v42 = vld [vmem:[#allocation5 + $0xb10] sm:$0xff] }
 0x13c   :  { %1181 = vmatprep.subr.mxu1 %v513_v5  ;;  %1111 = vmatpush1.msra.mxu0 %v384_v6  ;;  %v605_v41 = vld [vmem:[#allocation5 + $0xf18] sm:$0xff]  ;;  %v604_v43 = vld [vmem:[#allocation5 + $0xf10] sm:$0xff] }
 0x13d   :  { %1182 = vmatpush1.msra.mxu1 %v512_v7  ;;  %1112 = vmatprep.subr.mxu0 %v381_v8  ;;  %v473_v44 = vld [vmem:[#allocation5 + $0xaf8] sm:$0xff]  ;;  %v472_v46 = vld [vmem:[#allocation5 + $0xaf0] sm:$0xff] }
 0x13e   :  { %1183 = vmatprep.subr.mxu1 %v509_v9  ;;  %1113 = vmatpush1.msra.mxu0 %v380_v10  ;;  %v601_v45 = vld [vmem:[#allocation5 + $0xef8] sm:$0xff]  ;;  %v600_v47 = vld [vmem:[#allocation5 + $0xef0] sm:$0xff] }
 0x13f   :  { %1184 = vmatpush1.msra.mxu1 %v508_v11  ;;  %1114 = vmatprep.subr.mxu0 %v505_v12  ;;  %v469_v48 = vld [vmem:[#allocation5 + $0xad8] sm:$0xff]  ;;  %v468_v50 = vld [vmem:[#allocation5 + $0xad0] sm:$0xff]  ;;  %v1694_v12 = vld [vmem:[#allocation2 + $0x28] sm:$0xff] }
 0x140   :  { %1185 = vmatprep.subr.mxu1 %v633_v13  ;;  %1115 = vmatpush2.msra.mxu0 %v504_v14  ;;  %v597_v49 = vld [vmem:[#allocation5 + $0xed8] sm:$0xff]  ;;  %v596_v51 = vld [vmem:[#allocation5 + $0xed0] sm:$0xff] }
 0x141   :  { %1186 = vmatpush2.msra.mxu1 %v632_v15  ;;  %1116 = vmatprep.subr.mxu0 %v501_v16  ;;  %v465_v52 = vld [vmem:[#allocation5 + $0xab8] sm:$0xff]  ;;  %v464_v54 = vld [vmem:[#allocation5 + $0xab0] sm:$0xff]  ;;  %v1696_v16 = vld [vmem:[#allocation2 + $0x20] sm:$0xff] }
 0x142   :  { %1187 = vmatprep.subr.mxu1 %v629_v17  ;;  %1117 = vmatpush2.msra.mxu0 %v500_v18  ;;  %v593_v53 = vld [vmem:[#allocation5 + $0xeb8] sm:$0xff]  ;;  %v592_v55 = vld [vmem:[#allocation5 + $0xeb0] sm:$0xff] }
 0x143   :  { %1188 = vmatpush2.msra.mxu1 %v628_v19  ;;  %1118 = vmatprep.subr.mxu0 %v497_v20  ;;  %v461_v56 = vld [vmem:[#allocation5 + $0xa98] sm:$0xff]  ;;  %v460_v58 = vld [vmem:[#allocation5 + $0xa90] sm:$0xff]  ;;  %v1256_v19 = vld [vmem:[#allocation8 + $0xe0] sm:$0xff] }
 0x144   :  { %1189 = vmatprep.subr.mxu1 %v625_v21  ;;  %1119 = vmatpush2.msra.mxu0 %v496_v22  ;;  %v589_v57 = vld [vmem:[#allocation5 + $0xe98] sm:$0xff]  ;;  %v588_v59 = vld [vmem:[#allocation5 + $0xe90] sm:$0xff] }
 0x145   :  { %1190 = vmatpush2.msra.mxu1 %v624_v23  ;;  %1120 = vmatprep.subr.mxu0 %v493_v24  ;;  %v457_v60 = vld [vmem:[#allocation5 + $0xa78] sm:$0xff]  ;;  %v456_v62 = vld [vmem:[#allocation5 + $0xa70] sm:$0xff] }
 0x146   :  { %1191 = vmatprep.subr.mxu1 %v621_v25  ;;  %1121 = vmatpush2.msra.mxu0 %v492_v26  ;;  %v585_v61 = vld [vmem:[#allocation5 + $0xe78] sm:$0xff]  ;;  %v584_v63 = vld [vmem:[#allocation5 + $0xe70] sm:$0xff]  ;;  %v1320_v25 = vld [vmem:[#allocation8 + $0x2e0] sm:$0xff] }
 0x147   :  { %1192 = vmatpush2.msra.mxu1 %v620_v27  ;;  %1122 = vmatprep.subr.mxu0 %v489_v28  ;;  %v453_v0 = vld [vmem:[#allocation5 + $0xa58] sm:$0xff]  ;;  %v452_v2 = vld [vmem:[#allocation5 + $0xa50] sm:$0xff]  ;;  %v1252_v28 = vld [vmem:[#allocation8 + $0xc0] sm:$0xff] }
 0x148   :  { %1193 = vmatprep.subr.mxu1 %v617_v29  ;;  %1123 = vmatpush2.msra.mxu0 %v488_v30  ;;  %v581_v1 = vld [vmem:[#allocation5 + $0xe58] sm:$0xff]  ;;  %v580_v3 = vld [vmem:[#allocation5 + $0xe50] sm:$0xff] }
 0x149   :  { %1194 = vmatpush2.msra.mxu1 %v616_v31  ;;  %1124 = vmatprep.subr.mxu0 %v485_v32  ;;  %v449_v4 = vld [vmem:[#allocation5 + $0xa38] sm:$0xff]  ;;  %v448_v6 = vld [vmem:[#allocation5 + $0xa30] sm:$0xff] }
 0x14a   :  { %1195 = vmatprep.subr.mxu1 %v613_v33  ;;  %1125 = vmatpush2.msra.mxu0 %v484_v34  ;;  %v577_v5 = vld [vmem:[#allocation5 + $0xe38] sm:$0xff]  ;;  %v576_v7 = vld [vmem:[#allocation5 + $0xe30] sm:$0xff]  ;;  %v1316_v33 = vld [vmem:[#allocation8 + $0x2c0] sm:$0xff] }
 0x14b   :  { %1196 = vmatpush2.msra.mxu1 %v612_v35  ;;  %1126 = vmatprep.subr.mxu0 %v481_v36  ;;  %v445_v8 = vld [vmem:[#allocation5 + $0xa18] sm:$0xff]  ;;  %v444_v10 = vld [vmem:[#allocation5 + $0xa10] sm:$0xff]  ;;  %v1248_v36 = vld [vmem:[#allocation8 + $0xa0] sm:$0xff] }
 0x14c   :  { %1197 = vmatprep.subr.mxu1 %v609_v37  ;;  %1127 = vmatpush2.msra.mxu0 %v480_v38  ;;  %v573_v9 = vld [vmem:[#allocation5 + $0xe18] sm:$0xff]  ;;  %v572_v11 = vld [vmem:[#allocation5 + $0xe10] sm:$0xff] }
 0x14d   :  { %1198 = vmatpush2.msra.mxu1 %v608_v39  ;;  %1128 = vmatprep.subr.mxu0 %v477_v40  ;;  %v1259_v13 = vld [vmem:[#allocation8 + $0xf8] sm:$0xff]  ;;  %v1258_v15 = vld [vmem:[#allocation8 + $0xf0] sm:$0xff]  ;;  %v1257_v18 = vld [vmem:[#allocation8 + $0xe8] sm:$0xff] }
 0x14e   :  { %1199 = vmatprep.subr.mxu1 %v605_v41  ;;  %1129 = vmatpush2.msra.mxu0 %v476_v42  ;;  %v1695_v14 = vld [vmem:[#allocation2 + $0x38] sm:$0xff]  ;;  %v1697_v17 = vld [vmem:[#allocation2 + $0x30] sm:$0xff]  ;;  %v1312_v41 = vld [vmem:[#allocation8 + $0x2a0] sm:$0xff] }
 0x14f   :  { %1200 = vmatpush2.msra.mxu1 %v604_v43  ;;  %1130 = vmatprep.subr.mxu0 %v473_v44  ;;  %v1255_v20 = vld [vmem:[#allocation8 + $0xd8] sm:$0xff]  ;;  %v1322_v22 = vld [vmem:[#allocation8 + $0x2f0] sm:$0xff]  ;;  %v1321_v23 = vld [vmem:[#allocation8 + $0x2e8] sm:$0xff] }
 0x150   :  { %1201 = vmatprep.subr.mxu1 %v601_v45  ;;  %1131 = vmatpush2.msra.mxu0 %v472_v46  ;;  %v1323_v21 = vld [vmem:[#allocation8 + $0x2f8] sm:$0xff]  ;;  %v1254_v24 = vld [vmem:[#allocation8 + $0xd0] sm:$0xff]  ;;  %v1253_v26 = vld [vmem:[#allocation8 + $0xc8] sm:$0xff] }
 0x151   :  { %1202 = vmatpush2.msra.mxu1 %v600_v47  ;;  %1132 = vmatprep.subr.mxu0 %v469_v48  ;;  %v1319_v27 = vld [vmem:[#allocation8 + $0x2d8] sm:$0xff]  ;;  %v1318_v29 = vld [vmem:[#allocation8 + $0x2d0] sm:$0xff]  ;;  %v1317_v31 = vld [vmem:[#allocation8 + $0x2c8] sm:$0xff] }
 0x152   :  { %1203 = vmatprep.subr.mxu1 %v597_v49  ;;  %1133 = vmatpush2.msra.mxu0 %v468_v50  ;;  %v1251_v30 = vld [vmem:[#allocation8 + $0xb8] sm:$0xff]  ;;  %v1250_v32 = vld [vmem:[#allocation8 + $0xb0] sm:$0xff]  ;;  %v1249_v34 = vld [vmem:[#allocation8 + $0xa8] sm:$0xff] }
 0x153   :  { %1204 = vmatpush2.msra.mxu1 %v596_v51  ;;  %1134 = vmatprep.subr.mxu0 %v465_v52  ;;  %v1315_v35 = vld [vmem:[#allocation8 + $0x2b8] sm:$0xff]  ;;  %v1314_v37 = vld [vmem:[#allocation8 + $0x2b0] sm:$0xff]  ;;  %v1313_v39 = vld [vmem:[#allocation8 + $0x2a8] sm:$0xff] }
 0x154   :  { %1205 = vmatprep.subr.mxu1 %v593_v53  ;;  %1135 = vmatpush2.msra.mxu0 %v464_v54  ;;  %v1247_v38 = vld [vmem:[#allocation8 + $0x98] sm:$0xff]  ;;  %v1246_v40 = vld [vmem:[#allocation8 + $0x90] sm:$0xff]  ;;  %v1245_v42 = vld [vmem:[#allocation8 + $0x88] sm:$0xff] }
 0x155   :  { %1206 = vmatpush2.msra.mxu1 %v592_v55  ;;  %1136 = vmatprep.subr.mxu0 %v461_v56  ;;  %v1311_v43 = vld [vmem:[#allocation8 + $0x298] sm:$0xff]  ;;  %v1244_v44 = vld [vmem:[#allocation8 + $0x80] sm:$0xff]  ;;  %v1310_v45 = vld [vmem:[#allocation8 + $0x290] sm:$0xff] }
 0x156   :  { %1207 = vmatprep.subr.mxu1 %v589_v57  ;;  %1137 = vmatpush2.msra.mxu0 %v460_v58  ;;  %v1243_v46 = vld [vmem:[#allocation8 + $0x78] sm:$0xff]  ;;  %v1309_v47 = vld [vmem:[#allocation8 + $0x288] sm:$0xff]  ;;  %v1242_v48 = vld [vmem:[#allocation8 + $0x70] sm:$0xff] }
 0x157   :  { %1208 = vmatpush2.msra.mxu1 %v588_v59  ;;  %1138 = vmatprep.subr.mxu0 %v457_v60  ;;  %v1308_v49 = vld [vmem:[#allocation8 + $0x280] sm:$0xff]  ;;  %v1241_v50 = vld [vmem:[#allocation8 + $0x68] sm:$0xff]  ;;  %v1307_v51 = vld [vmem:[#allocation8 + $0x278] sm:$0xff] }
 0x158   :  { %1209 = vmatprep.subr.mxu1 %v585_v61  ;;  %1139 = vmatpush2.msra.mxu0 %v456_v62  ;;  %v1240_v52 = vld [vmem:[#allocation8 + $0x60] sm:$0xff]  ;;  %v1306_v53 = vld [vmem:[#allocation8 + $0x270] sm:$0xff]  ;;  %v1239_v54 = vld [vmem:[#allocation8 + $0x58] sm:$0xff] }
 0x159   :  { %1210 = vmatpush2.msra.mxu1 %v584_v63  ;;  %1140 = vmatprep.subr.mxu0 %v453_v0  ;;  %v1305_v55 = vld [vmem:[#allocation8 + $0x268] sm:$0xff]  ;;  %v1238_v56 = vld [vmem:[#allocation8 + $0x50] sm:$0xff]  ;;  %v1304_v57 = vld [vmem:[#allocation8 + $0x260] sm:$0xff] }
 0x15a   :  { %1211 = vmatprep.subr.mxu1 %v581_v1  ;;  %1141 = vmatpush2.msra.mxu0 %v452_v2  ;;  %v1237_v58 = vld [vmem:[#allocation8 + $0x48] sm:$0xff]  ;;  %v1303_v59 = vld [vmem:[#allocation8 + $0x258] sm:$0xff]  ;;  %v1236_v60 = vld [vmem:[#allocation8 + $0x40] sm:$0xff] }
 0x15b   :  { %1212 = vmatpush2.msra.mxu1 %v580_v3  ;;  %1142 = vmatprep.subr.mxu0 %v449_v4  ;;  %v1302_v61 = vld [vmem:[#allocation8 + $0x250] sm:$0xff]  ;;  %v1235_v62 = vld [vmem:[#allocation8 + $0x38] sm:$0xff]  ;;  %v1301_v63 = vld [vmem:[#allocation8 + $0x248] sm:$0xff] }
 0x15c   :  { %1213 = vmatprep.subr.mxu1 %v577_v5  ;;  %1143 = vmatpush2.msra.mxu0 %v448_v6  ;;  %v1234_v0 = vld [vmem:[#allocation8 + $0x30] sm:$0xff]  ;;  %v1300_v1 = vld [vmem:[#allocation8 + $0x240] sm:$0xff]  ;;  %v1233_v2 = vld [vmem:[#allocation8 + $0x28] sm:$0xff] }
 0x15d   :  { %1214 = vmatpush2.msra.mxu1 %v576_v7  ;;  %1144 = vmatprep.subr.mxu0 %v445_v8  ;;  %v1299_v3 = vld [vmem:[#allocation8 + $0x238] sm:$0xff]  ;;  %v1232_v4 = vld [vmem:[#allocation8 + $0x20] sm:$0xff]  ;;  %v1298_v5 = vld [vmem:[#allocation8 + $0x230] sm:$0xff] }
 0x15e   :  { %1215 = vmatprep.subr.mxu1 %v573_v9  ;;  %1145 = vmatpush2.msra.mxu0 %v444_v10  ;;  %v1231_v6 = vld [vmem:[#allocation8 + $0x18] sm:$0xff]  ;;  %v1297_v7 = vld [vmem:[#allocation8 + $0x228] sm:$0xff]  ;;  %v1230_v8 = vld [vmem:[#allocation8 + $0x10] sm:$0xff] }
 0x15f   :  { %1146 = vmatprep.mubr.f32.mxu0 %v1694_v12  ;;  %1216 = vmatpush2.msra.mxu1 %v572_v11  ;;  %v1296_v9 = vld [vmem:[#allocation8 + $0x220] sm:$0xff]  ;;  %v1229_v10 = vld [vmem:[#allocation8 + $0x8] sm:$0xff]  ;;  %v1295_v11 = vld [vmem:[#allocation8 + $0x218] sm:$0xff] }
 0x160   :  { %1217 = vmatprep.mubr.f32.mxu1 %v1695_v14  ;;  %1147 = vmatmul.mubr.f32.vlgmr.msra.gmra.mxu0 %v1696_v16  ;;  %v1228_v12 = vld [vmem:[#allocation8] sm:$0xff]  ;;  %v1291_v14 = vld [vmem:[#allocation8 + $0x1f8] sm:$0xff]  ;;  %v1290_v16 = vld [vmem:[#allocation8 + $0x1f0] sm:$0xff] }
 0x161   :  { %1218 = vmatmul.mubr.f32.vlgmr.msra.gmra.mxu1 %v1697_v17  ;;  %1368 = vmatprep.subr.mxu0 %v1259_v13  ;;  %v1294_v13 = vld [vmem:[#allocation8 + $0x210] sm:$0xff]  ;;  %v1292_v17 = vld [vmem:[#allocation8 + $0x200] sm:$0xff] }
 0x162   :  { %1369 = vmatpush1.msra.mxu0 %v1258_v15  ;;  %1439 = vmatprep.subr.mxu1 %v1323_v21  ;;  %v1293_v15 = vld [vmem:[#allocation8 + $0x208] sm:$0xff]  ;;  %v1354_v21 = vld [vmem:[#allocation8 + $0x3f0] sm:$0xff] }
 0x163   :  { %1370 = vmatprep.subr.mxu0 %v1257_v18  ;;  %1440 = vmatpush1.msra.mxu1 %v1322_v22  ;;  %v1289_v18 = vld [vmem:[#allocation8 + $0x1e8] sm:$0xff]  ;;  %v1287_v22 = vld [vmem:[#allocation8 + $0x1d8] sm:$0xff] }
 0x164   :  { %1371 = vmatpush1.msra.mxu0 %v1256_v19  ;;  %1441 = vmatprep.subr.mxu1 %v1321_v23  ;;  %v1355_v19 = vld [vmem:[#allocation8 + $0x3f8] sm:$0xff]  ;;  %v1353_v23 = vld [vmem:[#allocation8 + $0x3e8] sm:$0xff] }
 0x165   :  { %1372 = vmatprep.subr.mxu0 %v1255_v20  ;;  %1442 = vmatpush1.msra.mxu1 %v1320_v25  ;;  %v1288_v20 = vld [vmem:[#allocation8 + $0x1e0] sm:$0xff] }
 0x166   :  { %1373 = vmatpush1.msra.mxu0 %v1254_v24  ;;  %1443 = vmatprep.subr.mxu1 %v1319_v27  ;;  %v1286_v24 = vld [vmem:[#allocation8 + $0x1d0] sm:$0xff]  ;;  %v1352_v25 = vld [vmem:[#allocation8 + $0x3e0] sm:$0xff]  ;;  %v1351_v27 = vld [vmem:[#allocation8 + $0x3d8] sm:$0xff] }
 0x167   :  { %1374 = vmatprep.subr.mxu0 %v1253_v26  ;;  %1444 = vmatpush1.msra.mxu1 %v1318_v29  ;;  %v1285_v26 = vld [vmem:[#allocation8 + $0x1c8] sm:$0xff]  ;;  %v1350_v29 = vld [vmem:[#allocation8 + $0x3d0] sm:$0xff] }
 0x168   :  { %1375 = vmatpush1.msra.mxu0 %v1252_v28  ;;  %1445 = vmatprep.subr.mxu1 %v1317_v31  ;;  %v1284_v28 = vld [vmem:[#allocation8 + $0x1c0] sm:$0xff]  ;;  %v1283_v31 = vld [vmem:[#allocation8 + $0x1b8] sm:$0xff] }
 0x169   :  { %1376 = vmatprep.subr.mxu0 %v1251_v30  ;;  %1446 = vmatpush1.msra.mxu1 %v1316_v33  ;;  %v636_v30 = vlaneseq  ;;  %v1282_v33 = vld [vmem:[#allocation8 + $0x1b0] sm:$0xff] }
 0x16a   :  { %1377 = vmatpush1.msra.mxu0 %v1250_v32  ;;  %1447 = vmatprep.subr.mxu1 %v1315_v35  ;;  %v1349_v32 = vld [vmem:[#allocation8 + $0x3c8] sm:$0xff] }
 0x16b   :  { %1378 = vmatprep.subr.mxu0 %v1249_v34  ;;  %1448 = vmatpush1.msra.mxu1 %v1314_v37  ;;  %v1348_v34 = vld [vmem:[#allocation8 + $0x3c0] sm:$0xff]  ;;  %v1281_v35 = vld [vmem:[#allocation8 + $0x1a8] sm:$0xff] }
 0x16c   :  { %1379 = vmatpush1.msra.mxu0 %v1248_v36  ;;  %1449 = vmatprep.subr.mxu1 %v1313_v39  ;;  %v1347_v36 = vld [vmem:[#allocation8 + $0x3b8] sm:$0xff]  ;;  %v1280_v37 = vld [vmem:[#allocation8 + $0x1a0] sm:$0xff]  ;;  %v1943_v39 = vshrl.u32 %v636_v30, 7 }
 0x16d   :  { %1380 = vmatprep.subr.mxu0 %v1247_v38  ;;  %1450 = vmatpush1.msra.mxu1 %v1312_v41  ;;  %v1346_v38 = vld [vmem:[#allocation8 + $0x3b0] sm:$0xff]  ;;  %v1345_v41 = vld [vmem:[#allocation8 + $0x3a8] sm:$0xff]  ;;  %v1332_v30 = vld [vmem:[#allocation8 + $0x340] sm:$0xff] }
 0x16e   :  { %1381 = vmatpush1.msra.mxu0 %v1246_v40  ;;  %1451 = vmatprep.subr.mxu1 %v1311_v43  ;;  %v1279_v40 = vld [vmem:[#allocation8 + $0x198] sm:$0xff]  ;;  %v1344_v43 = vld [vmem:[#allocation8 + $0x3a0] sm:$0xff] }
 0x16f   :  { %1382 = vmatprep.subr.mxu0 %v1245_v42  ;;  %1452 = vmatpush1.msra.mxu1 %v1310_v45  ;;  %v1278_v42 = vld [vmem:[#allocation8 + $0x190] sm:$0xff]  ;;  %v1343_v45 = vld [vmem:[#allocation8 + $0x398] sm:$0xff] }
 0x170   :  { %1383 = vmatpush1.msra.mxu0 %v1244_v44  ;;  %1453 = vmatprep.subr.mxu1 %v1309_v47  ;;  %v1277_v44 = vld [vmem:[#allocation8 + $0x188] sm:$0xff]  ;;  %v1342_v47 = vld [vmem:[#allocation8 + $0x390] sm:$0xff] }
 0x171   :  { %1384 = vmatprep.subr.mxu0 %v1243_v46  ;;  %1454 = vmatpush1.msra.mxu1 %v1308_v49  ;;  %v1276_v46 = vld [vmem:[#allocation8 + $0x180] sm:$0xff]  ;;  %v1275_v49 = vld [vmem:[#allocation8 + $0x178] sm:$0xff] }
 0x172   :  { %1385 = vmatpush1.msra.mxu0 %v1242_v48  ;;  %1455 = vmatprep.subr.mxu1 %v1307_v51  ;;  %v638_v48 = vsub.s32 0, %v1943_v39  ;;  %v1946_v51 = vld [vmem:[#allocation7] sm:$0xf] }
 0x173   :  { %1386 = vmatprep.subr.mxu0 %v1241_v50  ;;  %1456 = vmatpush1.msra.mxu1 %v1306_v53  ;;  %v1341_v50 = vld [vmem:[#allocation8 + $0x388] sm:$0xff]  ;;  %v1340_v53 = vld [vmem:[#allocation8 + $0x380] sm:$0xff] }
 0x174   :  { %1387 = vmatpush1.msra.mxu0 %v1240_v52  ;;  %1457 = vmatprep.subr.mxu1 %v1305_v55  ;;  %v1274_v52 = vld [vmem:[#allocation8 + $0x170] sm:$0xff]  ;;  %v1273_v55 = vld [vmem:[#allocation8 + $0x168] sm:$0xff] }
 0x175   :  { %1388 = vmatprep.subr.mxu0 %v1239_v54  ;;  %1458 = vmatpush1.msra.mxu1 %v1304_v57  ;;  %v642_v54 = vsub.s32 1, %v1943_v39  ;;  %v722_v57 = vpop.f32.mrf.mxu0 }
 0x176   :  { %1389 = vmatpush1.msra.mxu0 %v1238_v56  ;;  %1459 = vmatprep.subr.mxu1 %v1303_v59  ;;  %v1339_v56 = vld [vmem:[#allocation8 + $0x378] sm:$0xff]  ;;  %v1338_v59 = vld [vmem:[#allocation8 + $0x370] sm:$0xff] }
 0x177   :  { %1390 = vmatprep.subr.mxu0 %v1237_v58  ;;  %1460 = vmatpush1.msra.mxu1 %v1302_v61  ;;  %v1272_v58 = vld [vmem:[#allocation8 + $0x160] sm:$0xff]  ;;  %v1271_v61 = vld [vmem:[#allocation8 + $0x158] sm:$0xff] }
 0x178   :  { %1391 = vmatpush1.msra.mxu0 %v1236_v60  ;;  %1461 = vmatprep.subr.mxu1 %v1301_v63  ;;  %v639_v60 = vrot.slane %v1946_v51, %v638_v48  ;;  %v1270_v63 = vld [vmem:[#allocation8 + $0x150] sm:$0xff] }
 0x179   :  { %1392 = vmatprep.subr.mxu0 %v1235_v62  ;;  %1462 = vmatpush1.msra.mxu1 %v1300_v1  ;;  %v1337_v62 = vld [vmem:[#allocation8 + $0x368] sm:$0xff]  ;;  %v643_v1 = vrot.slane %v1946_v51, %v642_v54 }
 0x17a   :  { %1393 = vmatpush1.msra.mxu0 %v1234_v0  ;;  %1463 = vmatprep.subr.mxu1 %v1299_v3  ;;  %v1336_v0 = vld [vmem:[#allocation8 + $0x360] sm:$0xff]  ;;  %v1335_v3 = vld [vmem:[#allocation8 + $0x358] sm:$0xff] }
 0x17b   :  { %1394 = vmatprep.subr.mxu0 %v1233_v2  ;;  %1464 = vmatpush1.msra.mxu1 %v1298_v5  ;;  %v1269_v2 = vld [vmem:[#allocation8 + $0x148] sm:$0xff]  ;;  %v724_v5 = vpop.f32.mrf.mxu0 }
 0x17c   :  { %1395 = vmatpush1.msra.mxu0 %v1232_v4  ;;  %1465 = vmatprep.subr.mxu1 %v1297_v7  ;;  %v793_v4 = vpop.f32.mrf.mxu1  ;;  %v1334_v7 = vld [vmem:[#allocation8 + $0x350] sm:$0xff] }
 0x17d   :  { %1396 = vmatprep.subr.mxu0 %v1231_v6  ;;  %1466 = vmatpush1.msra.mxu1 %v1296_v9  ;;  %v1268_v6 = vld [vmem:[#allocation8 + $0x140] sm:$0xff]  ;;  %v1267_v9 = vld [vmem:[#allocation8 + $0x138] sm:$0xff] }
 0x17e   :  { %1397 = vmatpush1.msra.mxu0 %v1230_v8  ;;  %1467 = vmatprep.subr.mxu1 %v1295_v11  ;;  %v723_v8 = vadd.f32 %v722_v57, %v639_v60  ;;  %v725_v11 = vadd.f32 %v724_v5, %v643_v1  ;;  %v1537_v57 = vld [vmem:[#allocation11 + $0xc8] sm:$0xff]  ;;  %v1520_v60 = vld [vmem:[#allocation11 + $0x40] sm:$0xff]  ;;  %v646_v5 = vsub.s32 2, %v1943_v39 }
 0x17f   :  { %1398 = vmatprep.subr.mxu0 %v1229_v10  ;;  %1468 = vmatpush1.msra.mxu1 %v1294_v13  ;;  %v1266_v10 = vld [vmem:[#allocation8 + $0x130] sm:$0xff]  ;;  %v795_v13 = vpop.f32.mrf.mxu1 }
 0x180   :  { %1399 = vmatpush1.msra.mxu0 %v1228_v12  ;;  %1469 = vmatprep.subr.mxu1 %v1293_v15  ;;  %v1265_v12 = vld [vmem:[#allocation8 + $0x128] sm:$0xff]  ;;  %v794_v15 = vadd.f32 %v793_v4, %v723_v8  ;;  %v647_v8 = vrot.slane %v1946_v51, %v646_v5 }
 0x181   :  { %1400 = vmatprep.subr.mxu0 %v1291_v14  ;;  %1470 = vmatpush1.msra.mxu1 %v1292_v17  ;;  %v1264_v14 = vld [vmem:[#allocation8 + $0x120] sm:$0xff]  ;;  %v1533_v1 = vld [vmem:[#allocation11 + $0xa8] sm:$0xff] }
 0x182   :  { %1401 = vmatpush2.msra.mxu0 %v1290_v16  ;;  %1471 = vmatprep.subr.mxu1 %v1355_v19  ;;  %v1263_v16 = vld [vmem:[#allocation8 + $0x118] sm:$0xff]  ;;  %v796_v19 = vadd.f32 %v795_v13, %v725_v11  ;;  %v1516_v4 = vld [vmem:[#allocation11 + $0x20] sm:$0xff] }
 0x183   :  { %1402 = vmatprep.subr.mxu0 %v1289_v18  ;;  %1472 = vmatpush2.msra.mxu1 %v1354_v21  ;;  %v1262_v18 = vld [vmem:[#allocation8 + $0x110] sm:$0xff]  ;;  %v1261_v21 = vld [vmem:[#allocation8 + $0x108] sm:$0xff] }
 0x184   :  { %1403 = vmatpush2.msra.mxu0 %v1288_v20  ;;  %1473 = vmatprep.subr.mxu1 %v1353_v23 }
 0x185   :  { %1404 = vmatprep.subr.mxu0 %v1287_v22  ;;  %1474 = vmatpush2.msra.mxu1 %v1352_v25 }
 0x186   :  { %1405 = vmatpush2.msra.mxu0 %v1286_v24  ;;  %1475 = vmatprep.subr.mxu1 %v1351_v27  ;;  %v1260_v24 = vld [vmem:[#allocation8 + $0x100] sm:$0xff] }
 0x187   :  { %1406 = vmatprep.subr.mxu0 %v1285_v26  ;;  %1476 = vmatpush2.msra.mxu1 %v1350_v29 }
 0x188   :  { %1407 = vmatpush2.msra.mxu0 %v1284_v28  ;;  %1477 = vmatprep.subr.mxu1 %v1349_v32  ;;  %v1333_v28 = vld [vmem:[#allocation8 + $0x348] sm:$0xff] }
 0x189   :  { %1408 = vmatprep.subr.mxu0 %v1283_v31  ;;  %1478 = vmatpush2.msra.mxu1 %v1348_v34  ;;  %v1331_v31 = vld [vmem:[#allocation8 + $0x338] sm:$0xff] }
 0x18a   :  { %1409 = vmatpush2.msra.mxu0 %v1282_v33  ;;  %1479 = vmatprep.subr.mxu1 %v1347_v36  ;;  %v1330_v33 = vld [vmem:[#allocation8 + $0x330] sm:$0xff]  ;;  %v1328_v36 = vld [vmem:[#allocation8 + $0x320] sm:$0xff] }
 0x18b   :  { %1410 = vmatprep.subr.mxu0 %v1281_v35  ;;  %1480 = vmatpush2.msra.mxu1 %v1346_v38  ;;  %v1329_v35 = vld [vmem:[#allocation8 + $0x328] sm:$0xff]  ;;  %v1326_v38 = vld [vmem:[#allocation8 + $0x310] sm:$0xff] }
 0x18c   :  { %1411 = vmatpush2.msra.mxu0 %v1280_v37  ;;  %1481 = vmatprep.subr.mxu1 %v1345_v41  ;;  %v1327_v37 = vld [vmem:[#allocation8 + $0x318] sm:$0xff]  ;;  %v1324_v41 = vld [vmem:[#allocation8 + $0x300] sm:$0xff] }
 0x18d   :  { %1412 = vmatprep.subr.mxu0 %v1279_v40  ;;  %1482 = vmatpush2.msra.mxu1 %v1344_v43  ;;  %v1325_v40 = vld [vmem:[#allocation8 + $0x308] sm:$0xff]  ;;  %v1527_v43 = vld [vmem:[#allocation11 + $0x78] sm:$0xff] }
 0x18e   :  { %1413 = vmatpush2.msra.mxu0 %v1278_v42  ;;  %1483 = vmatprep.subr.mxu1 %v1343_v45  ;;  %v1543_v42 = vld [vmem:[#allocation11 + $0xf8] sm:$0xff]  ;;  %v1526_v45 = vld [vmem:[#allocation11 + $0x70] sm:$0xff] }
 0x18f   :  { %1414 = vmatprep.subr.mxu0 %v1277_v44  ;;  %1484 = vmatpush2.msra.mxu1 %v1342_v47  ;;  %v1542_v44 = vld [vmem:[#allocation11 + $0xf0] sm:$0xff]  ;;  %v1525_v47 = vld [vmem:[#allocation11 + $0x68] sm:$0xff] }
 0x190   :  { %1415 = vmatpush2.msra.mxu0 %v1276_v46  ;;  %1485 = vmatprep.subr.mxu1 %v1341_v50  ;;  %v1541_v46 = vld [vmem:[#allocation11 + $0xe8] sm:$0xff]  ;;  %v1524_v50 = vld [vmem:[#allocation11 + $0x60] sm:$0xff] }
 0x191   :  { %1416 = vmatprep.subr.mxu0 %v1275_v49  ;;  %1486 = vmatpush2.msra.mxu1 %v1340_v53  ;;  %v1540_v49 = vld [vmem:[#allocation11 + $0xe0] sm:$0xff]  ;;  %v1523_v53 = vld [vmem:[#allocation11 + $0x58] sm:$0xff] }
 0x192   :  { %1417 = vmatpush2.msra.mxu0 %v1274_v52  ;;  %1487 = vmatprep.subr.mxu1 %v1339_v56  ;;  %v1539_v52 = vld [vmem:[#allocation11 + $0xd8] sm:$0xff]  ;;  %v1522_v56 = vld [vmem:[#allocation11 + $0x50] sm:$0xff] }
 0x193   :  { %1418 = vmatprep.subr.mxu0 %v1273_v55  ;;  %1488 = vmatpush2.msra.mxu1 %v1338_v59  ;;  %v1538_v55 = vld [vmem:[#allocation11 + $0xd0] sm:$0xff]  ;;  %v1536_v59 = vld [vmem:[#allocation11 + $0xc0] sm:$0xff] }
 0x194   :  { %1419 = vmatpush2.msra.mxu0 %v1272_v58  ;;  %1489 = vmatprep.subr.mxu1 %v1337_v62  ;;  %v1521_v58 = vld [vmem:[#allocation11 + $0x48] sm:$0xff]  ;;  %v1519_v62 = vld [vmem:[#allocation11 + $0x38] sm:$0xff] }
 0x195   :  { %1420 = vmatprep.subr.mxu0 %v1271_v61  ;;  %1490 = vmatpush2.msra.mxu1 %v1336_v0  ;;  %v1535_v61 = vld [vmem:[#allocation11 + $0xb8] sm:$0xff]  ;;  %v1518_v0 = vld [vmem:[#allocation11 + $0x30] sm:$0xff] }
 0x196   :  { %1421 = vmatpush2.msra.mxu0 %v1270_v63  ;;  %1491 = vmatprep.subr.mxu1 %v1335_v3  ;;  %v1534_v63 = vld [vmem:[#allocation11 + $0xb0] sm:$0xff]  ;;  %v1532_v3 = vld [vmem:[#allocation11 + $0xa0] sm:$0xff] }
 0x197   :  { %1422 = vmatprep.subr.mxu0 %v1269_v2  ;;  %1492 = vmatpush2.msra.mxu1 %v1334_v7  ;;  %v1517_v2 = vld [vmem:[#allocation11 + $0x28] sm:$0xff] }
 0x198   :  { %1423 = vmatpush2.msra.mxu0 %v1268_v6  ;;  %1493 = vmatprep.subr.mxu1 %v1333_v28  ;;  %v650_v6 = vsub.s32 3, %v1943_v39  ;;  %v1530_v28 = vld [vmem:[#allocation11 + $0x90] sm:$0xff] }
 0x199   :  { %1424 = vmatprep.subr.mxu0 %v1267_v9  ;;  %1494 = vmatpush2.msra.mxu1 %v1332_v30  ;;  %v1529_v30 = vld [vmem:[#allocation11 + $0x88] sm:$0xff] }
 0x19a   :  { %1425 = vmatpush2.msra.mxu0 %v1266_v10  ;;  %1495 = vmatprep.subr.mxu1 %v1331_v31  ;;  %v651_v9 = vrot.slane %v1946_v51, %v650_v6  ;;  %v1531_v51 = vld [vmem:[#allocation11 + $0x98] sm:$0xff]  ;;  %v1513_v31 = vld [vmem:[#allocation11 + $0x8] sm:$0xff] }
 0x19b   :  { %1426 = vmatprep.subr.mxu0 %v1265_v12  ;;  %1496 = vmatpush2.msra.mxu1 %v1330_v33  ;;  %v1512_v33 = vld [vmem:[#allocation11] sm:$0xff] }
 0x19c   :  { %v864_v17 = vpop.f32.mrf.mxu0  ;;  %1427 = vmatpush2.msra.mxu0 %v1264_v14  ;;  %1497 = vmatprep.subr.mxu1 %v1329_v35 }
 0x19d   :  { %v865_v20 = vadd.f32 %v864_v17, %v794_v15  ;;  %1428 = vmatprep.subr.mxu0 %v1263_v16  ;;  %1498 = vmatpush2.msra.mxu1 %v1328_v36 }
 0x19e   :  { %v935_v22 = vpop.f32.mrf.mxu1  ;;  %v866_v23 = vpop.f32.mrf.mxu0  ;;  %1429 = vmatpush2.msra.mxu0 %v1262_v18  ;;  %1499 = vmatprep.subr.mxu1 %v1327_v37 }
 0x19f   :  { %v867_v25 = vadd.f32 %v866_v23, %v796_v19  ;;  %v936_v26 = vadd.f32 %v935_v22, %v865_v20  ;;  %1430 = vmatprep.subr.mxu0 %v1261_v21  ;;  %1500 = vmatpush2.msra.mxu1 %v1326_v38 }
 0x1a0   :  { %v937_v27 = vpop.f32.mrf.mxu1  ;;  %1431 = vmatpush2.msra.mxu0 %v1260_v24  ;;  %1501 = vmatprep.subr.mxu1 %v1325_v40 }
 0x1a1   :  { %v938_v29 = vadd.f32 %v937_v27, %v867_v25  ;;  %v1224_v34 = vmax.f32 %v936_v26, 0.0  ;;  %1502 = vmatpush2.msra.mxu1 %v1324_v41  ;;  %1641 = vmatprep.subr.mxu0 %v1543_v42  ;;  %v1515_v27 = vld [vmem:[#allocation11 + $0x18] sm:$0xff] }
 0x1a3   :  { %v1225_v32 = vmax.f32 %v938_v29, 0.0  ;;  %v1514_v29 = vld [vmem:[#allocation11 + $0x10] sm:$0xff] }
 0x1a5   :  { %1432 = vmatprep.mubr.f32.mxu0 %v1225_v32  ;;  %v1528_v32 = vld [vmem:[#allocation11 + $0x80] sm:$0xff] }
 0x1a6   :  { %1433 = vmatmul.mubr.f32.vlgmr.msra.gmra.mxu0 %v1224_v34  ;;  %v1356_v34 = vld [vmem:[#allocation10] sm:$0x3] }
 0x1a7   :  { %1642 = vmatpush3.msra.mxu0 %v1527_v43  ;;  %v1361_v36 = vrot.slane %v1356_v34, %v638_v48  ;;  %v1365_v37 = vrot.slane %v1356_v34, %v642_v54 }
 0x1a8   :  { %1643 = vmatprep.subr.mxu0 %v1542_v44 }
 0x1a9   :  { %1644 = vmatpush3.msra.mxu0 %v1526_v45 }
 0x1aa   :  { %1645 = vmatprep.subr.mxu0 %v1541_v46 }
 0x1ab   :  { %1646 = vmatpush3.msra.mxu0 %v1525_v47 }
 0x1ac   :  { %1647 = vmatprep.subr.mxu0 %v1540_v49 }
 0x1ad   :  { %1648 = vmatpush3.msra.mxu0 %v1524_v50  ;;  %v1640_v50 = vld [vmem:[#allocation13] ss:$0 sm:$0xff] }
 0x1ae   :  { %1649 = vmatprep.subr.mxu0 %v1539_v52 }
 0x1af   :  { %1650 = vmatpush3.msra.mxu0 %v1523_v53 }
 0x1b0   :  { %1651 = vmatprep.subr.mxu0 %v1538_v55 }
 0x1b1   :  { %1652 = vmatpush3.msra.mxu0 %v1522_v56 }
 0x1b2   :  { %1653 = vmatprep.subr.mxu0 %v1537_v57 }
 0x1b3   :  { %1654 = vmatpush3.msra.mxu0 %v1521_v58 }
 0x1b4   :  { %1655 = vmatprep.subr.mxu0 %v1536_v59 }
 0x1b5   :  { %1656 = vmatpush3.msra.mxu0 %v1520_v60 }
 0x1b6   :  { %1657 = vmatprep.subr.mxu0 %v1535_v61 }
 0x1b7   :  { %1658 = vmatpush3.msra.mxu0 %v1519_v62 }
 0x1b8   :  { %1659 = vmatprep.subr.mxu0 %v1534_v63 }
 0x1b9   :  { %1660 = vmatpush3.msra.mxu0 %v1518_v0 }
 0x1ba   :  { %1661 = vmatprep.subr.mxu0 %v1533_v1 }
 0x1bb   :  { %1662 = vmatpush3.msra.mxu0 %v1517_v2 }
 0x1bc   :  { %1663 = vmatprep.subr.mxu0 %v1532_v3 }
 0x1bd   :  { %1664 = vmatpush3.msra.mxu0 %v1516_v4 }
 0x1be   :  { %1665 = vmatprep.subr.mxu0 %v1531_v51 }
 0x1bf   :  { %1666 = vmatpush3.msra.mxu0 %v1515_v27 }
 0x1c0   :  { %1667 = vmatprep.subr.mxu0 %v1530_v28 }
 0x1c1   :  { %1668 = vmatpush3.msra.mxu0 %v1514_v29 }
 0x1c2   :  { %1669 = vmatprep.subr.mxu0 %v1529_v30 }
 0x1c3   :  { %1670 = vmatpush3.msra.mxu0 %v1513_v31 }
 0x1c4   :  { %1671 = vmatprep.subr.mxu0 %v1528_v32 }
 0x1c5   :  { %1672 = vmatpush3.msra.mxu0 %v1512_v33 }
 0x1de   :  { %v1006_v7 = vpop.f32.mrf.mxu0 }
 0x1df   :  { %v1007_v12 = vadd.f32 %v1006_v7, %v647_v8 }
 0x1e0   :  { %v1077_v10 = vpop.f32.mrf.mxu1  ;;  %v1008_v11 = vpop.f32.mrf.mxu0 }
 0x1e1   :  { %v1009_v13 = vadd.f32 %v1008_v11, %v651_v9  ;;  %v1078_v15 = vadd.f32 %v1077_v10, %v1007_v12 }
 0x1e2   :  { %v1079_v14 = vpop.f32.mrf.mxu1 }
 0x1e3   :  { %v1080_v18 = vadd.f32 %v1079_v14, %v1009_v13 }
 0x220   :  { %v1148_v16 = vpop.f32.mrf.mxu0 }
 0x221   :  { %v1219_v17 = vpop.f32.mrf.mxu1  ;;  %v1149_v19 = vadd.f32 %v1148_v16, %v1078_v15 }
 0x222   :  { %v1150_v20 = vpop.f32.mrf.mxu0 }
 0x223   :  { %v1151_v21 = vadd.f32 %v1150_v20, %v1080_v18  ;;  %v1220_v22 = vadd.f32 %v1219_v17, %v1149_v19  ;;  %v1221_v23 = vpop.f32.mrf.mxu1 }
 0x225   :  { %v1222_v24 = vadd.f32 %v1221_v23, %v1151_v21  ;;  %v1226_v26 = vmax.f32 %v1220_v22, 0.0 }
 0x227   :  { %v1227_v25 = vmax.f32 %v1222_v24, 0.0 }
 0x229   :  { %1503 = vmatprep.mubr.f32.mxu1 %v1227_v25 }
 0x22a   :  { %1504 = vmatmul.mubr.f32.vlgmr.msra.gmra.mxu1 %v1226_v26 }
 0x266   :  { %v1434_v35 = vpop.f32.mrf.mxu0 }
 0x267   :  { %v1435_v40 = vadd.f32 %v1434_v35, %v1361_v36 }
 0x268   :  { %v1436_v38 = vpop.f32.mrf.mxu0 }
 0x269   :  { %v1437_v42 = vadd.f32 %v1436_v38, %v1365_v37 }
 0x2ea   :  { %v1505_v41 = vpop.f32.mrf.mxu1 }
 0x2eb   :  { %v1506_v43 = vadd.f32 %v1505_v41, %v1435_v40 }
 0x2ec   :  { %v1507_v44 = vpop.f32.mrf.mxu1 }
 0x2ed   :  { %v1508_v45 = vadd.f32 %v1507_v44, %v1437_v42  ;;  %v1510_v47 = vmax.f32 %v1506_v43, 0.0 }
 0x2ef   :  { %v1511_v46 = vmax.f32 %v1508_v45, 0.0 }
 0x2f1   :  { %1615 = vmatprep.mubr.f32.mxu0 %v1511_v46 }
 0x2f2   :  { %1616 = vmatmul.mubr.f32.vlgmr.msra.gmra.mxu0 %v1510_v47 }
 0x3b2   :  { %v1673_v49 = vpop.f32.mrf.mxu0 }
 0x3b4   :  { %v1674_v52 = vpop.f32.mrf.mxu0 }
 0x3b5   :  { %v1675_v48 = vadd.f32 %v1674_v52, %v1673_v49 }
 0x3b7   :  { %v1618_v53 = vadd.f32 %v1675_v48, %v1640_v50 }
 0x3b9   :  { %1621 = vst [vmem:[#allocation14] sm:$0xff] %v1618_v53 }
 0x3ba   :  { %1849 = shalt.err (!%p1846_p11)
}
 0x3bb   :  { %1631 = dma.vmem_to_hbm [thread:$0]  %s1629_s6, 128, %s1973_s7, [#allocation4]  }
 0x3bc   :  { %1866 = dma.done.wait [#allocation4], 128  }
 0x3bd   :  { %1867 = vsyncadd [#allocation4], 4294967168 }
 0x3be   :  { %1635 = vsyncpa [#allocation3], 1 }
 0x3bf   :  { %1636 = vsyncpa [#allocation6], 1 }
 0x3c0   :  { %1637 = vsyncpa [#allocation9], 1 }
 0x3c1   :  { %1638 = vsyncpa [#allocation12], 1 }
 0x3c2   :  { %1639 = vsyncpa [#allocation4], 1 }

</bundles_post_ra>
